<compile_context>
chip_gen: v6e
topology: v6e:2x2x1
jax: 0.10.0
libtpu: 0.0.40
codegen_flags: <defaults>
</compile_context>

<pallas_src>
import functools

import jax
import jax.numpy as jnp
from jax.experimental import pallas as pl
from jax.experimental.pallas import tpu as pltpu

BN_EPS = 1e-5


def _round_up(x, m):
    return (x + m - 1) // m * m


def conv_stats_kernel(x_ref, w_ref, b_ref, y_ref, stats_ref, *, H, W, Cout):
    """Pass 1: 3x3 conv (+bias) for one image.

    Writes the raw conv output channel-major (Cout, H*W) and per-channel
    (sum, sum_sq) over this image's H*W positions (partial BN statistics).
    """
    HW = H * W
    cin_pad = x_ref.shape[-1]
    cout_pad = w_ref.shape[-1]

    acc = jnp.zeros((HW, cout_pad), jnp.float32)
    # 9 shifted views of the resident padded tile -> 9 MXU matmuls, f32 accum.
    for di in range(3):
        for dj in range(3):
            xs = x_ref[0, di:di + H, dj:dj + W, :].reshape(HW, cin_pad)
            acc = acc + jnp.dot(xs, w_ref[di * 3 + dj],
                                preferred_element_type=jnp.float32)
    yf = acc + b_ref[...]                       # (HW, cout_pad) f32

    # Partial BN statistics for this image (reduced across the grid outside,
    # giving exact global batch stats).
    s = jnp.sum(yf, axis=0, keepdims=True)
    ss = jnp.sum(yf * yf, axis=0, keepdims=True)
    stats_ref[...] = jnp.concatenate([s, ss], axis=0)[None]

    # Channel-major, lane-dense (lane dim = H*W) output; NCHW is then a free
    # reshape in the wrapper.
    yt = jnp.transpose(yf)                      # (cout_pad, HW)
    y_ref[...] = yt[:Cout, :][None]


def bn_relu_kernel(y_ref, scale_ref, shift_ref, o_ref):
    """Pass 2: y * scale + shift, ReLU. scale/shift fold mean/var/gamma/beta."""
    y = y_ref[...]                              # (1, Cout, HW) f32
    scale = scale_ref[...][None]                # (1, Cout, 1)
    shift = shift_ref[...][None]
    o_ref[...] = jnp.maximum(y * scale + shift, 0.0).astype(o_ref.dtype)


@jax.jit
def basic_conv2d(x, w, b, gamma, beta):
    """x: (N, Cin, H, W) f32; w: (Cout, Cin, 3, 3); b/gamma/beta: (Cout,)."""
    N, Cin, H, W = x.shape
    Cout = w.shape[0]
    HW = H * W
    M = N * HW

    cin_pad = max(8, _round_up(Cin, 8))       # sublane-aligned K per matmul
    cout_pad = _round_up(Cout, 128)           # lane-aligned accumulator / MXU N

    # ---- layout plumbing: one pass over x, no 9x im2col expansion ----------
    xp = jnp.pad(x, ((0, 0), (0, 0), (1, 1), (1, 1)))           # spatial pad
    xp = jnp.transpose(xp, (0, 2, 3, 1))                        # NCHW -> NHWC
    xp = jnp.pad(xp, ((0, 0), (0, 0), (0, 0), (0, cin_pad - Cin)))
    xp = xp.astype(jnp.bfloat16)                                # bf16 MXU input

    # (Cout, Cin, 3, 3) -> (9, cin_pad, cout_pad) bf16 (index = di*3 + dj).
    w9 = jnp.transpose(w, (2, 3, 1, 0)).reshape(9, Cin, Cout)
    w9 = jnp.pad(w9, ((0, 0), (0, cin_pad - Cin), (0, cout_pad - Cout)))
    w9 = w9.astype(jnp.bfloat16)
    b2 = jnp.pad(b, (0, cout_pad - Cout)).reshape(1, cout_pad).astype(jnp.float32)

    Hp, Wp = H + 2, W + 2
    kernel1 = functools.partial(conv_stats_kernel, H=H, W=W, Cout=Cout)
    flops = 2 * M * (9 * cin_pad) * cout_pad
    bytes_accessed = (xp.size * 2 + w9.size * 2
                      + N * Cout * HW * 4 + N * 2 * cout_pad * 4)

    y, stats = pl.pallas_call(
        kernel1,
        out_shape=(
            jax.ShapeDtypeStruct((N, Cout, HW), jnp.float32),     # raw conv+bias
            jax.ShapeDtypeStruct((N, 2, cout_pad), jnp.float32),  # sum / sum_sq
        ),
        grid=(N,),
        in_specs=[
            pl.BlockSpec((1, Hp, Wp, cin_pad), lambda n: (n, 0, 0, 0)),
            pl.BlockSpec((9, cin_pad, cout_pad), lambda n: (0, 0, 0)),
            pl.BlockSpec((1, cout_pad), lambda n: (0, 0)),
        ],
        out_specs=(
            pl.BlockSpec((1, Cout, HW), lambda n: (n, 0, 0)),
            pl.BlockSpec((1, 2, cout_pad), lambda n: (n, 0, 0)),
        ),
        compiler_params=pltpu.CompilerParams(
            dimension_semantics=("parallel",),
            vmem_limit_bytes=32 * 1024 * 1024),
        cost_estimate=pl.CostEstimate(flops=flops, transcendentals=0,
                                      bytes_accessed=bytes_accessed),
    )(xp, w9, b2)

    # ---- exact global batch stats (tiny cross-image reduction, f32) --------
    sums = jnp.sum(stats, axis=0)                       # (2, cout_pad)
    mean = sums[0, :Cout] / M
    var = sums[1, :Cout] / M - mean * mean              # biased, as BN training
    inv = jax.lax.rsqrt(var + BN_EPS)
    scale = (gamma * inv).reshape(Cout, 1).astype(jnp.float32)
    shift = (beta - mean * gamma * inv).reshape(Cout, 1).astype(jnp.float32)

    out = pl.pallas_call(
        bn_relu_kernel,
        out_shape=jax.ShapeDtypeStruct((N, Cout, HW), jnp.float32),
        grid=(N,),
        in_specs=[
            pl.BlockSpec((1, Cout, HW), lambda n: (n, 0, 0)),
            pl.BlockSpec((Cout, 1), lambda n: (0, 0)),
            pl.BlockSpec((Cout, 1), lambda n: (0, 0)),
        ],
        out_specs=pl.BlockSpec((1, Cout, HW), lambda n: (n, 0, 0)),
        compiler_params=pltpu.CompilerParams(
            dimension_semantics=("parallel",)),
    )(y, scale, shift)

    # Channel-major (N, Cout, H*W) -> NCHW is a pure reshape (no transpose).
    return out.reshape(N, Cout, H, W)


def _reference(x, w, b, gamma, beta):
    y = jax.lax.conv_general_dilated(
        x, w, window_strides=(1, 1), padding=((1, 1), (1, 1)),
        dimension_numbers=("NCHW", "OIHW", "NCHW"))
    y = y + b[None, :, None, None]
    mean = y.mean(axis=(0, 2, 3), keepdims=True)
    var = y.var(axis=(0, 2, 3), keepdims=True)
    y = (y - mean) * jax.lax.rsqrt(var + BN_EPS)
    y = y * gamma[None, :, None, None] + beta[None, :, None, None]
    return jnp.maximum(y, 0.0)


if __name__ == "__main__":
    key = jax.random.PRNGKey(0)
    k_x, k_w, k_b = jax.random.split(key, 3)

    N, Cin, H, W = 2, 4, 16, 16
    Cout = 8

    x = jax.random.normal(k_x, (N, Cin, H, W), dtype=jnp.float32)
    w = 0.1 * jax.random.normal(k_w, (Cout, Cin, 3, 3), dtype=jnp.float32)
    b = 0.1 * jax.random.normal(k_b, (Cout,), dtype=jnp.float32)
    gamma = jnp.ones((Cout,), dtype=jnp.float32)   # BN default init
    beta = jnp.zeros((Cout,), dtype=jnp.float32)

    out = basic_conv2d(x, w, b, gamma, beta)
    out = jax.block_until_ready(out)

    ref = _reference(x, w, b, gamma, beta)
    assert out.shape == (N, Cout, H, W)
    # bf16 MXU inputs (f32 accumulation) -> slightly looser tolerance vs f32 ref.
    assert jnp.allclose(out, ref, atol=3e-2, rtol=3e-2)

    print("KERNEL_OK")
</pallas_src>

<mosaic_0001>
module attributes {stable_mosaic.version = 11 : i64} {
  func.func @conv_stats_kernel(%arg0: i32, %arg1: memref<1x18x18x8xbf16, #tpu.memory_space<vmem>>, %arg2: memref<9x8x128xbf16, #tpu.memory_space<vmem>>, %arg3: memref<1x128xf32, #tpu.memory_space<vmem>>, %arg4: memref<1x8x256xf32, #tpu.memory_space<vmem>>, %arg5: memref<1x2x128xf32, #tpu.memory_space<vmem>>) attributes {dimension_semantics = [#tpu.dimension_semantics<parallel>], iteration_bounds = array<i64: 2>, scalar_prefetch = 0 : i64, scratch_operands = 0 : i64, tpu.core_type = #tpu.core_type<tc>, window_params = [{transform_indices = @transform_0, window_bounds = array<i64: 1, 18, 18, 8>}, {pipeline_mode = #tpu.pipeline_mode<synchronous>, transform_indices = @transform_1, window_bounds = array<i64: 9, 8, 128>}, {pipeline_mode = #tpu.pipeline_mode<synchronous>, transform_indices = @transform_2, window_bounds = array<i64: 1, 128>}, {transform_indices = @transform_3, window_bounds = array<i64: 1, 8, 256>}, {transform_indices = @transform_4, window_bounds = array<i64: 1, 2, 128>}]} {
    %cst = arith.constant 0.000000e+00 : f32
    %0 = vector.broadcast %cst : f32 to vector<256x128xf32>
    %c0 = arith.constant 0 : index
    %c0_0 = arith.constant 0 : index
    %c0_1 = arith.constant 0 : index
    %c0_2 = arith.constant 0 : index
    %1 = vector.load %arg1[%c0, %c0_0, %c0_1, %c0_2] : memref<1x18x18x8xbf16, #tpu.memory_space<vmem>>, vector<1x16x16x8xbf16>
    %2 = vector.shape_cast %1 : vector<1x16x16x8xbf16> to vector<16x16x8xbf16>
    %3 = vector.shape_cast %2 : vector<16x16x8xbf16> to vector<256x8xbf16>
    %c0_3 = arith.constant 0 : index
    %c0_4 = arith.constant 0 : index
    %c0_5 = arith.constant 0 : index
    %4 = vector.load %arg2[%c0_3, %c0_4, %c0_5] : memref<9x8x128xbf16, #tpu.memory_space<vmem>>, vector<1x8x128xbf16>
    %5 = vector.shape_cast %4 : vector<1x8x128xbf16> to vector<8x128xbf16>
    %cst_6 = arith.constant dense<0.000000e+00> : vector<256x128xf32>
    %6 = tpu.matmul %3, %5, %cst_6 {dimension_numbers = #tpu.dot_dimension_numbers<[1], [0], [0], [1], [0, 0, 1, 1], [], []>} : vector<256x8xbf16>, vector<8x128xbf16>, vector<256x128xf32> -> vector<256x128xf32>
    %7 = arith.addf %0, %6 : vector<256x128xf32>
    %c0_7 = arith.constant 0 : index
    %c0_8 = arith.constant 0 : index
    %c1 = arith.constant 1 : index
    %c0_9 = arith.constant 0 : index
    %8 = vector.load %arg1[%c0_7, %c0_8, %c1, %c0_9] : memref<1x18x18x8xbf16, #tpu.memory_space<vmem>>, vector<1x16x16x8xbf16>
    %9 = vector.shape_cast %8 : vector<1x16x16x8xbf16> to vector<16x16x8xbf16>
    %10 = vector.shape_cast %9 : vector<16x16x8xbf16> to vector<256x8xbf16>
    %c1_10 = arith.constant 1 : index
    %c0_11 = arith.constant 0 : index
    %c0_12 = arith.constant 0 : index
    %11 = vector.load %arg2[%c1_10, %c0_11, %c0_12] : memref<9x8x128xbf16, #tpu.memory_space<vmem>>, vector<1x8x128xbf16>
    %12 = vector.shape_cast %11 : vector<1x8x128xbf16> to vector<8x128xbf16>
    %cst_13 = arith.constant dense<0.000000e+00> : vector<256x128xf32>
    %13 = tpu.matmul %10, %12, %cst_13 {dimension_numbers = #tpu.dot_dimension_numbers<[1], [0], [0], [1], [0, 0, 1, 1], [], []>} : vector<256x8xbf16>, vector<8x128xbf16>, vector<256x128xf32> -> vector<256x128xf32>
    %14 = arith.addf %7, %13 : vector<256x128xf32>
    %c0_14 = arith.constant 0 : index
    %c0_15 = arith.constant 0 : index
    %c2 = arith.constant 2 : index
    %c0_16 = arith.constant 0 : index
    %15 = vector.load %arg1[%c0_14, %c0_15, %c2, %c0_16] : memref<1x18x18x8xbf16, #tpu.memory_space<vmem>>, vector<1x16x16x8xbf16>
    %16 = vector.shape_cast %15 : vector<1x16x16x8xbf16> to vector<16x16x8xbf16>
    %17 = vector.shape_cast %16 : vector<16x16x8xbf16> to vector<256x8xbf16>
    %c2_17 = arith.constant 2 : index
    %c0_18 = arith.constant 0 : index
    %c0_19 = arith.constant 0 : index
    %18 = vector.load %arg2[%c2_17, %c0_18, %c0_19] : memref<9x8x128xbf16, #tpu.memory_space<vmem>>, vector<1x8x128xbf16>
    %19 = vector.shape_cast %18 : vector<1x8x128xbf16> to vector<8x128xbf16>
    %cst_20 = arith.constant dense<0.000000e+00> : vector<256x128xf32>
    %20 = tpu.matmul %17, %19, %cst_20 {dimension_numbers = #tpu.dot_dimension_numbers<[1], [0], [0], [1], [0, 0, 1, 1], [], []>} : vector<256x8xbf16>, vector<8x128xbf16>, vector<256x128xf32> -> vector<256x128xf32>
    %21 = arith.addf %14, %20 : vector<256x128xf32>
    %c0_21 = arith.constant 0 : index
    %c1_22 = arith.constant 1 : index
    %c0_23 = arith.constant 0 : index
    %c0_24 = arith.constant 0 : index
    %22 = vector.load %arg1[%c0_21, %c1_22, %c0_23, %c0_24] : memref<1x18x18x8xbf16, #tpu.memory_space<vmem>>, vector<1x16x16x8xbf16>
    %23 = vector.shape_cast %22 : vector<1x16x16x8xbf16> to vector<16x16x8xbf16>
    %24 = vector.shape_cast %23 : vector<16x16x8xbf16> to vector<256x8xbf16>
    %c3 = arith.constant 3 : index
    %c0_25 = arith.constant 0 : index
    %c0_26 = arith.constant 0 : index
    %25 = vector.load %arg2[%c3, %c0_25, %c0_26] : memref<9x8x128xbf16, #tpu.memory_space<vmem>>, vector<1x8x128xbf16>
    %26 = vector.shape_cast %25 : vector<1x8x128xbf16> to vector<8x128xbf16>
    %cst_27 = arith.constant dense<0.000000e+00> : vector<256x128xf32>
    %27 = tpu.matmul %24, %26, %cst_27 {dimension_numbers = #tpu.dot_dimension_numbers<[1], [0], [0], [1], [0, 0, 1, 1], [], []>} : vector<256x8xbf16>, vector<8x128xbf16>, vector<256x128xf32> -> vector<256x128xf32>
    %28 = arith.addf %21, %27 : vector<256x128xf32>
    %c0_28 = arith.constant 0 : index
    %c1_29 = arith.constant 1 : index
    %c1_30 = arith.constant 1 : index
    %c0_31 = arith.constant 0 : index
    %29 = vector.load %arg1[%c0_28, %c1_29, %c1_30, %c0_31] : memref<1x18x18x8xbf16, #tpu.memory_space<vmem>>, vector<1x16x16x8xbf16>
    %30 = vector.shape_cast %29 : vector<1x16x16x8xbf16> to vector<16x16x8xbf16>
    %31 = vector.shape_cast %30 : vector<16x16x8xbf16> to vector<256x8xbf16>
    %c4 = arith.constant 4 : index
    %c0_32 = arith.constant 0 : index
    %c0_33 = arith.constant 0 : index
    %32 = vector.load %arg2[%c4, %c0_32, %c0_33] : memref<9x8x128xbf16, #tpu.memory_space<vmem>>, vector<1x8x128xbf16>
    %33 = vector.shape_cast %32 : vector<1x8x128xbf16> to vector<8x128xbf16>
    %cst_34 = arith.constant dense<0.000000e+00> : vector<256x128xf32>
    %34 = tpu.matmul %31, %33, %cst_34 {dimension_numbers = #tpu.dot_dimension_numbers<[1], [0], [0], [1], [0, 0, 1, 1], [], []>} : vector<256x8xbf16>, vector<8x128xbf16>, vector<256x128xf32> -> vector<256x128xf32>
    %35 = arith.addf %28, %34 : vector<256x128xf32>
    %c0_35 = arith.constant 0 : index
    %c1_36 = arith.constant 1 : index
    %c2_37 = arith.constant 2 : index
    %c0_38 = arith.constant 0 : index
    %36 = vector.load %arg1[%c0_35, %c1_36, %c2_37, %c0_38] : memref<1x18x18x8xbf16, #tpu.memory_space<vmem>>, vector<1x16x16x8xbf16>
    %37 = vector.shape_cast %36 : vector<1x16x16x8xbf16> to vector<16x16x8xbf16>
    %38 = vector.shape_cast %37 : vector<16x16x8xbf16> to vector<256x8xbf16>
    %c5 = arith.constant 5 : index
    %c0_39 = arith.constant 0 : index
    %c0_40 = arith.constant 0 : index
    %39 = vector.load %arg2[%c5, %c0_39, %c0_40] : memref<9x8x128xbf16, #tpu.memory_space<vmem>>, vector<1x8x128xbf16>
    %40 = vector.shape_cast %39 : vector<1x8x128xbf16> to vector<8x128xbf16>
    %cst_41 = arith.constant dense<0.000000e+00> : vector<256x128xf32>
    %41 = tpu.matmul %38, %40, %cst_41 {dimension_numbers = #tpu.dot_dimension_numbers<[1], [0], [0], [1], [0, 0, 1, 1], [], []>} : vector<256x8xbf16>, vector<8x128xbf16>, vector<256x128xf32> -> vector<256x128xf32>
    %42 = arith.addf %35, %41 : vector<256x128xf32>
    %c0_42 = arith.constant 0 : index
    %c2_43 = arith.constant 2 : index
    %c0_44 = arith.constant 0 : index
    %c0_45 = arith.constant 0 : index
    %43 = vector.load %arg1[%c0_42, %c2_43, %c0_44, %c0_45] : memref<1x18x18x8xbf16, #tpu.memory_space<vmem>>, vector<1x16x16x8xbf16>
    %44 = vector.shape_cast %43 : vector<1x16x16x8xbf16> to vector<16x16x8xbf16>
    %45 = vector.shape_cast %44 : vector<16x16x8xbf16> to vector<256x8xbf16>
    %c6 = arith.constant 6 : index
    %c0_46 = arith.constant 0 : index
    %c0_47 = arith.constant 0 : index
    %46 = vector.load %arg2[%c6, %c0_46, %c0_47] : memref<9x8x128xbf16, #tpu.memory_space<vmem>>, vector<1x8x128xbf16>
    %47 = vector.shape_cast %46 : vector<1x8x128xbf16> to vector<8x128xbf16>
    %cst_48 = arith.constant dense<0.000000e+00> : vector<256x128xf32>
    %48 = tpu.matmul %45, %47, %cst_48 {dimension_numbers = #tpu.dot_dimension_numbers<[1], [0], [0], [1], [0, 0, 1, 1], [], []>} : vector<256x8xbf16>, vector<8x128xbf16>, vector<256x128xf32> -> vector<256x128xf32>
    %49 = arith.addf %42, %48 : vector<256x128xf32>
    %c0_49 = arith.constant 0 : index
    %c2_50 = arith.constant 2 : index
    %c1_51 = arith.constant 1 : index
    %c0_52 = arith.constant 0 : index
    %50 = vector.load %arg1[%c0_49, %c2_50, %c1_51, %c0_52] : memref<1x18x18x8xbf16, #tpu.memory_space<vmem>>, vector<1x16x16x8xbf16>
    %51 = vector.shape_cast %50 : vector<1x16x16x8xbf16> to vector<16x16x8xbf16>
    %52 = vector.shape_cast %51 : vector<16x16x8xbf16> to vector<256x8xbf16>
    %c7 = arith.constant 7 : index
    %c0_53 = arith.constant 0 : index
    %c0_54 = arith.constant 0 : index
    %53 = vector.load %arg2[%c7, %c0_53, %c0_54] : memref<9x8x128xbf16, #tpu.memory_space<vmem>>, vector<1x8x128xbf16>
    %54 = vector.shape_cast %53 : vector<1x8x128xbf16> to vector<8x128xbf16>
    %cst_55 = arith.constant dense<0.000000e+00> : vector<256x128xf32>
    %55 = tpu.matmul %52, %54, %cst_55 {dimension_numbers = #tpu.dot_dimension_numbers<[1], [0], [0], [1], [0, 0, 1, 1], [], []>} : vector<256x8xbf16>, vector<8x128xbf16>, vector<256x128xf32> -> vector<256x128xf32>
    %56 = arith.addf %49, %55 : vector<256x128xf32>
    %c0_56 = arith.constant 0 : index
    %c2_57 = arith.constant 2 : index
    %c2_58 = arith.constant 2 : index
    %c0_59 = arith.constant 0 : index
    %57 = vector.load %arg1[%c0_56, %c2_57, %c2_58, %c0_59] : memref<1x18x18x8xbf16, #tpu.memory_space<vmem>>, vector<1x16x16x8xbf16>
    %58 = vector.shape_cast %57 : vector<1x16x16x8xbf16> to vector<16x16x8xbf16>
    %59 = vector.shape_cast %58 : vector<16x16x8xbf16> to vector<256x8xbf16>
    %c8 = arith.constant 8 : index
    %c0_60 = arith.constant 0 : index
    %c0_61 = arith.constant 0 : index
    %60 = vector.load %arg2[%c8, %c0_60, %c0_61] : memref<9x8x128xbf16, #tpu.memory_space<vmem>>, vector<1x8x128xbf16>
    %61 = vector.shape_cast %60 : vector<1x8x128xbf16> to vector<8x128xbf16>
    %cst_62 = arith.constant dense<0.000000e+00> : vector<256x128xf32>
    %62 = tpu.matmul %59, %61, %cst_62 {dimension_numbers = #tpu.dot_dimension_numbers<[1], [0], [0], [1], [0, 0, 1, 1], [], []>} : vector<256x8xbf16>, vector<8x128xbf16>, vector<256x128xf32> -> vector<256x128xf32>
    %63 = arith.addf %56, %62 : vector<256x128xf32>
    %c0_63 = arith.constant 0 : index
    %c0_64 = arith.constant 0 : index
    %64 = vector.load %arg3[%c0_63, %c0_64] : memref<1x128xf32, #tpu.memory_space<vmem>>, vector<1x128xf32>
    %65 = vector.broadcast %64 : vector<1x128xf32> to vector<256x128xf32>
    %66 = arith.addf %63, %65 : vector<256x128xf32>
    %cst_65 = arith.constant dense<0.000000e+00> : vector<128xf32>
    %67 = vector.multi_reduction <add>, %66, %cst_65 [0] : vector<256x128xf32> to vector<128xf32>
    %68 = vector.shape_cast %67 : vector<128xf32> to vector<1x128xf32>
    %69 = arith.mulf %66, %66 : vector<256x128xf32>
    %cst_66 = arith.constant dense<0.000000e+00> : vector<128xf32>
    %70 = vector.multi_reduction <add>, %69, %cst_66 [0] : vector<256x128xf32> to vector<128xf32>
    %71 = vector.shape_cast %70 : vector<128xf32> to vector<1x128xf32>
    %72 = tpu.concatenate %68, %71 in 0 : vector<1x128xf32>, vector<1x128xf32> -> vector<2x128xf32>
    %73 = vector.shape_cast %72 : vector<2x128xf32> to vector<1x2x128xf32>
    %c0_67 = arith.constant 0 : index
    %c0_68 = arith.constant 0 : index
    %c0_69 = arith.constant 0 : index
    %74 = vector.load %arg5[%c0_67, %c0_68, %c0_69] : memref<1x2x128xf32, #tpu.memory_space<vmem>>, vector<1x2x128xf32>
    tpu.vector_store %arg5[%c0_67, %c0_68, %c0_69], %73 {strides = array<i32>} : memref<1x2x128xf32, #tpu.memory_space<vmem>>, vector<1x2x128xf32>,
    %75 = tpu.transpose %66, [1, 0] : vector<256x128xf32> -> vector<128x256xf32>
    %76 = vector.extract_strided_slice %75 {offsets = [0, 0], sizes = [8, 256], strides = [1, 1]} : vector<128x256xf32> to vector<8x256xf32>
    %77 = vector.shape_cast %76 : vector<8x256xf32> to vector<1x8x256xf32>
    %c0_70 = arith.constant 0 : index
    %c0_71 = arith.constant 0 : index
    %c0_72 = arith.constant 0 : index
    %78 = vector.load %arg4[%c0_70, %c0_71, %c0_72] : memref<1x8x256xf32, #tpu.memory_space<vmem>>, vector<1x8x256xf32>
    tpu.vector_store %arg4[%c0_70, %c0_71, %c0_72], %77 {strides = array<i32>} : memref<1x8x256xf32, #tpu.memory_space<vmem>>, vector<1x8x256xf32>,
    return
  }
  func.func @transform_0(%arg0: i32) -> (i32, i32, i32, i32) {
    %c0_i32 = arith.constant 0 : i32
    %c0_i32_0 = arith.constant 0 : i32
    %c0_i32_1 = arith.constant 0 : i32
    %c0_i32_2 = arith.constant 0 : i32
    return %arg0, %c0_i32, %c0_i32_0, %c0_i32_1 : i32, i32, i32, i32
  }
  func.func @transform_1(%arg0: i32) -> (i32, i32, i32) {
    %c0_i32 = arith.constant 0 : i32
    %c0_i32_0 = arith.constant 0 : i32
    %c0_i32_1 = arith.constant 0 : i32
    %c0_i32_2 = arith.constant 0 : i32
    return %c0_i32, %c0_i32_0, %c0_i32_1 : i32, i32, i32
  }
  func.func @transform_2(%arg0: i32) -> (i32, i32) {
    %c0_i32 = arith.constant 0 : i32
    %c0_i32_0 = arith.constant 0 : i32
    %c0_i32_1 = arith.constant 0 : i32
    return %c0_i32, %c0_i32_0 : i32, i32
  }
  func.func @transform_3(%arg0: i32) -> (i32, i32, i32) {
    %c0_i32 = arith.constant 0 : i32
    %c0_i32_0 = arith.constant 0 : i32
    %c0_i32_1 = arith.constant 0 : i32
    return %arg0, %c0_i32, %c0_i32_0 : i32, i32, i32
  }
  func.func @transform_4(%arg0: i32) -> (i32, i32, i32) {
    %c0_i32 = arith.constant 0 : i32
    %c0_i32_0 = arith.constant 0 : i32
    %c0_i32_1 = arith.constant 0 : i32
    return %arg0, %c0_i32, %c0_i32_0 : i32, i32, i32
  }
}

module attributes {stable_mosaic.version = 11 : i64} {
  func.func @bn_relu_kernel(%arg0: i32, %arg1: memref<1x8x256xf32, #tpu.memory_space<vmem>>, %arg2: memref<8x1xf32, #tpu.memory_space<vmem>>, %arg3: memref<8x1xf32, #tpu.memory_space<vmem>>, %arg4: memref<1x8x256xf32, #tpu.memory_space<vmem>>) attributes {dimension_semantics = [#tpu.dimension_semantics<parallel>], iteration_bounds = array<i64: 2>, scalar_prefetch = 0 : i64, scratch_operands = 0 : i64, tpu.core_type = #tpu.core_type<tc>, window_params = [{transform_indices = @transform_0, window_bounds = array<i64: 1, 8, 256>}, {pipeline_mode = #tpu.pipeline_mode<synchronous>, transform_indices = @transform_1, window_bounds = array<i64: 8, 1>}, {pipeline_mode = #tpu.pipeline_mode<synchronous>, transform_indices = @transform_2, window_bounds = array<i64: 8, 1>}, {transform_indices = @transform_3, window_bounds = array<i64: 1, 8, 256>}]} {
    %c0 = arith.constant 0 : index
    %c0_0 = arith.constant 0 : index
    %c0_1 = arith.constant 0 : index
    %0 = vector.load %arg1[%c0, %c0_0, %c0_1] : memref<1x8x256xf32, #tpu.memory_space<vmem>>, vector<1x8x256xf32>
    %c0_2 = arith.constant 0 : index
    %c0_3 = arith.constant 0 : index
    %1 = vector.load %arg2[%c0_2, %c0_3] : memref<8x1xf32, #tpu.memory_space<vmem>>, vector<8x1xf32>
    %2 = vector.shape_cast %1 : vector<8x1xf32> to vector<1x8x1xf32>
    %c0_4 = arith.constant 0 : index
    %c0_5 = arith.constant 0 : index
    %3 = vector.load %arg3[%c0_4, %c0_5] : memref<8x1xf32, #tpu.memory_space<vmem>>, vector<8x1xf32>
    %4 = vector.shape_cast %3 : vector<8x1xf32> to vector<1x8x1xf32>
    %5 = vector.broadcast %2 : vector<1x8x1xf32> to vector<1x8x256xf32>
    %6 = arith.mulf %0, %5 : vector<1x8x256xf32>
    %7 = vector.broadcast %4 : vector<1x8x1xf32> to vector<1x8x256xf32>
    %8 = arith.addf %6, %7 : vector<1x8x256xf32>
    %cst = arith.constant 0.000000e+00 : f32
    %9 = vector.broadcast %cst : f32 to vector<1x8x256xf32>
    %10 = arith.maximumf %8, %9 : vector<1x8x256xf32>
    %c0_6 = arith.constant 0 : index
    %c0_7 = arith.constant 0 : index
    %c0_8 = arith.constant 0 : index
    %11 = vector.load %arg4[%c0_6, %c0_7, %c0_8] : memref<1x8x256xf32, #tpu.memory_space<vmem>>, vector<1x8x256xf32>
    tpu.vector_store %arg4[%c0_6, %c0_7, %c0_8], %10 {strides = array<i32>} : memref<1x8x256xf32, #tpu.memory_space<vmem>>, vector<1x8x256xf32>,
    return
  }
  func.func @transform_0(%arg0: i32) -> (i32, i32, i32) {
    %c0_i32 = arith.constant 0 : i32
    %c0_i32_0 = arith.constant 0 : i32
    %c0_i32_1 = arith.constant 0 : i32
    return %arg0, %c0_i32, %c0_i32_0 : i32, i32, i32
  }
  func.func @transform_1(%arg0: i32) -> (i32, i32) {
    %c0_i32 = arith.constant 0 : i32
    %c0_i32_0 = arith.constant 0 : i32
    %c0_i32_1 = arith.constant 0 : i32
    return %c0_i32, %c0_i32_0 : i32, i32
  }
  func.func @transform_2(%arg0: i32) -> (i32, i32) {
    %c0_i32 = arith.constant 0 : i32
    %c0_i32_0 = arith.constant 0 : i32
    %c0_i32_1 = arith.constant 0 : i32
    return %c0_i32, %c0_i32_0 : i32, i32
  }
  func.func @transform_3(%arg0: i32) -> (i32, i32, i32) {
    %c0_i32 = arith.constant 0 : i32
    %c0_i32_0 = arith.constant 0 : i32
    %c0_i32_1 = arith.constant 0 : i32
    return %arg0, %c0_i32, %c0_i32_0 : i32, i32, i32
  }
}

</mosaic_0001>

<bundles_post_ra>
// kernel: basic_conv2d.3
= control target key start
LH: loop header
LB: loop body
LE: loop exit
PB: predicated region body
PF: predicated region fallthrough
CT: control target
= control target key end

     0   :  { %s300_s12 = smov 0   ;;  %s323_s0 = inlined_call_operand.vmem [shape: f32[2,8,256], index: 0, kind: input, shape index: {}]   ;;  %s324_s1 = inlined_call_operand.vmem [shape: f32[8,1], index: 1, kind: input, shape index: {}]   ;;  %s325_s2 = inlined_call_operand.vmem [shape: f32[8,1], index: 2, kind: input, shape index: {}]   ;;  %s326_s3 = inlined_call_operand.vmem [shape: f32[2,8,256], index: 3, kind: output, shape index: {}]  }
   0x1 LB: > { %s248_s13 = sadd.s32 4294967295, %s277_s12   ;;  %p252_p0 = scmp.ge.s32.totalorder %s277_s12, 1  ;;  %s277_s12 = sphi %s300_s12, %s13_s12  }
   0x2   : > { %p137_p1 = scmp.lt.s32.totalorder %s277_s12, 3 }
   0x4   : > { %p138_p2 = pnand %p252_p0, %p137_p1 }
   0x5   : > { %p161_p3 = scmp.lt.s32.totalorder (!%p138_p2), %s248_s13, 1 }
   0x6   : > { %141 = sbr.rel (%p138_p2) target bundleno = 146 (0x92), region = 32 }
   0xb   : > { %v173_v0 = vld [vmem:[%s324_s1] sm:$0xff]  ;;  %v279_v1 = vmov 0   ;;  %s328_s13 = smov (!%p161_p3, %s248_s13), 1 }
   0xc   : > { %270 = vset.pattern.permute.xlu0 %v279_v1  ;;  %v174_v2 = vld [vmem:[%s325_s2] sm:$0xff]  ;;  %s259_s18 = sshll.u32 %s328_s13, 4 }
   0xd   : > { %177 = vperm.xlu0 %270, %v173_v0   ;;  %s165_s21 = scalar_lea.vmem %s323_s0, %s259_s18  ;;  %s170_s24 = scalar_lea.vmem %s326_s3, %s259_s18 }
   0xe   : > { %v171_v4 = vld [vmem:[%s165_s21] sm:$0xff]  ;;  %v172_v5 = vld [vmem:[%s165_s21 + $0x8] sm:$0xff] }
  0x11   : > { %184 = vperm.xlu0 %270, %v174_v2  }
  0x88   : > { %v178_v3 = vpop.permute.xlu0 %177 }
  0x89   : > { %v180_v6 = vmul.f32 %v178_v3, %v171_v4  ;;  %v181_v7 = vmul.f32 %v178_v3, %v172_v5 }
  0x8c   : > { %v185_v8 = vpop.permute.xlu0 %184 }
  0x8d   : > { %v187_v9 = vadd.f32 %v185_v8, %v180_v6  ;;  %v188_v10 = vadd.f32 %v185_v8, %v181_v7 }
  0x8f   : > { %v189_v11 = vmax.f32 %v187_v9, 0.0  ;;  %v190_v12 = vmax.f32 %v188_v10, 0.0 }
  0x91   : > { %191 = vst [vmem:[%s170_s24] sm:$0xff] %v189_v11  ;;  %192 = vst [vmem:[%s170_s24 + $0x8] sm:$0xff] %v190_v12 }
  0x92 PF: > { %s13_s12 = sadd.s32 1, %s277_s12  }
  0x93   : > { %p10_p4 = scmp.ge.s32.totalorder %s13_s12, 4  }
  0x95   :  { %12 = sbr.rel (!%p10_p4) target bundleno = 1 (0x1), region = 62 }

// kernel: basic_conv2d.2
= control target key start
LH: loop header
LB: loop body
LE: loop exit
PB: predicated region body
PF: predicated region fallthrough
CT: control target
= control target key end

     0   :  { %s6181_s15 = smov 0   ;;  %s8822_s0 = inlined_call_operand.vmem [shape: bf16[2,18,18,8], index: 0, kind: input, shape index: {}]   ;;  %s8823_s1 = inlined_call_operand.vmem [shape: bf16[9,8,128], index: 1, kind: input, shape index: {}]   ;;  %s8824_s2 = inlined_call_operand.vmem [shape: f32[1,128], index: 2, kind: input, shape index: {}]   ;;  %s8825_s3 = inlined_call_operand.vmem [shape: f32[2,8,256], index: 3, kind: output, shape index: {0}]   ;;  %s8826_s4 = inlined_call_operand.vmem [shape: f32[2,2,128], index: 4, kind: output, shape index: {1}]  }
   0x1 LB: > { %s5069_s16 = sadd.s32 4294967295, %s6154_s15   ;;  %p5073_p0 = scmp.ge.s32.totalorder %s6154_s15, 1  ;;  %s6154_s15 = sphi %s6181_s15, %s15_s15  }
   0x2   : > { %p165_p1 = scmp.lt.s32.totalorder %s6154_s15, 3 }
   0x4   : > { %p166_p2 = pnand %p5073_p0, %p165_p1 }
   0x6   : > { %169 = sbr.rel (%p166_p2) target bundleno = 652 (0x28c), region = 32 }
   0xb   : > { %v5078_v0 = vld [vmem:[%s8823_s1 + $0x4] sm:$0xf]  ;;  %vm745_vm0 = vcmask 1043456   ;;  %p195_p3 = scmp.lt.s32.totalorder %s5069_s16, 1  ;;  %v242_v2 = vld [vmem:[%s8823_s1] sm:$0xf] }
   0xc   : > { %6080 = vmatprep.subr.msk.bf16.mxu1 %vm745_vm0, %v5078_v0  ;;  %6079 = vmatprep.subr.msk.bf16.mxu0 %vm745_vm0, %v5078_v0  ;;  %v747_v1 = vsel %vm745_vm0, %v5078_v0, 0  ;;  %v5159_v3 = vld [vmem:[%s8823_s1 + $0x8] sm:$0xf]  ;;  %vm259_vm1 = vsmask.f32 3328  ;;  %v6212_v4 = vsel %vm745_vm0, %v242_v2, 0 }
   0xd   : > { %6078 = vmatpush3.bf16.msra.mxu1 %v747_v1  ;;  %5772 = vmatpush3.bf16.msra.mxu0 %v747_v1  ;;  %s9039_s16 = smov (!%p195_p3, %s5069_s16), 1  ;;  %vm260_vm2 = vsmask.f32 7440  ;;  %vm696_vm3 = vcmask 64512   ;;  %v6238_v16 = vsel %vm745_vm0, %v5159_v3, 0  ;;  %vm1250_vm5 = vcmask 1042432  }
   0xe   : > { %6081 = vmatprep.subr.msk.bf16.mxu1 %vm745_vm0, %v242_v2  ;;  %6082 = vmatprep.subr.msk.bf16.mxu0 %vm745_vm0, %v5159_v3  ;;  %s6089_s23 = smul.u32 216, %s9039_s16  ;;  %vm6253_vm4 = vmor %vm259_vm1, %vm260_vm2  ;;  %vm1251_vm6 = vcmask 1046532   ;;  %s5077_s17 = sshll.u32 %s9039_s16, 1  ;;  %vm4914_vm8 = vcmask 1040384  }
   0xf   : > { %vm6539_vm7 = vmor %vm1250_vm5, %vm1251_vm6  ;;  %s208_s20 = scalar_lea.vmem %s8826_s4, %s5077_s17  ;;  %s5617_s21 = sshll.u32 %s9039_s16, 4 }
  0x10   : > { %s6209_s26 = scalar_lea.vmem %s8822_s0, %s6089_s23  ;;  %s204_s24 = scalar_lea.vmem %s8825_s3, %s5617_s21 }
  0x11   : > { %v6215_v5 = vld [vmem:[%s6209_s26] sm:$0xf]  ;;  %v6218_v6 = vld [vmem:[%s6209_s26 + $0x4] sm:$0xf]  ;;  %v6221_v7 = vld [vmem:[%s6209_s26 + $0x8] sm:$0x1] }
  0x12   : > { %v263_v8 = vshrl.u32 %v6215_v5, 16  ;;  %v266_v9 = vshll.u32 %v6215_v5, 16  ;;  %v272_v10 = vshll.u32 %v6218_v6, 16  ;;  %v276_v11 = vshrl.u32 %v6218_v6, 16  ;;  %v6228_v12 = vld [vmem:[%s6209_s26 + $0x60] sm:$0xf] }
  0x13   : > { %v282_v13 = vshll.u32 %v6221_v7, 16  ;;  %v6232_v14 = vld [vmem:[%s6209_s26 + $0x64] sm:$0xf]  ;;  %v6235_v15 = vld [vmem:[%s6209_s26 + $0x68] sm:$0x1]  ;;  %v455_v22 = vshrl.u32 %v6228_v12, 16 }
  0x14   : > { %v265_v17 = vrot.slane %v263_v8, 4  ;;  %v268_v18 = vrot.slane %v266_v9, 5  ;;  %v274_v19 = vrot.slane %v272_v10, 5  ;;  %v278_v20 = vrot.slane %v276_v11, 4  ;;  %v6246_v29 = vld [vmem:[%s6209_s26 + $0xc] sm:$0xf] }
  0x15   : > { %v284_v21 = vrot.slane %v282_v13, 5  ;;  %v458_v23 = vshll.u32 %v6228_v12, 16  ;;  %v464_v24 = vshll.u32 %v6232_v14, 16  ;;  %v468_v27 = vshrl.u32 %v6232_v14, 16  ;;  %v6249_v30 = vld [vmem:[%s6209_s26 + $0x10] sm:$0xf] }
  0x16   : > { %v269_v25 = vor.u32 %v268_v18, %v265_v17  ;;  %v279_v26 = vor.u32 %v278_v20, %v274_v19  ;;  %v474_v28 = vshll.u32 %v6235_v15, 16  ;;  %v457_v33 = vrot.slane %v455_v22, 4  ;;  %v6259_v41 = vld [vmem:[%s6209_s26 + $0x14] sm:$0x1]  ;;  %v6270_v53 = vld [vmem:[%s6209_s26 + $0x6c] sm:$0xf] }
  0x17   : > { %v460_v34 = vrot.slane %v458_v23, 5  ;;  %v466_v35 = vrot.slane %v464_v24, 5  ;;  %v470_v38 = vrot.slane %v468_v27, 4  ;;  %v287_v42 = vshrl.u32 %v6246_v29, 16  ;;  %v6274_v58 = vld [vmem:[%s6209_s26 + $0x70] sm:$0xf] }
  0x18   : > { %v270_v36 = vrot.slane %v269_v25, 4  ;;  %v280_v37 = vrot.slane %v279_v26, 4  ;;  %v476_v39 = vrot.slane %v474_v28, 5  ;;  %v290_v43 = vshll.u32 %v6246_v29, 16  ;;  %v6282_v63 = vld [vmem:[%s6209_s26 + $0x74] sm:$0x1] }
  0x19   : > { %v461_v40 = vor.u32 %v460_v34, %v457_v33  ;;  %v296_v44 = vshll.u32 %v6249_v30, 16  ;;  %v471_v47 = vor.u32 %v470_v38, %v466_v35  ;;  %v300_v48 = vshrl.u32 %v6249_v30, 16  ;;  %v6288_v8 = vld [vmem:[%s6209_s26 + $0x18] sm:$0xf]  ;;  %v6301_v25 = vld [vmem:[%s6209_s26 + $0x20] sm:$0x1] }
  0x1a   : > { %v275_v45 = vsel %vm6253_vm4, %v270_v36, %v274_v19  ;;  %v285_v46 = vsel %vm6253_vm4, %v280_v37, %v284_v21  ;;  %v289_v51 = vrot.slane %v287_v42, 4  ;;  %v292_v52 = vrot.slane %v290_v43, 5  ;;  %v6295_v21 = vld [vmem:[%s6209_s26 + $0x1c] sm:$0xf] }
  0x1b   : > { %v5079_v49 = vcombine.low %v275_v45, %v285_v46  ;;  %v462_v50 = vrot.slane %v461_v40, 4  ;;  %v472_v54 = vrot.slane %v471_v47, 4  ;;  %v298_v55 = vrot.slane %v296_v44, 5  ;;  %v6314_v40 = vld [vmem:[%s8823_s1 + $0x10] sm:$0xf] }
  0x1c   : > { %v302_v56 = vrot.slane %v300_v48, 4  ;;  %v306_v57 = vshll.u32 %v6259_v41, 16  ;;  %v293_v60 = vor.u32 %v292_v52, %v289_v51  ;;  %v479_v3 = vshrl.u32 %v6270_v53, 16  ;;  %v6319_v46 = vld [vmem:[%s6209_s26 + $0x7c] sm:$0xf] }
  0x1d   : > { %5773 = vmatprep.mubr.msk.bf16.mxu0 %vm696_vm3, %v5079_v49  ;;  %v467_v59 = vsel %vm6253_vm4, %v462_v50, %v466_v35  ;;  %v477_v0 = vsel %vm6253_vm4, %v472_v54, %v476_v39  ;;  %v482_v11 = vshll.u32 %v6270_v53, 16  ;;  %v488_v13 = vshll.u32 %v6274_v58, 16  ;;  %v6308_v35 = vld [vmem:[%s6209_s26 + $0x78] sm:$0xf] }
  0x1e   : > { %v303_v1 = vor.u32 %v302_v56, %v298_v55  ;;  %v308_v2 = vrot.slane %v306_v57, 5  ;;  %v5087_v9 = vcombine.low %v467_v59, %v477_v0  ;;  %v294_v10 = vrot.slane %v293_v60, 4  ;;  %v6326_v56 = vld [vmem:[%s6209_s26 + $0x80] sm:$0x1] }
  0x1f   : > { %v481_v18 = vrot.slane %v479_v3, 4  ;;  %v492_v19 = vshrl.u32 %v6274_v58, 16  ;;  %v498_v20 = vshll.u32 %v6282_v63, 16  ;;  %v484_v23 = vrot.slane %v482_v11, 5  ;;  %8862 = vst [vmem:[#allocation2_spill] sm:$0xff] %v6326_v56 }
  0x20   : > { %v304_v17 = vrot.slane %v303_v1, 4  ;;  %5789 = vmatprep.mubr.msk.bf16.mxu1 %vm696_vm3, %v5087_v9  ;;  %v299_v22 = vsel %vm6253_vm4, %v294_v10, %v298_v55  ;;  %v490_v24 = vrot.slane %v488_v13, 5  ;;  %v311_v26 = vshrl.u32 %v6288_v8, 16  ;;  %v6332_v1 = vld [vmem:[%s6209_s26 + $0x24] sm:$0xf] }
  0x21   : > { %v494_v28 = vrot.slane %v492_v19, 4  ;;  %v500_v33 = vrot.slane %v498_v20, 5  ;;  %v314_v34 = vshll.u32 %v6288_v8, 16  ;;  %v485_v37 = vor.u32 %v484_v23, %v481_v18  ;;  %v6340_v10 = vld [vmem:[%s6209_s26 + $0x28] sm:$0xf] }
  0x22   : > { %v309_v27 = vsel %vm6253_vm4, %v304_v17, %v308_v2  ;;  %v313_v38 = vrot.slane %v311_v26, 4  ;;  %v320_v39 = vshll.u32 %v6295_v21, 16  ;;  %v324_v44 = vshrl.u32 %v6295_v21, 16  ;;  %v6346_v19 = vld [vmem:[%s8823_s1 + $0xc] sm:$0xf] }
  0x23   : > { %v5080_v36 = vcombine.low %v299_v22, %v309_v27  ;;  %v495_v42 = vor.u32 %v494_v28, %v490_v24  ;;  %v316_v43 = vrot.slane %v314_v34, 5  ;;  %v330_v45 = vshll.u32 %v6301_v25, 16 }
  0x24   : > { %v486_v47 = vrot.slane %v485_v37, 4  ;;  %v322_v48 = vrot.slane %v320_v39, 5  ;;  %v503_v49 = vshrl.u32 %v6308_v35, 16  ;;  %v506_v50 = vshll.u32 %v6308_v35, 16 }
  0x25   : > { %5774 = vmatmul.mubr.msk.bf16.vlgmr.msra.gmra.mxu0 %vm696_vm3, %v5080_v36  ;;  %v496_v51 = vrot.slane %v495_v42, 4  ;;  %v317_v52 = vor.u32 %v316_v43, %v313_v38  ;;  %v326_v54 = vrot.slane %v324_v44, 4  ;;  %v332_v55 = vrot.slane %v330_v45, 5  ;;  %v6358_v36 = vld [vmem:[%s6209_s26 + $0x84] sm:$0xf] }
  0x26   : > { %5840 = vmatpush3.bf16.msra.mxu0 %v6238_v16  ;;  %v491_v57 = vsel %vm6253_vm4, %v486_v47, %v490_v24  ;;  %v505_v59 = vrot.slane %v503_v49, 4  ;;  %v508_v60 = vrot.slane %v506_v50, 5  ;;  %v512_v0 = vshll.u32 %v6319_v46, 16  ;;  %v6351_v24 = vld [vmem:[%s6209_s26 + $0x2c] sm:$0x1] }
  0x27   : > { %6084 = vmatprep.subr.msk.bf16.mxu0 %vm745_vm0, %v6314_v40  ;;  %v501_v16 = vsel %vm6253_vm4, %v496_v51, %v500_v33  ;;  %v318_v2 = vrot.slane %v317_v52, 4  ;;  %v327_v3 = vor.u32 %v326_v54, %v322_v48  ;;  %v516_v9 = vshrl.u32 %v6319_v46, 16  ;;  %v6365_v43 = vld [vmem:[%s6209_s26 + $0x88] sm:$0xf]  ;;  %v6373_v51 = vld [vmem:[%s6209_s26 + $0x8c] sm:$0x1] }
  0x28   : > { %v5088_v11 = vcombine.low %v491_v57, %v501_v16  ;;  %v509_v13 = vor.u32 %v508_v60, %v505_v59  ;;  %v514_v17 = vrot.slane %v512_v0, 5  ;;  %v522_v18 = vshll.u32 %v6326_v56, 16  ;;  %8863 = vst [vmem:[#allocation3_spill] sm:$0xff] %v6373_v51  ;;  %v6381_v60 = vld [vmem:[%s6209_s26 + $0x30] sm:$0xf] }
  0x29   : > { %v323_v20 = vsel %vm6253_vm4, %v318_v2, %v322_v48  ;;  %v328_v22 = vrot.slane %v327_v3, 4  ;;  %v518_v23 = vrot.slane %v516_v9, 4  ;;  %v335_v26 = vshrl.u32 %v6332_v1, 16  ;;  %v6386_v9 = vld [vmem:[%s6209_s26 + $0x34] sm:$0xf] }
  0x2a   : > { %5790 = vmatmul.mubr.msk.bf16.vlgmr.msra.gmra.mxu1 %vm696_vm3, %v5088_v11  ;;  %v510_v27 = vrot.slane %v509_v13, 4  ;;  %v524_v28 = vrot.slane %v522_v18, 5  ;;  %v338_v33 = vshll.u32 %v6332_v1, 16  ;;  %v344_v34 = vshll.u32 %v6340_v10, 16 }
  0x2b   : > { %5806 = vmatpush3.bf16.msra.mxu1 %v6212_v4  ;;  %v333_v37 = vsel %vm6253_vm4, %v328_v22, %v332_v55  ;;  %v519_v38 = vor.u32 %v518_v23, %v514_v17  ;;  %v337_v39 = vrot.slane %v335_v26, 4  ;;  %v348_v42 = vshrl.u32 %v6340_v10, 16 }
  0x2c   : > { %v5081_v44 = vcombine.low %v323_v20, %v333_v37  ;;  %v515_v45 = vsel %vm6253_vm4, %v510_v27, %v514_v17  ;;  %v340_v47 = vrot.slane %v338_v33, 5  ;;  %v346_v48 = vrot.slane %v344_v34, 5  ;;  %6083 = vmatprep.subr.msk.bf16.mxu1 %vm745_vm0, %v6346_v19  ;;  %v6394_v33 = vld [vmem:[%s6209_s26 + $0x38] sm:$0x1] }
  0x2d   : > { %v520_v4 = vrot.slane %v519_v38, 4  ;;  %v350_v49 = vrot.slane %v348_v42, 4  ;;  %v354_v50 = vshll.u32 %v6351_v24, 16  ;;  %v527_v52 = vshrl.u32 %v6358_v36, 16  ;;  %v6399_v38 = vld [vmem:[%s6209_s26 + $0x90] sm:$0xf] }
  0x2e   : > { %5777 = vmatprep.mubr.msk.bf16.mxu0 %vm696_vm3, %v5081_v44  ;;  %v341_v54 = vor.u32 %v340_v47, %v337_v39  ;;  %v530_v55 = vshll.u32 %v6358_v36, 16  ;;  %v536_v57 = vshll.u32 %v6365_v43, 16  ;;  %v540_v59 = vshrl.u32 %v6365_v43, 16  ;;  %8864 = vst [vmem:[#allocation4_spill] sm:$0xff] %v6399_v38  ;;  %v6404_v47 = vld [vmem:[%s6209_s26 + $0x94] sm:$0xf] }
  0x2f   : > { %v525_v0 = vsel %vm6253_vm4, %v520_v4, %v524_v28  ;;  %v351_v16 = vor.u32 %v350_v49, %v346_v48  ;;  %v356_v2 = vrot.slane %v354_v50, 5  ;;  %v529_v3 = vrot.slane %v527_v52, 4  ;;  %8865 = vst [vmem:[#allocation5_spill] sm:$0xff] %v6404_v47 }
  0x30   : > { %v5089_v11 = vcombine.low %v515_v45, %v525_v0  ;;  %v342_v13 = vrot.slane %v341_v54, 4  ;;  %v532_v17 = vrot.slane %v530_v55, 5  ;;  %v538_v18 = vrot.slane %v536_v57, 5 }
  0x31   : > { %v352_v20 = vrot.slane %v351_v16, 4  ;;  %v542_v22 = vrot.slane %v540_v59, 4  ;;  %v546_v23 = vshll.u32 %v6373_v51, 16  ;;  %v359_v26 = vshrl.u32 %v6381_v60, 16  ;;  %v6413_v16 = vld [vmem:[%s6209_s26 + $0x98] sm:$0x1] }
  0x32   : > { %5793 = vmatprep.mubr.msk.bf16.mxu1 %vm696_vm3, %v5089_v11  ;;  %v347_v27 = vsel %vm6253_vm4, %v342_v13, %v346_v48  ;;  %v533_v28 = vor.u32 %v532_v17, %v529_v3  ;;  %v362_v34 = vshll.u32 %v6381_v60, 16  ;;  %v368_v37 = vshll.u32 %v6386_v9, 16  ;;  %8866 = vst [vmem:[#allocation6_spill] sm:$0xff] %v6413_v16  ;;  %v6418_v11 = vld [vmem:[%s6209_s26 + $0x3c] sm:$0xf] }
  0x33   : > { %v357_v39 = vsel %vm6253_vm4, %v352_v20, %v356_v2  ;;  %v543_v42 = vor.u32 %v542_v22, %v538_v18  ;;  %v548_v44 = vrot.slane %v546_v23, 5  ;;  %v361_v45 = vrot.slane %v359_v26, 4  ;;  %v6423_v23 = vld [vmem:[%s6209_s26 + $0x40] sm:$0xf]  ;;  %v1203_v51 = vld [vmem:[%s6209_s26 + $0xc] sm:$0xe] }
  0x34   : > { %v5082_v48 = vcombine.low %v347_v27, %v357_v39  ;;  %v534_v4 = vrot.slane %v533_v28, 4  ;;  %v364_v49 = vrot.slane %v362_v34, 5  ;;  %v370_v50 = vrot.slane %v368_v37, 5 }
  0x35   : > { %v544_v52 = vrot.slane %v543_v42, 4  ;;  %v372_v54 = vshrl.u32 %v6386_v9, 16  ;;  %v378_v55 = vshll.u32 %v6394_v33, 16  ;;  %v551_v57 = vshrl.u32 %v6399_v38, 16 }
  0x36   : > { %5778 = vmatmul.mubr.msk.bf16.gmra.mxu0 %vm696_vm3, %v5082_v48  ;;  %v539_v59 = vsel %vm6253_vm4, %v534_v4, %v538_v18  ;;  %v365_v0 = vor.u32 %v364_v49, %v361_v45  ;;  %v554_v2 = vshll.u32 %v6399_v38, 16  ;;  %v560_v3 = vshll.u32 %v6404_v47, 16  ;;  %v6432_v48 = vld [vmem:[%s6209_s26 + $0x44] sm:$0x1] }
  0x37   : > { %v549_v13 = vsel %vm6253_vm4, %v544_v52, %v548_v44  ;;  %v374_v17 = vrot.slane %v372_v54, 4  ;;  %v380_v20 = vrot.slane %v378_v55, 5  ;;  %v553_v22 = vrot.slane %v551_v57, 4  ;;  %v6437_v52 = vld [vmem:[%s6209_s26 + $0x9c] sm:$0xf] }
  0x38   : > { %v5090_v18 = vcombine.low %v539_v59, %v549_v13  ;;  %v366_v26 = vrot.slane %v365_v0, 4  ;;  %v556_v27 = vrot.slane %v554_v2, 5  ;;  %v562_v28 = vrot.slane %v560_v3, 5  ;;  %8867 = vst [vmem:[#allocation7_spill] sm:$0xff] %v6437_v52  ;;  %v6441_v13 = vld [vmem:[%s6209_s26 + $0xa0] sm:$0xf] }
  0x39   : > { %v375_v34 = vor.u32 %v374_v17, %v370_v50  ;;  %v564_v37 = vshrl.u32 %v6404_v47, 16  ;;  %v570_v39 = vshll.u32 %v6413_v16, 16  ;;  %v383_v42 = vshrl.u32 %v6418_v11, 16  ;;  %8868 = vst [vmem:[#allocation8_spill] sm:$0xff] %v6441_v13 }
  0x3a   : > { %5794 = vmatmul.mubr.msk.bf16.gmra.mxu1 %vm696_vm3, %v5090_v18  ;;  %v371_v44 = vsel %vm6253_vm4, %v366_v26, %v370_v50  ;;  %v557_v45 = vor.u32 %v556_v27, %v553_v22  ;;  %v386_v4 = vshll.u32 %v6418_v11, 16  ;;  %v392_v49 = vshll.u32 %v6423_v23, 16  ;;  %v6447_v26 = vld [vmem:[%s6209_s26 + $0xa4] sm:$0x1] }
  0x3b   : > { %v376_v54 = vrot.slane %v375_v34, 4  ;;  %v566_v55 = vrot.slane %v564_v37, 4  ;;  %v572_v57 = vrot.slane %v570_v39, 5  ;;  %v385_v59 = vrot.slane %v383_v42, 4  ;;  %8869 = vst [vmem:[#allocation9_spill] sm:$0xff] %v6447_v26 }
  0x3c   : > { %v558_v0 = vrot.slane %v557_v45, 4  ;;  %v388_v2 = vrot.slane %v386_v4, 5  ;;  %v394_v3 = vrot.slane %v392_v49, 5  ;;  %v396_v50 = vshrl.u32 %v6423_v23, 16  ;;  %v6451_v34 = vld [vmem:[%s6209_s26 + $0x48] sm:$0xf] }
  0x3d   : > { %v381_v17 = vsel %vm6253_vm4, %v376_v54, %v380_v20  ;;  %v567_v22 = vor.u32 %v566_v55, %v562_v28  ;;  %v402_v18 = vshll.u32 %v6432_v48, 16  ;;  %v575_v27 = vshrl.u32 %v6437_v52, 16 }
  0x3e   : > { %v5083_v37 = vcombine.low %v371_v44, %v381_v17  ;;  %v563_v39 = vsel %vm6253_vm4, %v558_v0, %v562_v28  ;;  %v389_v42 = vor.u32 %v388_v2, %v385_v59  ;;  %v398_v45 = vrot.slane %v396_v50, 4  ;;  %v6460_v17 = vld [vmem:[%s6209_s26 + $0x4c] sm:$0xf]  ;;  %v6466_v2 = vld [vmem:[%s6209_s26 + $0x50] sm:$0x1] }
  0x3f   : > { %v568_v4 = vrot.slane %v567_v22, 4  ;;  %v404_v49 = vrot.slane %v402_v18, 5  ;;  %v577_v20 = vrot.slane %v575_v27, 4  ;;  %v578_v54 = vshll.u32 %v6437_v52, 16 }
  0x40   : > { %5781 = vmatprep.mubr.msk.bf16.mxu0 %vm696_vm3, %v5083_v37  ;;  %v390_v55 = vrot.slane %v389_v42, 4  ;;  %v399_v62 = vor.u32 %v398_v45, %v394_v3  ;;  %v584_v32 = vshll.u32 %v6441_v13, 16  ;;  %v588_v44 = vshrl.u32 %v6441_v13, 16  ;;  %v6472_v42 = vld [vmem:[%s6209_s26 + $0xa8] sm:$0xf] }
  0x41   : > { %v573_v28 = vsel %vm6253_vm4, %v568_v4, %v572_v57  ;;  %v580_v59 = vrot.slane %v578_v54, 5  ;;  %v594_v0 = vshll.u32 %v6447_v26, 16  ;;  %v407_v50 = vshrl.u32 %v6451_v34, 16  ;;  %8870 = vst [vmem:[#allocation10_spill] sm:$0xff] %v6472_v42 }
  0x42   : > { %v5091_v22 = vcombine.low %v563_v39, %v573_v28  ;;  %v395_v18 = vsel %vm6253_vm4, %v390_v55, %v394_v3  ;;  %v400_v27 = vrot.slane %v399_v62, 4  ;;  %v586_v37 = vrot.slane %v584_v32, 5 }
  0x43   : > { %v581_v45 = vor.u32 %v580_v59, %v577_v20  ;;  %v590_v61 = vrot.slane %v588_v44, 4  ;;  %v596_v57 = vrot.slane %v594_v0, 5  ;;  %v409_v4 = vrot.slane %v407_v50, 4  ;;  %v6482_v44 = vld [vmem:[%s6209_s26 + $0xac] sm:$0xf] }
  0x44   : > { %5797 = vmatprep.mubr.msk.bf16.mxu1 %vm696_vm3, %v5091_v22  ;;  %v405_v54 = vsel %vm6253_vm4, %v400_v27, %v404_v49  ;;  %v410_v39 = vshll.u32 %v6451_v34, 16  ;;  %v416_v28 = vshll.u32 %v6460_v17, 16  ;;  %v420_v62 = vshrl.u32 %v6460_v17, 16  ;;  %8871 = vst [vmem:[#allocation11_spill] sm:$0xff] %v6482_v44  ;;  %v6485_v22 = vld [vmem:[%s6209_s26 + $0xb0] sm:$0x1] }
  0x45   : > { %v5084_v3 = vcombine.low %v395_v18, %v405_v54  ;;  %v582_v32 = vrot.slane %v581_v45, 4  ;;  %v591_v55 = vor.u32 %v590_v61, %v586_v37  ;;  %v426_v20 = vshll.u32 %v6466_v2, 16  ;;  %8872 = vst [vmem:[#allocation12_spill] sm:$0xff] %v6485_v22 }
  0x46   : > { %v412_v59 = vrot.slane %v410_v39, 5  ;;  %v418_v0 = vrot.slane %v416_v28, 5  ;;  %v422_v50 = vrot.slane %v420_v62, 4  ;;  %v599_v49 = vshrl.u32 %v6472_v42, 16  ;;  %v6494_v62 = vld [vmem:[%s6209_s26 + $0x54] sm:$0xf] }
  0x47   : > { %5782 = vmatmul.mubr.msk.bf16.gmra.mxu0 %vm696_vm3, %v5084_v3  ;;  %v587_v18 = vsel %vm6253_vm4, %v582_v32, %v586_v37  ;;  %v592_v27 = vrot.slane %v591_v55, 4  ;;  %v428_v61 = vrot.slane %v426_v20, 5  ;;  %v602_v45 = vshll.u32 %v6472_v42, 16  ;;  %v6501_v55 = vld [vmem:[%s6209_s26 + $0x58] sm:$0xf] }
  0x48   : > { %v413_v54 = vor.u32 %v412_v59, %v409_v4  ;;  %v423_v56 = vor.u32 %v422_v50, %v418_v0  ;;  %v601_v39 = vrot.slane %v599_v49, 4  ;;  %v608_v28 = vshll.u32 %v6482_v44, 16  ;;  %v6504_v49 = vld [vmem:[%s6209_s26 + $0x5c] sm:$0x1] }
  0x49   : > { %v597_v3 = vsel %vm6253_vm4, %v592_v27, %v596_v57  ;;  %v604_v26 = vrot.slane %v602_v45, 5  ;;  %v612_v37 = vshrl.u32 %v6482_v44, 16  ;;  %v618_v32 = vshll.u32 %v6485_v22, 16  ;;  %v1202_v22 = vld [vmem:[%s6209_s26] sm:$0xe] }
  0x4a   : > { %v5092_v4 = vcombine.low %v587_v18, %v597_v3  ;;  %v414_v20 = vrot.slane %v413_v54, 4  ;;  %v424_v59 = vrot.slane %v423_v56, 4  ;;  %v610_v50 = vrot.slane %v608_v28, 5  ;;  %v6515_v54 = vld [vmem:[%s6209_s26 + $0xb4] sm:$0xf] }
  0x4b   : > { %v605_v42 = vor.u32 %v604_v26, %v601_v39  ;;  %v614_v52 = vrot.slane %v612_v37, 4  ;;  %v620_v13 = vrot.slane %v618_v32, 5  ;;  %v431_v57 = vshrl.u32 %v6494_v62, 16  ;;  %8873 = vst [vmem:[#allocation13_spill] sm:$0xff] %v6515_v54  ;;  %v6518_v37 = vld [vmem:[%s6209_s26 + $0xb8] sm:$0xf] }
  0x4c   : > { %5798 = vmatmul.mubr.msk.bf16.gmra.mxu1 %vm696_vm3, %v5092_v4  ;;  %v419_v27 = vsel %vm6253_vm4, %v414_v20, %v418_v0  ;;  %v429_v18 = vsel %vm6253_vm4, %v424_v59, %v428_v61  ;;  %v434_v56 = vshll.u32 %v6494_v62, 16  ;;  %v440_v45 = vshll.u32 %v6501_v55, 16  ;;  %v6523_v61 = vld [vmem:[%s6209_s26 + $0xbc] sm:$0x1] }
  0x4d   : > { %v5085_v26 = vcombine.low %v419_v27, %v429_v18  ;;  %v606_v39 = vrot.slane %v605_v42, 4  ;;  %v615_v28 = vor.u32 %v614_v52, %v610_v50  ;;  %v433_v3 = vrot.slane %v431_v57, 4 }
  0x4e   : > { %v436_v32 = vrot.slane %v434_v56, 5  ;;  %v442_v4 = vrot.slane %v440_v45, 5  ;;  %v444_v0 = vshrl.u32 %v6501_v55, 16  ;;  %v450_v20 = vshll.u32 %v6504_v49, 16 }
  0x4f   : > { %5785 = vmatprep.mubr.msk.bf16.mxu0 %vm696_vm3, %v5085_v26  ;;  %v611_v59 = vsel %vm6253_vm4, %v606_v39, %v610_v50  ;;  %v616_v27 = vrot.slane %v615_v28, 4  ;;  %v623_v52 = vshrl.u32 %v6515_v54, 16  ;;  %v626_v42 = vshll.u32 %v6515_v54, 16 }
  0x50   : > { %v437_v57 = vor.u32 %v436_v32, %v433_v3  ;;  %v446_v18 = vrot.slane %v444_v0, 4  ;;  %v452_v56 = vrot.slane %v450_v20, 5  ;;  %v632_v45 = vshll.u32 %v6518_v37, 16 }
  0x51   : > { %v621_v44 = vsel %vm6253_vm4, %v616_v27, %v620_v13  ;;  %v625_v16 = vrot.slane %v623_v52, 4  ;;  %v628_v26 = vrot.slane %v626_v42, 5  ;;  %v636_v38 = vshrl.u32 %v6518_v37, 16 }
  0x52   : > { %v5093_v50 = vcombine.low %v611_v59, %v621_v44  ;;  %v438_v39 = vrot.slane %v437_v57, 4  ;;  %v447_v28 = vor.u32 %v446_v18, %v442_v4  ;;  %v634_v47 = vrot.slane %v632_v45, 5  ;;  %v1204_v57 = vld [vmem:[%s6209_s26 + $0x18] sm:$0xe] }
  0x53   : > { %v629_v54 = vor.u32 %v628_v26, %v625_v16  ;;  %v638_v3 = vrot.slane %v636_v38, 4  ;;  %v642_v32 = vshll.u32 %v6523_v61, 16  ;;  %v5143_v13 = vrot.slane %v1202_v22, 9 }
  0x54   : > { %5801 = vmatprep.mubr.msk.bf16.mxu1 %vm696_vm3, %v5093_v50  ;;  %v443_v44 = vsel %vm6253_vm4, %v438_v39, %v442_v4  ;;  %v448_v20 = vrot.slane %v447_v28, 4  ;;  %v1255_v59 = vrot.slane %v6218_v6, 5  ;;  %v5112_v38 = vcombine.low %v6246_v29, %v6249_v30 }
  0x55   : > { %v630_v16 = vrot.slane %v629_v54, 4  ;;  %v639_v27 = vor.u32 %v638_v3, %v634_v47  ;;  %v644_v52 = vrot.slane %v642_v32, 5  ;;  %v5144_v42 = vrot.slane %v1203_v51, 9 }
  0x56   : > { %v453_v18 = vsel %vm6253_vm4, %v448_v20, %v452_v56  ;;  %v1256_v22 = vsel %vm6539_vm7, %v5143_v13, %v1255_v59  ;;  %v1257_v45 = vrot.slane %v1255_v59, 4  ;;  %v8876_v4 = vrot.slane %v6249_v30, 5 }
  0x57   : > { %v5086_v50 = vcombine.low %v443_v44, %v453_v18  ;;  %v635_v54 = vsel %vm6253_vm4, %v630_v16, %v634_v47  ;;  %v640_v39 = vrot.slane %v639_v27, 4  ;;  %v5111_v51 = vcombine.low %v6215_v5, %v6218_v6  ;;  %v1205_v27 = vld [vmem:[%s6209_s26 + $0x24] sm:$0xe] }
  0x58   : > { %v1264_v26 = vrot.slane %v8876_v4, 4  ;;  %v8877_v28 = vrot.slane %v6221_v7, 5  ;;  %v8878_v3 = vmov %v8876_v4  ;;  %v5113_v13 = vcombine.low %v6288_v8, %v6295_v21  ;;  %v1207_v4 = vld [vmem:[%s6209_s26 + $0x3c] sm:$0xe] }
  0x59   : > { %v1263_v32 = vsel %vm6539_vm7, %v5144_v42, %v8878_v3  ;;  %v5145_v44 = vrot.slane %v1204_v57, 9  ;;  %5786 = vmatmul.mubr.msk.bf16.gmra.mxu0 %vm696_vm3, %v5086_v50  ;;  %v645_v47 = vsel %vm6253_vm4, %v640_v39, %v644_v52  ;;  %v8879_v6 = vrot.slane %v6259_v41, 5  ;;  %v1206_v42 = vld [vmem:[%s6209_s26 + $0x30] sm:$0xe]  ;;  %v1208_v39 = vld [vmem:[%s6209_s26 + $0x48] sm:$0xe] }
  0x5a   : > { %v1259_v56 = vsel %vm6539_vm7, %v1257_v45, %v8877_v28  ;;  %v1269_v20 = vrot.slane %v6295_v21, 5  ;;  %v5094_v59 = vcombine.low %v635_v54, %v645_v47  ;;  %v1272_v16 = vrot.slane %v6301_v25, 5  ;;  %v1209_v47 = vld [vmem:[%s6209_s26 + $0x54] sm:$0xe]  ;;  %v6834_v21 = vld [vmem:[%s6209_s26 + $0x2c] sm:$0x1] }
  0x5b   : > { %v5160_v5 = vcombine.low %v1256_v22, %v1259_v56  ;;  %v1266_v7 = vsel %vm6539_vm7, %v1264_v26, %v8879_v6  ;;  %v1823_v52 = vsel %vm745_vm0, %v6346_v19, 0  ;;  %v1276_v18 = vrot.slane %v6340_v10, 5 }
  0x5c   : > { %v1270_v41 = vsel %vm6539_vm7, %v5145_v44, %v1269_v20  ;;  %v1271_v57 = vrot.slane %v1269_v20, 4  ;;  %5802 = vmatmul.mubr.msk.bf16.gmra.mxu1 %vm696_vm3, %v5094_v59  ;;  %v5161_v22 = vcombine.low %v1263_v32, %v1266_v7  ;;  %v2549_v25 = vsel %vm745_vm0, %v6314_v40, 0 }
  0x5d   : > { %5841 = vmatprep.mubr.msk.bf16.mxu0 %vm696_vm3, %v5160_v5  ;;  %v1283_v45 = vrot.slane %v6386_v9, 5  ;;  %5807 = vmatprep.mubr.msk.bf16.mxu1 %vm696_vm3, %v5111_v51  ;;  %v5146_v26 = vrot.slane %v1205_v27, 9  ;;  %v1279_v50 = vrot.slane %v6351_v24, 5  ;;  %v5147_v54 = vrot.slane %v1206_v42, 9  ;;  %v6606_v24 = vld [vmem:[%s8823_s1 + $0x18] sm:$0xf] }
  0x5e   : > { %v1273_v19 = vsel %vm6539_vm7, %v1271_v57, %v1272_v16  ;;  %v1278_v56 = vrot.slane %v1276_v18, 4  ;;  %v1286_v32 = vrot.slane %v6394_v33, 5  ;;  %v5148_v44 = vrot.slane %v1207_v4, 9 }
  0x5f   : > { %v5162_v28 = vcombine.low %v1270_v41, %v1273_v19  ;;  %v1285_v3 = vrot.slane %v1283_v45, 4  ;;  %v1290_v40 = vrot.slane %v6423_v23, 5  ;;  %v1314_v5 = vrot.slane %v6235_v15, 5 }
  0x60   : > { %v1293_v51 = vrot.slane %v6432_v48, 5  ;;  %v5149_v6 = vrot.slane %v1208_v39, 9  ;;  %v1297_v7 = vrot.slane %v6460_v17, 5  ;;  %v5114_v33 = vcombine.low %v6332_v1, %v6340_v10  ;;  %v1210_v1 = vld [vmem:[%s6209_s26 + $0x60] sm:$0xe] }
  0x61   : > { %5842 = vmatmul.mubr.msk.bf16.vlgmr.msra.gmra.mxu0 %vm696_vm3, %v5161_v22  ;;  %v1277_v20 = vsel %vm6539_vm7, %v5146_v26, %v1276_v18  ;;  %v1292_v59 = vrot.slane %v1290_v40, 4  ;;  %v1300_v16 = vrot.slane %v6466_v2, 5  ;;  %v1280_v48 = vsel %vm6539_vm7, %v1278_v56, %v1279_v50  ;;  %v6634_v22 = vld [vmem:[%s8823_s1 + $0x14] sm:$0xf]  ;;  %v6659_v50 = vld [vmem:[%s6209_s26 + $0x6c] sm:$0xe] }
  0x62   : > { %5908 = vmatpush3.bf16.msra.mxu0 %v2549_v25  ;;  %5845 = vmatprep.mubr.msk.bf16.mxu0 %vm696_vm3, %v5162_v28  ;;  %v1284_v27 = vsel %vm6539_vm7, %v5147_v54, %v1283_v45  ;;  %v1287_v42 = vsel %vm6539_vm7, %v1285_v3, %v1286_v32  ;;  %v1299_v41 = vrot.slane %v1297_v7, 4  ;;  %v6624_v10 = vsel %vm6539_vm7, %v5148_v44, %v1290_v40  ;;  %v1213_v39 = vld [vmem:[%s6209_s26 + $0x84] sm:$0xe]  ;;  %v6688_v44 = vld [vmem:[%s6209_s26 + $0x78] sm:$0xe] }
  0x63   : > { %v6628_v2 = vsel %vm6539_vm7, %v5149_v6, %v1297_v7  ;;  %v5150_v57 = vrot.slane %v1209_v47, 9  ;;  %v1304_v18 = vrot.slane %v6501_v55, 5  ;;  %6086 = vmatprep.subr.msk.bf16.mxu0 %vm745_vm0, %v6606_v24  ;;  %v6644_v25 = vsel %vm6539_vm7, %v1292_v59, %v1293_v51  ;;  %v1214_v40 = vld [vmem:[%s6209_s26 + $0x90] sm:$0xe] }
  0x64   : > { %5808 = vmatmul.mubr.msk.bf16.vlgmr.msra.gmra.mxu1 %vm696_vm3, %v5112_v38  ;;  %v6648_v45 = vsel %vm6539_vm7, %v1299_v41, %v1300_v16  ;;  %v1307_v4 = vrot.slane %v6504_v49, 5  ;;  %v1311_v19 = vrot.slane %v6232_v14, 5  ;;  %v5163_v29 = vcombine.low %v1277_v20, %v1280_v48  ;;  %v8880_v48 = vld [vmem:[#allocation3_spill] sm:$0xff] }
  0x65   : > { %5874 = vmatpush3.bf16.msra.mxu1 %v1823_v52  ;;  %5811 = vmatprep.mubr.msk.bf16.mxu1 %vm696_vm3, %v5113_v13  ;;  %v5115_v30 = vcombine.low %v6381_v60, %v6386_v9  ;;  %v1306_v38 = vrot.slane %v1304_v18, 4  ;;  %v5151_v26 = vrot.slane %v1210_v1, 9  ;;  %v5164_v49 = vcombine.low %v1284_v27, %v1287_v42  ;;  %v1215_v42 = vld [vmem:[%s6209_s26 + $0x9c] sm:$0xe] }
  0x66   : > { %v5116_v52 = vcombine.low %v6418_v11, %v6423_v23  ;;  %v5117_v8 = vcombine.low %v6451_v34, %v6460_v17  ;;  %6085 = vmatprep.subr.msk.bf16.mxu1 %vm745_vm0, %v6634_v22  ;;  %v5165_v60 = vcombine.low %v6624_v10, %v6644_v25  ;;  %v5166_v9 = vcombine.low %v6628_v2, %v6648_v45  ;;  %v8881_v10 = vld [vmem:[#allocation5_spill] sm:$0xff]  ;;  %v8882_v2 = vld [vmem:[#allocation4_spill] sm:$0xff] }
  0x67   : > { %v1313_v54 = vrot.slane %v1311_v19, 4  ;;  %v6678_v28 = vsel %vm6539_vm7, %v5150_v57, %v1304_v18  ;;  %v6682_v56 = vsel %vm6539_vm7, %v1306_v38, %v1307_v4  ;;  %v5152_v32 = vrot.slane %v6659_v50, 9  ;;  %v1216_v18 = vld [vmem:[%s6209_s26 + $0xa8] sm:$0xe]  ;;  %v8884_v38 = vld [vmem:[#allocation8_spill] sm:$0xff] }
  0x68   : > { %v6694_v47 = vsel %vm6539_vm7, %v5151_v26, %v1311_v19  ;;  %v1318_v51 = vrot.slane %v6274_v58, 5  ;;  %v1321_v6 = vrot.slane %v6282_v63, 5  ;;  %v5154_v59 = vrot.slane %v1213_v39, 9  ;;  %v8883_v19 = vld [vmem:[#allocation6_spill] sm:$0xff]  ;;  %v8885_v26 = vld [vmem:[#allocation7_spill] sm:$0xff] }
  0x69   : > { %5846 = vmatmul.mubr.msk.bf16.gmra.mxu0 %vm696_vm3, %v5163_v29  ;;  %v1332_v16 = vrot.slane %v6365_v43, 5  ;;  %v1335_v27 = vrot.slane %v8880_v48, 5  ;;  %v5167_v41 = vcombine.low %v6678_v28, %v6682_v56  ;;  %v6712_v63 = vsel %vm6539_vm7, %v1313_v54, %v1314_v5  ;;  %v8887_v48 = vld [vmem:[#allocation11_spill] sm:$0xff] }
  0x6a   : > { %5849 = vmatprep.mubr.msk.bf16.mxu0 %vm696_vm3, %v5164_v49  ;;  %v5153_v1 = vrot.slane %v6688_v44, 9  ;;  %v5155_v4 = vrot.slane %v1214_v40, 9  ;;  %v1339_v15 = vrot.slane %v8881_v10, 5  ;;  %v1320_v5 = vrot.slane %v1318_v51, 4  ;;  %v5257_v57 = vld [vmem:[%s6209_s26 + $0xc] sm:$0xf] }
  0x6b   : > { %v6721_v25 = vsel %vm6539_vm7, %v5154_v59, %v1332_v16  ;;  %v1334_v45 = vrot.slane %v1332_v16, 4  ;;  %v1342_v29 = vrot.slane %v8883_v19, 5  ;;  %v5156_v49 = vrot.slane %v1215_v42, 9  ;;  %v8886_v59 = vld [vmem:[#allocation9_spill] sm:$0xff]  ;;  %v8888_v42 = vld [vmem:[#allocation10_spill] sm:$0xff] }
  0x6c   : > { %5812 = vmatmul.mubr.msk.bf16.gmra.mxu1 %vm696_vm3, %v5114_v33  ;;  %v1325_v33 = vrot.slane %v6319_v46, 5  ;;  %v6735_v39 = vsel %vm6539_vm7, %v5155_v4, %v1339_v15  ;;  %v1341_v44 = vrot.slane %v1339_v15, 4  ;;  %v1346_v40 = vrot.slane %v8884_v38, 5  ;;  %v8889_v15 = vld [vmem:[#allocation12_spill] sm:$0xff] }
  0x6d   : > { %5815 = vmatprep.mubr.msk.bf16.mxu1 %vm696_vm3, %v5115_v30  ;;  %v6731_v54 = vsel %vm6539_vm7, %v1334_v45, %v1335_v27  ;;  %v1349_v16 = vrot.slane %v8886_v59, 5  ;;  %v5157_v45 = vrot.slane %v1216_v18, 9  ;;  %v1353_v4 = vrot.slane %v8887_v48, 5 }
  0x6e   : > { %v6745_v27 = vsel %vm6539_vm7, %v1341_v44, %v1342_v29  ;;  %v1356_v50 = vrot.slane %v8889_v15, 5  ;;  %v6755_v19 = vsel %vm6539_vm7, %v5156_v49, %v1346_v40  ;;  %v1348_v7 = vrot.slane %v1346_v40, 4  ;;  %v8890_v29 = vld [vmem:[#allocation13_spill] sm:$0xff]  ;;  %v8891_v15 = vld [vmem:[#allocation2_spill] sm:$0xff]  ;;  %v6770_v49 = vld [vmem:[%s6209_s26 + $0x10] sm:$0xf] }
  0x6f   : > { %v6762_v18 = vsel %vm6539_vm7, %v5152_v32, %v1318_v51  ;;  %v6767_v59 = vsel %vm6539_vm7, %v5157_v45, %v1353_v4  ;;  %v1355_v30 = vrot.slane %v1353_v4, 4  ;;  %v5260_v40 = vld [vmem:[%s6209_s26 + $0x18] sm:$0xf]  ;;  %v1327_v20 = vrot.slane %v1325_v33, 4 }
  0x70   : > { %v2067_v44 = vshrl.u32 %v5257_v57, 16  ;;  %v2070_v32 = vshll.u32 %v5257_v57, 16  ;;  %v5168_v51 = vcombine.low %v6694_v47, %v6712_v63  ;;  %v6785_v45 = vsel %vm6539_vm7, %v1320_v5, %v1321_v6  ;;  %v1217_v57 = vld [vmem:[%s6209_s26 + $0xb4] sm:$0xe]  ;;  %v6806_v47 = vld [vmem:[%s6209_s26 + $0x14] sm:$0x1] }
  0x71   : > { %5850 = vmatmul.mubr.msk.bf16.gmra.mxu0 %vm696_vm3, %v5165_v60  ;;  %v1328_v60 = vrot.slane %v8891_v15, 5  ;;  %v6800_v11 = vsel %vm6539_vm7, %v5153_v1, %v1325_v33  ;;  %v2076_v6 = vshll.u32 %v6770_v49, 16  ;;  %v5261_v63 = vld [vmem:[%s6209_s26 + $0x1c] sm:$0xf]  ;;  %v2080_v17 = vshrl.u32 %v6770_v49, 16 }
  0x72   : > { %5853 = vmatprep.mubr.msk.bf16.mxu0 %vm696_vm3, %v5166_v9  ;;  %v6775_v9 = vsel %vm6539_vm7, %v1348_v7, %v1349_v16  ;;  %v6791_v7 = vsel %vm6539_vm7, %v1355_v30, %v1356_v50  ;;  %v2069_v5 = vrot.slane %v2067_v44, 4  ;;  %v2072_v34 = vrot.slane %v2070_v32, 5  ;;  %v5263_v15 = vld [vmem:[%s6209_s26 + $0x24] sm:$0xf]  ;;  %v6819_v44 = vld [vmem:[%s6209_s26 + $0x28] sm:$0xf] }
  0x73   : > { %v2091_v50 = vshrl.u32 %v5260_v40, 16  ;;  %v1329_v1 = vsel %vm6539_vm7, %v1327_v20, %v1328_v60  ;;  %v5158_v33 = vrot.slane %v1217_v57, 9  ;;  %v6814_v30 = vrot.slane %v2076_v6, 5 }
  0x74   : > { %5816 = vmatmul.mubr.msk.bf16.gmra.mxu1 %vm696_vm3, %v5116_v52  ;;  %v1360_v52 = vrot.slane %v6518_v37, 5  ;;  %v2094_v16 = vshll.u32 %v5260_v40, 16  ;;  %v1363_v23 = vrot.slane %v6523_v61, 5  ;;  %v2082_v4 = vrot.slane %v2080_v17, 4 }
  0x75   : > { %5819 = vmatprep.mubr.msk.bf16.mxu1 %vm696_vm3, %v5117_v8  ;;  %v5262_v8 = vld [vmem:[%s6209_s26 + $0x20] sm:$0x1]  ;;  %v2093_v3 = vrot.slane %v2091_v50, 4  ;;  %v2100_v13 = vshll.u32 %v5261_v63, 16  ;;  %v2086_v20 = vshll.u32 %v6806_v47, 16  ;;  %v2104_v57 = vshrl.u32 %v5261_v63, 16 }
  0x76   : > { %v1362_v32 = vrot.slane %v1360_v52, 4  ;;  %v2096_v60 = vrot.slane %v2094_v16, 5  ;;  %v5169_v61 = vcombine.low %v6762_v18, %v6785_v45  ;;  %v5170_v40 = vcombine.low %v6800_v11, %v1329_v1 }
  0x77   : > { %v2073_v6 = vor.u32 %v2072_v34, %v2069_v5  ;;  %v6830_v17 = vrot.slane %v2100_v13, 5  ;;  %v2083_v28 = vor.u32 %v2082_v4, %v6814_v30  ;;  %v2110_v50 = vshll.u32 %v5262_v8, 16  ;;  %v6857_v5 = vld [vmem:[%s6209_s26 + $0x34] sm:$0xf] }
  0x78   : > { %v2097_v56 = vor.u32 %v2096_v60, %v2093_v3  ;;  %v6842_v18 = vsel %vm6539_vm7, %v5158_v33, %v1360_v52  ;;  %v2115_v13 = vshrl.u32 %v5263_v15, 16  ;;  %v2118_v45 = vshll.u32 %v5263_v15, 16  ;;  %v5266_v52 = vld [vmem:[%s6209_s26 + $0x30] sm:$0xf] }
  0x79   : > { %5854 = vmatmul.mubr.msk.bf16.gmra.mxu0 %vm696_vm3, %v5167_v41  ;;  %v2106_v41 = vrot.slane %v2104_v57, 4  ;;  %v2124_v11 = vshll.u32 %v6819_v44, 16  ;;  %v8893_v3 = vcombine.low %v6228_v12, %v6232_v14  ;;  %v6851_v4 = vsel %vm6539_vm7, %v1362_v32, %v1363_v23 }
  0x7a   : > { %5857 = vmatprep.mubr.msk.bf16.mxu0 %vm696_vm3, %v5168_v51  ;;  %v8892_v51 = vcombine.low %v6494_v62, %v6501_v55  ;;  %v2088_v62 = vrot.slane %v2086_v20, 5  ;;  %v2128_v63 = vshrl.u32 %v6819_v44, 16  ;;  %v2074_v34 = vrot.slane %v2073_v6, 4 }
  0x7b   : > { %v2107_v55 = vor.u32 %v2106_v41, %v6830_v17  ;;  %v2117_v8 = vrot.slane %v2115_v13, 4  ;;  %v2120_v1 = vrot.slane %v2118_v45, 5  ;;  %v6859_v33 = vrot.slane %v2124_v11, 5  ;;  %v6865_v41 = vld [vmem:[%s6209_s26 + $0x38] sm:$0x1] }
  0x7c   : > { %5820 = vmatmul.mubr.msk.bf16.gmra.mxu1 %vm696_vm3, %v8892_v51  ;;  %v2084_v12 = vrot.slane %v2083_v28, 4  ;;  %v2098_v14 = vrot.slane %v2097_v56, 4  ;;  %v2112_v16 = vrot.slane %v2110_v50, 5  ;;  %v2130_v23 = vrot.slane %v2128_v63, 4  ;;  %v5269_v13 = vld [vmem:[%s6209_s26 + $0x3c] sm:$0xf] }
  0x7d   : > { %5823 = vmatprep.mubr.msk.bf16.mxu1 %vm696_vm3, %v8893_v3  ;;  %v2108_v15 = vrot.slane %v2107_v55, 4  ;;  %v2134_v32 = vshll.u32 %v6834_v21, 16  ;;  %v2139_v20 = vshrl.u32 %v5266_v52, 16  ;;  %v2142_v60 = vshll.u32 %v5266_v52, 16 }
  0x7e   : > { %v2121_v57 = vor.u32 %v2120_v1, %v2117_v8  ;;  %v2131_v6 = vor.u32 %v2130_v23, %v6859_v33  ;;  %v2148_v28 = vshll.u32 %v6857_v5, 16  ;;  %v2152_v56 = vshrl.u32 %v6857_v5, 16  ;;  %v5272_v8 = vld [vmem:[%s6209_s26 + $0x48] sm:$0xf]  ;;  %v6892_v1 = vld [vmem:[%s6209_s26 + $0x4c] sm:$0xf] }
  0x7f   : > { %v2141_v50 = vrot.slane %v2139_v20, 4  ;;  %v2144_v51 = vrot.slane %v2142_v60, 5  ;;  %v8894_v3 = vcombine.low %v6270_v53, %v6274_v58  ;;  %v5175_v55 = vcombine.low %v6842_v18, %v6851_v4 }
  0x80   : > { %v6871_v45 = vrot.slane %v2148_v28, 5  ;;  %v2154_v11 = vrot.slane %v2152_v56, 4  ;;  %v2089_v63 = vsel %vm6253_vm4, %v2084_v12, %v2088_v62  ;;  %v2103_v52 = vsel %vm6253_vm4, %v2098_v14, %v6830_v17 }
  0x81   : > { %5858 = vmatmul.mubr.msk.bf16.gmra.mxu0 %vm696_vm3, %v5169_v61  ;;  %v6874_v61 = vld [vmem:[%s6209_s26 + $0x40] sm:$0xf]  ;;  %v8895_v53 = vcombine.low %v6308_v35, %v6319_v46  ;;  %v2113_v58 = vsel %vm6253_vm4, %v2108_v15, %v2112_v16  ;;  %v2122_v23 = vrot.slane %v2121_v57, 4  ;;  %v2145_v20 = vor.u32 %v2144_v51, %v2141_v50  ;;  %v6926_v50 = vld [vmem:[%s6209_s26 + $0x44] sm:$0x1] }
  0x82   : > { %5861 = vmatprep.mubr.msk.bf16.mxu0 %vm696_vm3, %v5170_v40  ;;  %v2079_v40 = vsel %vm6253_vm4, %v2074_v34, %v6814_v30  ;;  %v2132_v30 = vrot.slane %v2131_v6, 4  ;;  %v2136_v34 = vrot.slane %v2134_v32, 5  ;;  %v2158_v62 = vshll.u32 %v6865_v41, 16  ;;  %v5275_v51 = vld [vmem:[%s6209_s26 + $0x54] sm:$0xf] }
  0x83   : > { %v2163_v12 = vshrl.u32 %v5269_v13, 16  ;;  %v2166_v17 = vshll.u32 %v5269_v13, 16  ;;  %v6903_v14 = vsel %vm745_vm0, %v6634_v22, 0  ;;  %v2155_v35 = vor.u32 %v2154_v11, %v6871_v45 }
  0x84   : > { %5824 = vmatmul.mubr.msk.bf16.gmra.mxu1 %vm696_vm3, %v8894_v3  ;;  %v2172_v46 = vshll.u32 %v6874_v61, 16  ;;  %v2176_v16 = vshrl.u32 %v6874_v61, 16  ;;  %v6908_v15 = vcombine.low %v2079_v40, %v2089_v63  ;;  %v6912_v32 = vsel %vm745_vm0, %v6606_v24, 0  ;;  %v6935_v40 = vld [vmem:[%s6209_s26 + $0x58] sm:$0xf] }
  0x85   : > { %5827 = vmatprep.mubr.msk.bf16.mxu1 %vm696_vm3, %v8895_v53  ;;  %v2187_v60 = vshrl.u32 %v5272_v8, 16  ;;  %v2190_v57 = vshll.u32 %v5272_v8, 16  ;;  %v8896_v6 = vcombine.low %v6721_v25, %v6731_v54  ;;  %v6918_v22 = vcombine.low %v2103_v52, %v2113_v58  ;;  %v6940_v8 = vld [vmem:[%s6209_s26 + $0x50] sm:$0x1] }
  0x86   : > { %v2127_v28 = vsel %vm6253_vm4, %v2122_v23, %v6859_v33  ;;  %v2137_v56 = vsel %vm6253_vm4, %v2132_v30, %v2136_v34  ;;  %v2196_v24 = vshll.u32 %v6892_v1, 16  ;;  %v8897_v25 = vcombine.low %v6735_v39, %v6745_v27  ;;  %v5278_v34 = vld [vmem:[%s6209_s26 + $0x60] sm:$0xf] }
  0x87   : > { %v2146_v54 = vrot.slane %v2145_v20, 4  ;;  %v2160_v13 = vrot.slane %v2158_v62, 5  ;;  %v2165_v11 = vrot.slane %v2163_v12, 4  ;;  %v2168_v3 = vrot.slane %v2166_v17, 5 }
  0x88   : > { %v2156_v33 = vrot.slane %v2155_v35, 4  ;;  %v6937_v63 = vrot.slane %v2172_v46, 5  ;;  %v2178_v52 = vrot.slane %v2176_v16, 4  ;;  %v2200_v53 = vshrl.u32 %v6892_v1, 16  ;;  %v6957_v35 = vld [vmem:[%s6209_s26 + $0x5c] sm:$0x1] }
  0x89   : > { %5862 = vmatmul.mubr.msk.bf16.gmra.mxu0 %vm696_vm3, %v8896_v6  ;;  %v8898_v39 = vcombine.low %v6358_v36, %v6365_v43  ;;  %v2189_v27 = vrot.slane %v2187_v60, 4  ;;  %v2192_v58 = vrot.slane %v2190_v57, 5  ;;  %v2211_v23 = vshrl.u32 %v5275_v51, 16 }
  0x8a   : > { %5865 = vmatprep.mubr.msk.bf16.mxu0 %vm696_vm3, %v8897_v25  ;;  %v2214_v30 = vshll.u32 %v5275_v51, 16  ;;  %v8899_v20 = vcombine.low %v8882_v2, %v8881_v10  ;;  %v6952_v62 = vcombine.low %v2127_v28, %v2137_v56  ;;  %v6954_v12 = vrot.slane %v2196_v24, 5  ;;  %v6970_v28 = vld [vmem:[%s6209_s26 + $0x64] sm:$0xf] }
  0x8b   : > { %v2202_v17 = vrot.slane %v2200_v53, 4  ;;  %v2220_v36 = vshll.u32 %v6935_v40, 16  ;;  %v2182_v43 = vshll.u32 %v6926_v50, 16  ;;  %v2213_v46 = vrot.slane %v2211_v23, 4 }
  0x8c   : > { %5828 = vmatmul.mubr.msk.bf16.gmra.mxu1 %vm696_vm3, %v8898_v39  ;;  %v2216_v16 = vrot.slane %v2214_v30, 5  ;;  %v2224_v60 = vshrl.u32 %v6935_v40, 16  ;;  %v2151_v10 = vsel %vm6253_vm4, %v2146_v54, %v6871_v45  ;;  %v2161_v2 = vsel %vm6253_vm4, %v2156_v33, %v2160_v13  ;;  %v6992_v30 = vld [vmem:[%s6209_s26 + $0x68] sm:$0x1] }
  0x8d   : > { %5831 = vmatprep.mubr.msk.bf16.mxu1 %vm696_vm3, %v8899_v20  ;;  %v2169_v57 = vor.u32 %v2168_v3, %v2165_v11  ;;  %v6967_v6 = vrot.slane %v2220_v36, 5  ;;  %v2179_v56 = vor.u32 %v2178_v52, %v6937_v63  ;;  %v2193_v24 = vor.u32 %v2192_v58, %v2189_v27  ;;  %v5281_v3 = vld [vmem:[%s6209_s26 + $0x6c] sm:$0xf]  ;;  %v6989_v27 = vld [vmem:[%s6209_s26 + $0x70] sm:$0xf] }
  0x8e   : > { %v2206_v51 = vshll.u32 %v6940_v8, 16  ;;  %v2226_v25 = vrot.slane %v2224_v60, 4  ;;  %v8900_v53 = vcombine.low %v6755_v19, %v6775_v9  ;;  %v2203_v45 = vor.u32 %v2202_v17, %v6954_v12 }
  0x8f   : > { %v2217_v54 = vor.u32 %v2216_v16, %v2213_v46  ;;  %v2235_v13 = vshrl.u32 %v5278_v34, 16  ;;  %v2238_v11 = vshll.u32 %v5278_v34, 16  ;;  %v8901_v33 = vcombine.low %v6767_v59, %v6791_v7  ;;  %v5284_v16 = vld [vmem:[%s6209_s26 + $0x78] sm:$0xf] }
  0x90   : > { %v2227_v52 = vor.u32 %v2226_v25, %v6967_v6  ;;  %v2230_v39 = vshll.u32 %v6957_v35, 16  ;;  %v2244_v19 = vshll.u32 %v6970_v28, 16  ;;  %v2248_v9 = vshrl.u32 %v6970_v28, 16 }
  0x91   : > { %5866 = vmatmul.mubr.msk.bf16.gmra.mxu0 %vm696_vm3, %v8900_v53  ;;  %v2170_v58 = vrot.slane %v2169_v57, 4  ;;  %v2184_v23 = vrot.slane %v2182_v43, 5  ;;  %v2237_v34 = vrot.slane %v2235_v13, 4  ;;  %v2240_v20 = vrot.slane %v2238_v11, 5 }
  0x92   : > { %5869 = vmatprep.mubr.msk.bf16.mxu0 %vm696_vm3, %v8901_v33  ;;  %v8902_v59 = vcombine.low %v8885_v26, %v8884_v38  ;;  %v6998_v7 = vcombine.low %v2151_v10, %v2161_v2  ;;  %v2180_v17 = vrot.slane %v2179_v56, 4  ;;  %v2194_v36 = vrot.slane %v2193_v24, 4  ;;  %v7008_v2 = vld [vmem:[%s6209_s26 + $0x7c] sm:$0xf] }
  0x93   : > { %v7000_v46 = vrot.slane %v2244_v19, 5  ;;  %v8903_v43 = vcombine.low %v8888_v42, %v8887_v48  ;;  %v2204_v60 = vrot.slane %v2203_v45, 4  ;;  %v2208_v57 = vrot.slane %v2206_v51, 5  ;;  %8904 = vst [vmem:[#allocation3_spill] sm:$0xff] %v7008_v2  ;;  %v5287_v19 = vld [vmem:[%s6209_s26 + $0x84] sm:$0xf] }
  0x94   : > { %5832 = vmatmul.mubr.msk.bf16.gmra.mxu1 %vm696_vm3, %v8902_v59  ;;  %v2218_v25 = vrot.slane %v2217_v54, 4  ;;  %v2250_v38 = vrot.slane %v2248_v9, 4  ;;  %v2228_v26 = vrot.slane %v2227_v52, 4  ;;  %v2232_v53 = vrot.slane %v2230_v39, 5 }
  0x95   : > { %5835 = vmatprep.mubr.msk.bf16.mxu1 %vm696_vm3, %v8903_v43  ;;  %v2241_v13 = vor.u32 %v2240_v20, %v2237_v34  ;;  %v2259_v10 = vshrl.u32 %v5281_v3, 16  ;;  %v2175_v56 = vsel %vm6253_vm4, %v2170_v58, %v6937_v63  ;;  %v2262_v24 = vshll.u32 %v5281_v3, 16  ;;  %v6114_v63 = vld [vmem:[%s6209_s26 + $0xc] sm:$0xff]   ;;  %v7042_v34 = vld [vmem:[%s6209_s26 + $0x88] sm:$0xf] }
  0x96   : > { %v2268_v48 = vshll.u32 %v6989_v27, 16  ;;  %v2272_v42 = vshrl.u32 %v6989_v27, 16  ;;  %v2185_v51 = vsel %vm6253_vm4, %v2180_v17, %v2184_v23  ;;  %v2199_v45 = vsel %vm6253_vm4, %v2194_v36, %v6954_v12  ;;  %8905 = vst [vmem:[#allocation5_spill] sm:$0xff] %v7042_v34  ;;  %v7051_v36 = vld [vmem:[%s6209_s26 + $0x74] sm:$0x1] }
  0x97   : > { %v2251_v54 = vor.u32 %v2250_v38, %v7000_v46  ;;  %v2254_v11 = vshll.u32 %v6992_v30, 16  ;;  %v2209_v3 = vsel %vm6253_vm4, %v2204_v60, %v2208_v57  ;;  %v2223_v33 = vsel %vm6253_vm4, %v2218_v25, %v6967_v6  ;;  %8907 = vst [vmem:[#allocation4_spill] sm:$0xff] %v7051_v36  ;;  %v7061_v38 = vld [vmem:[%s6209_s26 + $0x80] sm:$0x1] }
  0x98   : > { %v2283_v52 = vshrl.u32 %v5284_v16, 16  ;;  %v2286_v12 = vshll.u32 %v5284_v16, 16  ;;  %v2233_v18 = vsel %vm6253_vm4, %v2228_v26, %v2232_v53  ;;  %v2242_v4 = vrot.slane %v2241_v13, 4  ;;  %8908 = vst [vmem:[#allocation6_spill] sm:$0xff] %v7061_v38  ;;  %v7064_v26 = vld [vmem:[%s6209_s26 + $0x8c] sm:$0x1] }
  0x99   : > { %5870 = vmatmul.mubr.msk.bf16.gmra.mxu0 %vm696_vm3, %v5175_v55  ;;  %v2261_v55 = vrot.slane %v2259_v10, 4  ;;  %v2292_v39 = vshll.u32 %v7008_v2, 16  ;;  %v2264_v9 = vrot.slane %v2262_v24, 5  ;;  %v7038_v58 = vrot.slane %v2268_v48, 5  ;;  %8909 = vst [vmem:[#allocation8_spill] sm:$0xff] %v7064_v26  ;;  %v6115_v10 = vld [vmem:[%s6209_s26 + $0x18] sm:$0xff]  }
  0x9a   : > { %5909 = vmatprep.mubr.msk.bf16.mxu0 %vm696_vm3, %v6908_v15  ;;  %v2274_v23 = vrot.slane %v2272_v42, 4  ;;  %v2296_v6 = vshrl.u32 %v7008_v2, 16  ;;  %v8906_v15 = vcombine.low %v8890_v29, %v6518_v37  ;;  %v7048_v20 = vcombine.low %v2175_v56, %v2185_v51  ;;  %v5290_v51 = vld [vmem:[%s6209_s26 + $0x90] sm:$0xf] }
  0x9b   : > { %v2252_v59 = vrot.slane %v2251_v54, 4  ;;  %v2256_v17 = vrot.slane %v2254_v11, 5  ;;  %v2285_v16 = vrot.slane %v2283_v52, 4  ;;  %v2288_v43 = vrot.slane %v2286_v12, 5 }
  0x9c   : > { %5836 = vmatmul.mubr.msk.bf16.gmra.mxu1 %vm696_vm3, %v8906_v15  ;;  %v7054_v60 = vrot.slane %v2292_v39, 5  ;;  %v2298_v57 = vrot.slane %v2296_v6, 4  ;;  %v2307_v25 = vshrl.u32 %v5287_v19, 16  ;;  %v7056_v37 = vcombine.low %v2199_v45, %v2209_v3  ;;  %v7075_v45 = vld [vmem:[%s6209_s26 + $0x94] sm:$0xf] }
  0x9d   : > { %5875 = vmatprep.mubr.msk.bf16.mxu1 %vm696_vm3, %v6114_v63  ;;  %v7058_v29 = vcombine.low %v2223_v33, %v2233_v18  ;;  %v2310_v53 = vshll.u32 %v5287_v19, 16  ;;  %v2316_v13 = vshll.u32 %v7042_v34, 16  ;;  %v2247_v56 = vsel %vm6253_vm4, %v2242_v4, %v7000_v46  ;;  %8910 = vst [vmem:[#allocation7_spill] sm:$0xff] %v7075_v45  ;;  %v7083_v33 = vld [vmem:[%s8823_s1 + $0x20] sm:$0xf]  ;;  %v6116_v46 = vld [vmem:[%s6209_s26 + $0x24] sm:$0xff]  }
  0x9e   : > { %v2265_v24 = vor.u32 %v2264_v9, %v2261_v55  ;;  %v2275_v48 = vor.u32 %v2274_v23, %v7038_v58  ;;  %v2278_v42 = vshll.u32 %v7051_v36, 16  ;;  %v2309_v54 = vrot.slane %v2307_v25, 4  ;;  %8911 = vst [vmem:[#allocation9_spill] sm:$0xff] %v7083_v33 }
  0x9f   : > { %v2312_v11 = vrot.slane %v2310_v53, 5  ;;  %v7077_v63 = vrot.slane %v2316_v13, 5  ;;  %v2320_v3 = vshrl.u32 %v7042_v34, 16  ;;  %v2257_v52 = vsel %vm6253_vm4, %v2252_v59, %v2256_v17 }
  0xa0   : > { %v2289_v12 = vor.u32 %v2288_v43, %v2285_v16  ;;  %v2299_v18 = vor.u32 %v2298_v57, %v7054_v60  ;;  %v2302_v4 = vshll.u32 %v7061_v38, 16  ;;  %v2331_v19 = vshrl.u32 %v5290_v51, 16  ;;  %v7117_v57 = vld [vmem:[%s6209_s26 + $0xa0] sm:$0xf] }
  0xa1   : > { %5910 = vmatmul.mubr.msk.bf16.vlgmr.msra.gmra.mxu0 %vm696_vm3, %v6918_v22  ;;  %v2313_v55 = vor.u32 %v2312_v11, %v2309_v54  ;;  %v2322_v39 = vrot.slane %v2320_v3, 4  ;;  %v2334_v9 = vshll.u32 %v5290_v51, 16  ;;  %v5293_v22 = vld [vmem:[%s6209_s26 + $0x9c] sm:$0xf]  ;;  %v7096_v23 = vrot.slane %v2265_v24, 4  ;;  %8913 = vst [vmem:[#allocation10_spill] sm:$0xff] %v7117_v57 }
  0xa2   : > { %5976 = vmatpush3.bf16.msra.mxu0 %v6912_v32  ;;  %5913 = vmatprep.mubr.msk.bf16.mxu0 %vm696_vm3, %v6952_v62  ;;  %v7098_v6 = vrot.slane %v2278_v42, 5  ;;  %v2326_v15 = vshll.u32 %v7064_v26, 16  ;;  %v2340_v59 = vshll.u32 %v7075_v45, 16  ;;  %v7105_v32 = vld [vmem:[%s8823_s1 + $0x1c] sm:$0xf]  ;;  %v7110_v62 = vcombine.low %v2247_v56, %v2257_v52 }
  0xa3   : > { %8912 = vst [vmem:[#allocation11_spill] sm:$0xff] %v7105_v32  ;;  %6088 = vmatprep.subr.msk.bf16.mxu0 %vm745_vm0, %v7083_v33  ;;  %v7112_v17 = vrot.slane %v2275_v48, 4  ;;  %v2323_v16 = vor.u32 %v2322_v39, %v7077_v63  ;;  %v2344_v43 = vshrl.u32 %v7075_v45, 16  ;;  %v7121_v25 = vrot.slane %v2289_v12, 4  ;;  %v7130_v56 = vld [vmem:[%s6209_s26 + $0x98] sm:$0x1] }
  0xa4   : > { %5876 = vmatmul.mubr.msk.bf16.vlgmr.msra.gmra.mxu1 %vm696_vm3, %v6115_v10  ;;  %v7123_v53 = vrot.slane %v2299_v18, 4  ;;  %v7125_v13 = vrot.slane %v2302_v4, 5  ;;  %v7127_v10 = vrot.slane %v2313_v55, 4  ;;  %8914 = vst [vmem:[#allocation12_spill] sm:$0xff] %v7130_v56  ;;  %v2333_v24 = vrot.slane %v2331_v19, 4  ;;  %v6118_v19 = vld [vmem:[%s6209_s26 + $0x3c] sm:$0xff]  }
  0xa5   : > { %5942 = vmatpush3.bf16.msra.mxu1 %v6903_v14  ;;  %5879 = vmatprep.mubr.msk.bf16.mxu1 %vm696_vm3, %v6116_v46  ;;  %v2336_v48 = vrot.slane %v2334_v9, 5  ;;  %v2355_v42 = vshrl.u32 %v5293_v22, 16  ;;  %v2358_v51 = vshll.u32 %v5293_v22, 16  ;;  %v6117_v14 = vld [vmem:[%s6209_s26 + $0x30] sm:$0xff]   ;;  %v7139_v11 = vrot.slane %v2326_v15, 5 }
  0xa6   : > { %6087 = vmatprep.subr.msk.bf16.mxu1 %vm745_vm0, %v7105_v32  ;;  %v7141_v3 = vrot.slane %v2340_v59, 5  ;;  %v2364_v46 = vshll.u32 %v7117_v57, 16  ;;  %v5296_v52 = vld [vmem:[%s6209_s26 + $0xa8] sm:$0xf]  ;;  %v7145_v12 = vrot.slane %v2323_v16, 4  ;;  %v2346_v18 = vrot.slane %v2344_v43, 4 }
  0xa7   : > { %v2350_v4 = vshll.u32 %v7130_v56, 16  ;;  %v2368_v55 = vshrl.u32 %v7117_v57, 16  ;;  %v7150_v39 = vld [vmem:[%s6209_s26 + $0xac] sm:$0xf]  ;;  %v2337_v59 = vor.u32 %v2336_v48, %v2333_v24  ;;  %v7174_v16 = vld [vmem:[%s6209_s26 + $0xa4] sm:$0x1] }
  0xa8   : > { %8915 = vst [vmem:[#allocation13_spill] sm:$0xff] %v7150_v39  ;;  %8916 = vst [vmem:[#allocation2_spill] sm:$0xff] %v7174_v16  ;;  %v2357_v43 = vrot.slane %v2355_v42, 4  ;;  %v2360_v22 = vrot.slane %v2358_v51, 5  ;;  %v2379_v54 = vshrl.u32 %v5296_v52, 16  ;;  %v7176_v9 = vrot.slane %v2364_v46, 5 }
  0xa9   : > { %5914 = vmatmul.mubr.msk.bf16.gmra.mxu0 %vm696_vm3, %v6998_v7  ;;  %v2370_v32 = vrot.slane %v2368_v55, 4  ;;  %v2382_v15 = vshll.u32 %v5296_v52, 16  ;;  %v2388_v33 = vshll.u32 %v7150_v39, 16  ;;  %v5299_v57 = vld [vmem:[%s6209_s26 + $0xb4] sm:$0xf]  ;;  %v2347_v24 = vor.u32 %v2346_v18, %v7141_v3 }
  0xaa   : > { %5917 = vmatprep.mubr.msk.bf16.mxu0 %vm696_vm3, %v7048_v20  ;;  %v2329_v20 = vsel %vm6253_vm4, %v7145_v12, %v7139_v11  ;;  %v7186_v48 = vrot.slane %v2350_v4, 5  ;;  %v7189_v42 = vld [vmem:[%s6209_s26 + $0xb0] sm:$0x1]  ;;  %v2381_v51 = vrot.slane %v2379_v54, 4  ;;  %v7192_v46 = vld [vmem:[%s6209_s26 + $0xb8] sm:$0xf]  ;;  %v2361_v18 = vor.u32 %v2360_v22, %v2357_v43 }
  0xab   : > { %8917 = vst [vmem:[#allocation14_spill] sm:$0xff] %v7189_v42  ;;  %8918 = vst [vmem:[#allocation15_spill] sm:$0xff] %v7192_v46  ;;  %v2384_v52 = vrot.slane %v2382_v15, 5  ;;  %v7196_v55 = vrot.slane %v2388_v33, 5  ;;  %v2392_v11 = vshrl.u32 %v7150_v39, 16  ;;  %v7199_v12 = vrot.slane %v2337_v59, 4 }
  0xac   : > { %5880 = vmatmul.mubr.msk.bf16.gmra.mxu1 %vm696_vm3, %v6117_v14  ;;  %v2374_v14 = vshll.u32 %v7174_v16, 16  ;;  %v7202_v4 = vld [vmem:[%s6209_s26 + $0xbc] sm:$0x1]  ;;  %v2403_v54 = vshrl.u32 %v5299_v57, 16  ;;  %v2406_v7 = vshll.u32 %v5299_v57, 16  ;;  %v2371_v56 = vor.u32 %v2370_v32, %v7176_v9  ;;  %v6119_v16 = vld [vmem:[%s6209_s26 + $0x48] sm:$0xff]  }
  0xad   : > { %5883 = vmatprep.mubr.msk.bf16.mxu1 %vm696_vm3, %v6118_v19  ;;  %v2394_v45 = vrot.slane %v2392_v11, 4  ;;  %v2398_v19 = vshll.u32 %v7189_v42, 16  ;;  %v2412_v15 = vshll.u32 %v7192_v46, 16  ;;  %v5302_v33 = vld [vmem:[%s6209_s26 + $0xc0] sm:$0xf]  ;;  %v2385_v26 = vor.u32 %v2384_v52, %v2381_v51  ;;  %v6120_v57 = vld [vmem:[%s6209_s26 + $0x54] sm:$0xff]  }
  0xae   : > { %v2405_v39 = vrot.slane %v2403_v54, 4  ;;  %v2408_v34 = vrot.slane %v2406_v7, 5  ;;  %v2416_v59 = vshrl.u32 %v7192_v46, 16  ;;  %v7211_v22 = vld [vmem:[%s6209_s26 + $0xc4] sm:$0xf]  ;;  %v2348_v43 = vrot.slane %v2347_v24, 4 }
  0xaf   : > { %v2376_v32 = vrot.slane %v2374_v14, 5  ;;  %v2395_v11 = vor.u32 %v2394_v45, %v7196_v55  ;;  %v2414_v42 = vrot.slane %v2412_v15, 5  ;;  %v2422_v7 = vshll.u32 %v7202_v4, 16  ;;  %v7223_v45 = vld [vmem:[%s6209_s26 + $0xc8] sm:$0x1] }
  0xb0   : > { %v2409_v51 = vor.u32 %v2408_v34, %v2405_v39  ;;  %v2418_v52 = vrot.slane %v2416_v59, 4  ;;  %v2427_v54 = vshrl.u32 %v5302_v33, 16  ;;  %v2362_v46 = vrot.slane %v2361_v18, 4 }
  0xb1   : > { %5918 = vmatmul.mubr.msk.bf16.gmra.mxu0 %vm696_vm3, %v7056_v37  ;;  %v2372_v38 = vrot.slane %v2371_v56, 4  ;;  %v2430_v2 = vshll.u32 %v5302_v33, 16  ;;  %v2436_v37 = vshll.u32 %v7211_v22, 16  ;;  %v2386_v24 = vrot.slane %v2385_v26, 4 }
  0xb2   : > { %5921 = vmatprep.mubr.msk.bf16.mxu0 %vm696_vm3, %v7058_v29  ;;  %v2400_v14 = vrot.slane %v2398_v19, 5  ;;  %v2419_v36 = vor.u32 %v2418_v52, %v2414_v42  ;;  %v2429_v15 = vrot.slane %v2427_v54, 4  ;;  %v2396_v34 = vrot.slane %v2395_v11, 4 }
  0xb3   : > { %v2432_v29 = vrot.slane %v2430_v2, 5  ;;  %v7226_v39 = vrot.slane %v2436_v37, 5  ;;  %v2440_v56 = vshrl.u32 %v7211_v22, 16  ;;  %v8919_v26 = vsel %vm6253_vm4, %v7112_v17, %v7098_v6 }
  0xb4   : > { %5884 = vmatmul.mubr.msk.bf16.gmra.mxu1 %vm696_vm3, %v6119_v16  ;;  %v8920_v16 = vsel %vm6253_vm4, %v7096_v23, %v7038_v58  ;;  %v2410_v19 = vrot.slane %v2409_v51, 4  ;;  %v2420_v33 = vrot.slane %v2419_v36, 4  ;;  %v2424_v2 = vrot.slane %v2422_v7, 5  ;;  %v6121_v23 = vld [vmem:[%s6209_s26 + $0x60] sm:$0xff]  }
  0xb5   : > { %5887 = vmatprep.mubr.msk.bf16.mxu1 %vm696_vm3, %v6120_v57  ;;  %v5314_v18 = vcombine.low %v8920_v16, %v8919_v26  ;;  %v8921_v59 = vsel %vm6253_vm4, %v7123_v53, %v7125_v13  ;;  %v8922_v6 = vsel %vm6253_vm4, %v7121_v25, %v7054_v60  ;;  %v2433_v57 = vor.u32 %v2432_v29, %v2429_v15  ;;  %v5340_v13 = vld [vmem:[%s6209_s26 + $0x24] sm:$0xe]  ;;  %v5343_v26 = vld [vmem:[%s6209_s26 + $0x48] sm:$0xe] }
  0xb6   : > { %v5315_v17 = vcombine.low %v8922_v6, %v8921_v59  ;;  %v2442_v11 = vrot.slane %v2440_v56, 4  ;;  %v2446_v58 = vshll.u32 %v7223_v45, 16  ;;  %v8923_v36 = vsel %vm6253_vm4, %v7127_v10, %v7077_v63  ;;  %v6122_v63 = vld [vmem:[%s6209_s26 + $0x6c] sm:$0xff]   ;;  %v5344_v6 = vld [vmem:[%s6209_s26 + $0x54] sm:$0xe] }
  0xb7   : > { %v5316_v51 = vcombine.low %v8923_v36, %v2329_v20  ;;  %v2343_v53 = vsel %vm6253_vm4, %v7199_v12, %v7141_v3  ;;  %v2353_v60 = vsel %vm6253_vm4, %v2348_v43, %v7186_v48  ;;  %v2367_v25 = vsel %vm6253_vm4, %v2362_v46, %v7176_v9  ;;  %v7279_v12 = vld [vmem:[%s6209_s26 + $0xc] sm:$0xe] }
  0xb8   : > { %v2377_v10 = vsel %vm6253_vm4, %v2372_v38, %v2376_v32  ;;  %v2391_v3 = vsel %vm6253_vm4, %v2386_v24, %v7196_v55  ;;  %v2401_v20 = vsel %vm6253_vm4, %v2396_v34, %v2400_v14  ;;  %v2443_v48 = vor.u32 %v2442_v11, %v7226_v39  ;;  %v5341_v55 = vld [vmem:[%s6209_s26 + $0x30] sm:$0xe]  ;;  %v5342_v14 = vld [vmem:[%s6209_s26 + $0x3c] sm:$0xe] }
  0xb9   : > { %5922 = vmatmul.mubr.msk.bf16.gmra.mxu0 %vm696_vm3, %v7110_v62  ;;  %v2415_v62 = vsel %vm6253_vm4, %v2410_v19, %v2414_v42  ;;  %v2425_v38 = vsel %vm6253_vm4, %v2420_v33, %v2424_v2  ;;  %v7286_v9 = vrot.slane %v2433_v57, 4  ;;  %v2810_v46 = vrot.slane %v6770_v49, 5  ;;  %v6123_v57 = vld [vmem:[%s6209_s26 + $0x78] sm:$0xff]  }
  0xba   : > { %5925 = vmatprep.mubr.msk.bf16.mxu0 %vm696_vm3, %v5314_v18  ;;  %v7290_v43 = vcombine.low %v2343_v53, %v2353_v60  ;;  %v7292_v32 = vrot.slane %v2443_v48, 4  ;;  %v7294_v52 = vrot.slane %v2446_v58, 5  ;;  %v5356_v7 = vrot.slane %v5340_v13, 9  ;;  %v6124_v53 = vld [vmem:[%s6209_s26 + $0x84] sm:$0xff]   ;;  %v5345_v13 = vld [vmem:[%s6209_s26 + $0x60] sm:$0xe] }
  0xbb   : > { %v7297_v54 = vcombine.low %v2367_v25, %v2377_v10  ;;  %v7299_v42 = vcombine.low %v2391_v3, %v2401_v20  ;;  %v5354_v37 = vrot.slane %v7279_v12, 9  ;;  %v2824_v24 = vrot.slane %v6819_v44, 5 }
  0xbc   : > { %5888 = vmatmul.mubr.msk.bf16.gmra.mxu1 %vm696_vm3, %v6121_v23  ;;  %v7305_v15 = vcombine.low %v2415_v62, %v2425_v38  ;;  %v2813_v34 = vrot.slane %v6806_v47, 5  ;;  %v2827_v29 = vrot.slane %v6834_v21, 5  ;;  %v5357_v56 = vrot.slane %v5341_v55, 9  ;;  %v5347_v55 = vld [vmem:[%s6209_s26 + $0x78] sm:$0xe] }
  0xbd   : > { %5891 = vmatprep.mubr.msk.bf16.mxu1 %vm696_vm3, %v6122_v63  ;;  %v2439_v16 = vsel %vm6253_vm4, %v7286_v9, %v7226_v39  ;;  %v7316_v44 = vrot.slane %v2810_v46, 4  ;;  %v7320_v18 = vsel %vm6539_vm7, %v5356_v7, %v2824_v24  ;;  %v2826_v19 = vrot.slane %v2824_v24, 4  ;;  %v6130_v39 = vld [vmem:[%s6209_s26 + $0x18] sm:$0xff]  }
  0xbe   : > { %v2449_v21 = vsel %vm6253_vm4, %v7292_v32, %v7294_v52  ;;  %v2831_v33 = vrot.slane %v6857_v5, 5  ;;  %v2834_v2 = vrot.slane %v6865_v41, 5  ;;  %v5358_v59 = vrot.slane %v5342_v14, 9 }
  0xbf   : > { %v7332_v11 = vsel %vm6539_vm7, %v2826_v19, %v2827_v29  ;;  %v2838_v58 = vrot.slane %v6874_v61, 5  ;;  %v2841_v23 = vrot.slane %v6926_v50, 5  ;;  %v5359_v36 = vrot.slane %v5343_v26, 9  ;;  %v5348_v19 = vld [vmem:[%s6209_s26 + $0x84] sm:$0xe] }
  0xc0   : > { %v5373_v5 = vcombine.low %v7320_v18, %v7332_v11  ;;  %v7342_v41 = vsel %vm6539_vm7, %v5357_v56, %v2831_v33  ;;  %v2833_v60 = vrot.slane %v2831_v33, 4  ;;  %v2845_v25 = vrot.slane %v6892_v1, 5  ;;  %v5474_v11 = vld [vmem:[%s6209_s26 + $0x30] sm:$0xf] }
  0xc1   : > { %5926 = vmatmul.mubr.msk.bf16.gmra.mxu0 %vm696_vm3, %v5315_v17  ;;  %v7349_v61 = vsel %vm6539_vm7, %v5358_v59, %v2838_v58  ;;  %v2840_v50 = vrot.slane %v2838_v58, 4  ;;  %v2848_v17 = vrot.slane %v6940_v8, 5  ;;  %v5360_v63 = vrot.slane %v5344_v6, 9  ;;  %v8924_v59 = vld [vmem:[#allocation4_spill] sm:$0xff] }
  0xc2   : > { %5929 = vmatprep.mubr.msk.bf16.mxu0 %vm696_vm3, %v5316_v51  ;;  %v7354_v10 = vsel %vm6539_vm7, %v2833_v60, %v2834_v2  ;;  %v7358_v3 = vsel %vm6539_vm7, %v5359_v36, %v2845_v25  ;;  %v2847_v1 = vrot.slane %v2845_v25, 4  ;;  %v2852_v20 = vrot.slane %v6935_v40, 5  ;;  %v5346_v51 = vld [vmem:[%s6209_s26 + $0x6c] sm:$0xe]  ;;  %v6125_v58 = vld [vmem:[%s6209_s26 + $0x90] sm:$0xff]  }
  0xc3   : > { %v5374_v48 = vcombine.low %v7342_v41, %v7354_v10  ;;  %v7367_v8 = vsel %vm6539_vm7, %v2840_v50, %v2841_v23  ;;  %v2855_v62 = vrot.slane %v6957_v35, 5  ;;  %v5361_v38 = vrot.slane %v5345_v13, 9  ;;  %v8925_v36 = vld [vmem:[#allocation3_spill] sm:$0xff]  ;;  %v5349_v60 = vld [vmem:[%s6209_s26 + $0x90] sm:$0xe]  ;;  %v8926_v50 = vld [vmem:[#allocation6_spill] sm:$0xff] }
  0xc4   : > { %5892 = vmatmul.mubr.msk.bf16.gmra.mxu1 %vm696_vm3, %v6123_v57  ;;  %v5375_v40 = vcombine.low %v7349_v61, %v7367_v8  ;;  %v7376_v7 = vsel %vm6539_vm7, %v2847_v1, %v2848_v17  ;;  %v7380_v24 = vsel %vm6539_vm7, %v5360_v63, %v2852_v20  ;;  %v2854_v14 = vrot.slane %v2852_v20, 4  ;;  %v6136_v10 = vld [vmem:[%s6209_s26 + $0x60] sm:$0xff]  }
  0xc5   : > { %5895 = vmatprep.mubr.msk.bf16.mxu1 %vm696_vm3, %v6124_v53  ;;  %v5376_v35 = vcombine.low %v7358_v3, %v7376_v7  ;;  %v2859_v29 = vrot.slane %v6970_v28, 5  ;;  %v2862_v56 = vrot.slane %v6992_v30, 5  ;;  %v5362_v26 = vrot.slane %v5346_v51, 9  ;;  %v8927_v51 = vld [vmem:[#allocation5_spill] sm:$0xff] }
  0xc6   : > { %v7389_v33 = vsel %vm6539_vm7, %v2854_v14, %v2855_v62  ;;  %v2866_v2 = vrot.slane %v6989_v27, 5  ;;  %v2869_v6 = vrot.slane %v8924_v59, 5  ;;  %v5363_v57 = vrot.slane %v5347_v55, 9  ;;  %v6126_v27 = vld [vmem:[%s6209_s26 + $0x9c] sm:$0xff]  }
  0xc7   : > { %v5377_v23 = vcombine.low %v7380_v24, %v7389_v33  ;;  %v7398_v28 = vsel %vm6539_vm7, %v5361_v38, %v2859_v29  ;;  %v2861_v30 = vrot.slane %v2859_v29, 4  ;;  %v2873_v53 = vrot.slane %v8925_v36, 5  ;;  %v5350_v38 = vld [vmem:[%s6209_s26 + $0x9c] sm:$0xe]  ;;  %v8930_v36 = vld [vmem:[#allocation12_spill] sm:$0xff] }
  0xc8   : > { %v7407_v25 = vsel %vm6539_vm7, %v5362_v26, %v2866_v2  ;;  %v2868_v13 = vrot.slane %v2866_v2, 4  ;;  %v2876_v17 = vrot.slane %v8926_v50, 5  ;;  %v5364_v63 = vrot.slane %v5348_v19, 9  ;;  %v5351_v26 = vld [vmem:[%s6209_s26 + $0xa8] sm:$0xe] }
  0xc9   : > { %5930 = vmatmul.mubr.msk.bf16.gmra.mxu0 %vm696_vm3, %v7290_v43  ;;  %v7414_v1 = vsel %vm6539_vm7, %v2861_v30, %v2862_v56  ;;  %v7418_v43 = vsel %vm6539_vm7, %v5363_v57, %v2873_v53  ;;  %v2875_v20 = vrot.slane %v2873_v53, 4  ;;  %v2880_v62 = vrot.slane %v8927_v51, 5  ;;  %v5353_v57 = vld [vmem:[%s6209_s26 + $0xc0] sm:$0xe]  ;;  %v6127_v19 = vld [vmem:[%s6209_s26 + $0xa8] sm:$0xff]  }
  0xca   : > { %5933 = vmatprep.mubr.msk.bf16.mxu0 %vm696_vm3, %v7297_v54  ;;  %v7426_v14 = vsel %vm6539_vm7, %v2868_v13, %v2869_v6  ;;  %v8928_v54 = vld [vmem:[#allocation8_spill] sm:$0xff]  ;;  %v5365_v56 = vrot.slane %v5349_v60, 9  ;;  %v2890_v53 = vrot.slane %v8930_v36, 5  ;;  %v5366_v60 = vrot.slane %v5350_v38, 9  ;;  %v8933_v38 = vld [vmem:[#allocation13_spill] sm:$0xff] }
  0xcb   : > { %v2883_v29 = vrot.slane %v8928_v54, 5  ;;  %v7435_v2 = vsel %vm6539_vm7, %v2875_v20, %v2876_v17  ;;  %v7439_v59 = vsel %vm6539_vm7, %v5364_v63, %v2880_v62  ;;  %v2882_v6 = vrot.slane %v2880_v62, 4  ;;  %v5352_v13 = vld [vmem:[%s6209_s26 + $0xb4] sm:$0xe]  ;;  %v8931_v17 = vld [vmem:[#allocation10_spill] sm:$0xff] }
  0xcc   : > { %5896 = vmatmul.mubr.msk.bf16.gmra.mxu1 %vm696_vm3, %v6125_v58  ;;  %v8929_v58 = vld [vmem:[#allocation7_spill] sm:$0xff]  ;;  %v2894_v63 = vrot.slane %v8931_v17, 5  ;;  %v8932_v20 = vld [vmem:[#allocation2_spill] sm:$0xff]  ;;  %v5367_v62 = vrot.slane %v5351_v26, 9  ;;  %v2901_v36 = vrot.slane %v8933_v38, 5  ;;  %v5368_v26 = vrot.slane %v5352_v13, 9 }
  0xcd   : > { %5899 = vmatprep.mubr.msk.bf16.mxu1 %vm696_vm3, %v6126_v27  ;;  %v2887_v30 = vrot.slane %v8929_v58, 5  ;;  %v7449_v50 = vsel %vm6539_vm7, %v2882_v6, %v2883_v29  ;;  %v2897_v51 = vrot.slane %v8932_v20, 5  ;;  %v8934_v17 = vld [vmem:[#allocation14_spill] sm:$0xff]  ;;  %v6128_v27 = vld [vmem:[%s6209_s26 + $0xb4] sm:$0xff]   ;;  %v2814_v32 = vsel %vm6539_vm7, %v7316_v44, %v2813_v34 }
  0xce   : > { %v7464_v29 = vsel %vm6539_vm7, %v5366_v60, %v2894_v63  ;;  %v2896_v6 = vrot.slane %v2894_v63, 4  ;;  %v2904_v20 = vrot.slane %v8934_v17, 5  ;;  %v2903_v38 = vrot.slane %v2901_v36, 4  ;;  %v8935_v60 = vld [vmem:[#allocation15_spill] sm:$0xff]  ;;  %v7717_v24 = vld [vmem:[%s6209_s26 + $0x58] sm:$0xf] }
  0xcf   : > { %v7457_v54 = vsel %vm6539_vm7, %v5365_v56, %v2887_v30  ;;  %v2889_v58 = vrot.slane %v2887_v30, 4  ;;  %v7476_v30 = vsel %vm6539_vm7, %v5367_v62, %v2901_v36  ;;  %v2908_v55 = vrot.slane %v8935_v60, 5  ;;  %v7557_v60 = vld [vmem:[%s6209_s26 + $0x1c] sm:$0xf] }
  0xd0   : > { %v5369_v63 = vrot.slane %v5353_v57, 9  ;;  %v2915_v57 = vrot.slane %v7211_v22, 5  ;;  %v2918_v17 = vrot.slane %v7223_v45, 5  ;;  %v2811_v22 = vsel %vm6539_vm7, %v5354_v37, %v2810_v46  ;;  %v5339_v45 = vld [vmem:[%s6209_s26 + $0x18] sm:$0xe]  ;;  %v6129_v46 = vld [vmem:[%s6209_s26 + $0xc0] sm:$0xff]  }
  0xd1   : > { %5934 = vmatmul.mubr.msk.bf16.gmra.mxu0 %vm696_vm3, %v7299_v42  ;;  %v7472_v56 = vsel %vm6539_vm7, %v2889_v58, %v2890_v53  ;;  %v7485_v42 = vsel %vm6539_vm7, %v2896_v6, %v2897_v51  ;;  %v2911_v53 = vrot.slane %v7202_v4, 5  ;;  %v7492_v58 = vsel %vm6539_vm7, %v2903_v38, %v2904_v20  ;;  %v6146_v51 = vld [vmem:[%s6209_s26 + $0x1c] sm:$0xf]  ;;  %v6147_v37 = vld [vmem:[%s6209_s26 + $0x20] sm:$0x1] }
  0xd2   : > { %5937 = vmatprep.mubr.msk.bf16.mxu0 %vm696_vm3, %v7305_v15  ;;  %v7496_v15 = vsel %vm6539_vm7, %v5368_v26, %v2908_v55  ;;  %v2910_v36 = vrot.slane %v2908_v55, 4  ;;  %v2817_v6 = vrot.slane %v6146_v51, 5  ;;  %v5321_v55 = vcombine.low %v2439_v16, %v2449_v21  ;;  %v6131_v26 = vld [vmem:[%s6209_s26 + $0x24] sm:$0xff]   ;;  %v5468_v38 = vld [vmem:[%s6209_s26 + $0x18] sm:$0xf] }
  0xd3   : > { %v7536_v12 = vsel %vm6539_vm7, %v5369_v63, %v2915_v57  ;;  %v2917_v9 = vrot.slane %v2915_v57, 4  ;;  %v5355_v52 = vrot.slane %v5339_v45, 9  ;;  %v2820_v16 = vrot.slane %v6147_v37, 5  ;;  %v6133_v37 = vld [vmem:[%s6209_s26 + $0x3c] sm:$0xff]  }
  0xd4   : > { %5900 = vmatmul.mubr.msk.bf16.gmra.mxu1 %vm696_vm3, %v6127_v19  ;;  %v7524_v19 = vsel %vm6539_vm7, %v2910_v36, %v2911_v53  ;;  %v2819_v47 = vrot.slane %v2817_v6, 4  ;;  %v5371_v44 = vcombine.low %v2811_v22, %v2814_v32  ;;  %v6132_v53 = vld [vmem:[%s6209_s26 + $0x30] sm:$0xff]   ;;  %v8936_v36 = vld [vmem:[#allocation9_spill] sm:$0xff]  ;;  %v3622_v57 = vshrl.u32 %v5468_v38, 16  ;;  %v8937_v22 = vld [vmem:[#allocation11_spill] sm:$0xff] }
  0xd5   : > { %5903 = vmatprep.mubr.msk.bf16.mxu1 %vm696_vm3, %v6128_v27  ;;  %v7542_v34 = vsel %vm6539_vm7, %v2917_v9, %v2918_v17  ;;  %v2818_v27 = vsel %vm6539_vm7, %v5355_v52, %v2817_v6  ;;  %v4574_v51 = vsel %vm745_vm0, %v8936_v36, 0  ;;  %v3625_v17 = vshll.u32 %v5468_v38, 16  ;;  %v5471_v32 = vld [vmem:[%s6209_s26 + $0x24] sm:$0xf] }
  0xd6   : > { %v2821_v20 = vsel %vm6539_vm7, %v2819_v47, %v2820_v16  ;;  %v3631_v6 = vshll.u32 %v7557_v60, 16  ;;  %v4104_v45 = vsel %vm745_vm0, %v8937_v22, 0  ;;  %v7573_v47 = vld [vmem:[%s6209_s26 + $0x28] sm:$0xf]  ;;  %v5470_v16 = vld [vmem:[%s6209_s26 + $0x20] sm:$0x1] }
  0xd7   : > { %v5372_v63 = vcombine.low %v2818_v27, %v2821_v20  ;;  %v3627_v9 = vrot.slane %v3625_v17, 5  ;;  %v3646_v27 = vshrl.u32 %v5471_v32, 16  ;;  %v3649_v20 = vshll.u32 %v5471_v32, 16  ;;  %v7593_v22 = vld [vmem:[%s6209_s26 + $0x34] sm:$0xf] }
  0xd8   : > { %v3655_v38 = vshll.u32 %v7573_v47, 16  ;;  %v4365_v18 = vrot.slane %v7557_v60, 5  ;;  %v4368_v17 = vrot.slane %v5470_v16, 5  ;;  %v3683_v41 = vshrl.u32 %v7593_v22, 16 }
  0xd9   : > { %5938 = vmatmul.mubr.msk.bf16.gmra.mxu0 %vm696_vm3, %v5321_v55  ;;  %v3635_v55 = vshrl.u32 %v7557_v60, 16  ;;  %v4372_v61 = vrot.slane %v7573_v47, 5 }
  0xda   : > { %5977 = vmatprep.mubr.msk.bf16.mxu0 %vm696_vm3, %v6130_v39  ;;  %v3624_v39 = vrot.slane %v3622_v57, 4  ;;  %v7598_v32 = vrot.slane %v3655_v38, 5  ;;  %v3679_v38 = vshll.u32 %v7593_v22, 16 }
  0xdb   : > { %v3637_v52 = vrot.slane %v3635_v55, 4  ;;  %v3651_v55 = vrot.slane %v3649_v20, 5  ;;  %v6135_v20 = vld [vmem:[%s6209_s26 + $0x54] sm:$0xff]  }
  0xdc   : > { %5904 = vmatmul.mubr.msk.bf16.gmra.mxu1 %vm696_vm3, %v6129_v46  ;;  %v7570_v46 = vrot.slane %v3631_v6, 5  ;;  %v3648_v6 = vrot.slane %v3646_v27, 4  ;;  %v4367_v27 = vrot.slane %v4365_v18, 4 }
  0xdd   : > { %5943 = vmatprep.mubr.msk.bf16.mxu1 %vm696_vm3, %v5371_v44  ;;  %v6134_v44 = vld [vmem:[%s6209_s26 + $0x48] sm:$0xff]  }
  0xde   : > { %v3638_v36 = vor.u32 %v3637_v52, %v7570_v46 }
  0xe1   : > { %5978 = vmatmul.mubr.msk.bf16.vlgmr.msra.gmra.mxu0 %vm696_vm3, %v6131_v26  ;;  %v5549_v26 = vld [vmem:[%s6209_s26 + $0x18] sm:$0xe] }
  0xe2   : > { %6044 = vmatpush3.bf16.msra.mxu0 %v4574_v51  ;;  %5981 = vmatprep.mubr.msk.bf16.mxu0 %vm696_vm3, %v6132_v53  ;;  %v3659_v53 = vshrl.u32 %v7573_v47, 16  ;;  %v3641_v51 = vshll.u32 %v5470_v16, 16  ;;  %v5565_v57 = vrot.slane %v5549_v26, 9  ;;  %v3639_v16 = vrot.slane %v3638_v36, 4  ;;  %v7637_v47 = vld [vmem:[%s6209_s26 + $0x38] sm:$0x1] }
  0xe3   : > { %v3689_v4 = vshll.u32 %v7637_v47, 16 }
  0xe4   : > { %5944 = vmatmul.mubr.msk.bf16.vlgmr.msra.gmra.mxu1 %vm696_vm3, %v5372_v63  ;;  %v3628_v63 = vor.u32 %v3627_v9, %v3624_v39  ;;  %v3661_v60 = vrot.slane %v3659_v53, 4  ;;  %v3670_v39 = vshrl.u32 %v5474_v11, 16  ;;  %v3673_v9 = vshll.u32 %v5474_v11, 16 }
  0xe5   : > { %6010 = vmatpush3.bf16.msra.mxu1 %v4104_v45  ;;  %5947 = vmatprep.mubr.msk.bf16.mxu1 %vm696_vm3, %v5373_v5  ;;  %v7589_v5 = vpop.f32.mrf.mxu0  ;;  %v7596_v45 = vld [vmem:[%s6209_s26 + $0x2c] sm:$0x1] }
  0xe6   : > { %v3665_v53 = vshll.u32 %v7596_v45, 16  ;;  %v3662_v36 = vor.u32 %v3661_v60, %v7598_v32  ;;  %v3672_v8 = vrot.slane %v3670_v39, 4  ;;  %v7634_v60 = vsel %vm6539_vm7, %v4367_v27, %v4368_v17 }
  0xe7   : > { %v7611_v26 = vpop.f32.mrf.mxu0  ;;  %v4375_v27 = vrot.slane %v7596_v45, 5 }
  0xe8   : > { %v7654_v49 = vrot.slane %v3662_v36, 4 }
  0xe9   : > { %5982 = vmatmul.mubr.msk.bf16.gmra.mxu0 %vm696_vm3, %v6133_v37  ;;  %v3629_v37 = vrot.slane %v3628_v63, 4  ;;  %v5477_v63 = vld [vmem:[%s6209_s26 + $0x3c] sm:$0xf]  ;;  %v7640_v39 = vpop.f32.mrf.mxu0 }
  0xea   : > { %5985 = vmatprep.mubr.msk.bf16.mxu0 %vm696_vm3, %v6134_v44  ;;  %v7604_v52 = vpop.f32.mrf.mxu1  ;;  %v3643_v44 = vrot.slane %v3641_v51, 5  ;;  %v5550_v51 = vld [vmem:[%s6209_s26 + $0x24] sm:$0xe] }
  0xeb   : > { %8938 = vst [vmem:[#allocation4_spill] sm:$0xff] %v7604_v52  ;;  %v3634_v21 = vsel %vm6253_vm4, %v3629_v37, %v7570_v46  ;;  %v3685_v46 = vrot.slane %v3683_v41, 4  ;;  %v7645_v37 = vld [vmem:[%s6209_s26 + $0x40] sm:$0xf]  ;;  %v5566_v17 = vrot.slane %v5550_v51, 9  ;;  %v7671_v36 = vpop.f32.mrf.mxu0 }
  0xec   : > { %5948 = vmatmul.mubr.msk.bf16.gmra.mxu1 %vm696_vm3, %v5374_v48  ;;  %v3652_v48 = vor.u32 %v3651_v55, %v3648_v6  ;;  %v7621_v11 = vpop.f32.mrf.mxu1  ;;  %v3644_v6 = vsel %vm6253_vm4, %v3639_v16, %v3643_v44  ;;  %v7630_v55 = vsel %vm6539_vm7, %v5565_v57, %v4365_v18  ;;  %v3694_v16 = vshrl.u32 %v5477_v63, 16  ;;  %8941 = vst [vmem:[#allocation5_spill] sm:$0xff] %v7671_v36 }
  0xed   : > { %5951 = vmatprep.mubr.msk.bf16.mxu1 %vm696_vm3, %v5375_v40  ;;  %v3675_v40 = vrot.slane %v3673_v9, 5  ;;  %8939 = vst [vmem:[#allocation3_spill] sm:$0xff] %v7621_v11  ;;  %v7642_v9 = vrot.slane %v3679_v38, 5  ;;  %v3697_v44 = vshll.u32 %v5477_v63, 16  ;;  %v7650_v57 = vrot.slane %v3665_v53, 5  ;;  %v6137_v63 = vld [vmem:[%s6209_s26 + $0x6c] sm:$0xff]  }
  0xee   : > { %v7648_v18 = vrot.slane %v3652_v48, 4  ;;  %v4374_v38 = vrot.slane %v4372_v61, 4  ;;  %v4379_v48 = vrot.slane %v7593_v22, 5  ;;  %v3703_v45 = vshll.u32 %v7645_v37, 16  ;;  %v6138_v22 = vld [vmem:[%s6209_s26 + $0x78] sm:$0xff]  }
  0xef   : > { %v3676_v41 = vor.u32 %v3675_v40, %v3672_v8  ;;  %v3707_v53 = vshrl.u32 %v7645_v37, 16  ;;  %v3686_v3 = vor.u32 %v3685_v46, %v7642_v9  ;;  %v3699_v51 = vrot.slane %v3697_v44, 5  ;;  %v5480_v44 = vld [vmem:[%s6209_s26 + $0x48] sm:$0xf] }
  0xf0   : > { %v7675_v8 = vcombine.low %v3634_v21, %v3644_v6  ;;  %v7685_v33 = vsel %vm6539_vm7, %v5566_v17, %v4372_v61  ;;  %v3668_v21 = vsel %vm6253_vm4, %v7654_v49, %v7650_v57  ;;  %v7696_v6 = vsel %vm6539_vm7, %v4374_v38, %v4375_v27  ;;  %v5483_v49 = vld [vmem:[%s6209_s26 + $0x54] sm:$0xf] }
  0xf1   : > { %5986 = vmatmul.mubr.msk.bf16.gmra.mxu0 %vm696_vm3, %v6135_v20  ;;  %v5551_v20 = vld [vmem:[%s6209_s26 + $0x30] sm:$0xe]  ;;  %v3677_v46 = vrot.slane %v3676_v41, 4  ;;  %v4381_v17 = vrot.slane %v4379_v48, 4  ;;  %v4382_v40 = vrot.slane %v7637_v47, 5  ;;  %v7705_v62 = vrot.slane %v3703_v45, 5 }
  0xf2   : > { %5989 = vmatprep.mubr.msk.bf16.mxu0 %vm696_vm3, %v6136_v10  ;;  %v7661_v10 = vpop.f32.mrf.mxu1  ;;  %v5567_v7 = vrot.slane %v5551_v20, 9  ;;  %v7700_v20 = vld [vmem:[%s6209_s26 + $0x4c] sm:$0xf]  ;;  %v3709_v13 = vrot.slane %v3707_v53, 4  ;;  %v3687_v27 = vrot.slane %v3686_v3, 4  ;;  %v3718_v45 = vshrl.u32 %v5480_v44, 16 }
  0xf3   : > { %8940 = vst [vmem:[#allocation6_spill] sm:$0xff] %v7661_v10  ;;  %v5552_v47 = vld [vmem:[%s6209_s26 + $0x3c] sm:$0xe]  ;;  %v3721_v53 = vshll.u32 %v5480_v44, 16  ;;  %v4386_v3 = vrot.slane %v7645_v37, 5  ;;  %v7735_v44 = vsel %vm6539_vm7, %v4381_v17, %v4382_v40  ;;  %v3755_v37 = vshrl.u32 %v7717_v24, 16 }
  0xf4   : > { %5952 = vmatmul.mubr.msk.bf16.gmra.mxu1 %vm696_vm3, %v5376_v35  ;;  %v3696_v35 = vrot.slane %v3694_v16, 4  ;;  %v3691_v16 = vrot.slane %v3689_v4, 5  ;;  %v7702_v61 = vpop.f32.mrf.mxu1  ;;  %v7713_v4 = vsel %vm6539_vm7, %v5567_v7, %v4379_v48  ;;  %v3682_v48 = vsel %vm6253_vm4, %v3677_v46, %v7642_v9  ;;  %v7754_v17 = vld [vmem:[%s6209_s26 + $0x50] sm:$0x1] }
  0xf5   : > { %5955 = vmatprep.mubr.msk.bf16.mxu1 %vm696_vm3, %v5377_v23  ;;  %v7688_v23 = vld [vmem:[%s6209_s26 + $0x44] sm:$0x1]  ;;  %8942 = vst [vmem:[#allocation8_spill] sm:$0xff] %v7702_v61  ;;  %v3731_v61 = vshrl.u32 %v7700_v20, 16  ;;  %v3742_v7 = vshrl.u32 %v5483_v49, 16  ;;  %v3710_v10 = vor.u32 %v3709_v13, %v7705_v62  ;;  %v3751_v9 = vshll.u32 %v7717_v24, 16 }
  0xf6   : > { %v7709_v57 = vpop.f32.mrf.mxu0  ;;  %v3700_v38 = vor.u32 %v3699_v51, %v3696_v35  ;;  %v3713_v41 = vshll.u32 %v7688_v23, 16  ;;  %v3745_v35 = vshll.u32 %v5483_v49, 16  ;;  %v8944_v51 = vcombine.low %v7398_v28, %v7414_v1  ;;  %v6139_v28 = vld [vmem:[%s6209_s26 + $0x84] sm:$0xff]  }
  0xf7   : > { %8943 = vst [vmem:[#allocation7_spill] sm:$0xff] %v7709_v57  ;;  %v8946_v46 = vcombine.low %v7407_v25, %v7426_v14  ;;  %v3692_v49 = vsel %vm6253_vm4, %v3687_v27, %v3691_v16  ;;  %v5568_v13 = vrot.slane %v5552_v47, 9  ;;  %v3720_v11 = vrot.slane %v3718_v45, 4  ;;  %v5553_v47 = vld [vmem:[%s6209_s26 + $0x48] sm:$0xe] }
  0xf8   : > { %v7745_v1 = vpop.f32.mrf.mxu0  ;;  %v7751_v40 = vrot.slane %v3713_v41, 5  ;;  %v3723_v52 = vrot.slane %v3721_v53, 5  ;;  %v3733_v14 = vrot.slane %v3731_v61, 4  ;;  %v3744_v57 = vrot.slane %v3742_v7, 4 }
  0xf9   : > { %5990 = vmatmul.mubr.msk.bf16.gmra.mxu0 %vm696_vm3, %v6137_v63  ;;  %v3727_v63 = vshll.u32 %v7700_v20, 16  ;;  %8947 = vst [vmem:[#allocation10_spill] sm:$0xff] %v7745_v1  ;;  %v4389_v1 = vrot.slane %v7688_v23, 5  ;;  %v3747_v16 = vrot.slane %v3745_v35, 5  ;;  %v3737_v41 = vshll.u32 %v7754_v17, 16 }
  0xfa   : > { %5993 = vmatprep.mubr.msk.bf16.mxu0 %vm696_vm3, %v6138_v22  ;;  %v7731_v22 = vpop.f32.mrf.mxu1  ;;  %v7766_v36 = vrot.slane %v3751_v9, 5  ;;  %v3757_v45 = vrot.slane %v3755_v37, 4  ;;  %v7769_v61 = vpop.f32.mrf.mxu0  ;;  %v8950_v23 = vsel %vm6253_vm4, %v7648_v18, %v7598_v32  ;;  %v7785_v35 = vld [vmem:[%s6209_s26 + $0x5c] sm:$0x1]  ;;  %v7794_v18 = vsel %vm6539_vm7, %v5568_v13, %v4386_v3  ;;  %v5486_v9 = vld [vmem:[%s6209_s26 + $0x60] sm:$0xf] }
  0xfb   : > { %8945 = vst [vmem:[#allocation12_spill] sm:$0xff] %v7731_v22  ;;  %v6140_v22 = vld [vmem:[%s6209_s26 + $0x90] sm:$0xff]   ;;  %v7757_v25 = vrot.slane %v3727_v63, 5  ;;  %8949 = vst [vmem:[#allocation13_spill] sm:$0xff] %v7769_v61  ;;  %v7776_v53 = vcombine.low %v8950_v23, %v3668_v21  ;;  %v7780_v63 = vcombine.low %v3682_v48, %v3692_v49  ;;  %v3724_v21 = vor.u32 %v3723_v52, %v3720_v11  ;;  %v7804_v23 = vld [vmem:[%s6209_s26 + $0x64] sm:$0xf] }
  0xfc   : > { %5956 = vmatmul.mubr.msk.bf16.gmra.mxu1 %vm696_vm3, %v8944_v51  ;;  %v7749_v51 = vrot.slane %v3700_v38, 4  ;;  %v7760_v27 = vpop.f32.mrf.mxu1  ;;  %v7762_v38 = vrot.slane %v3710_v10, 4  ;;  %v3748_v49 = vor.u32 %v3747_v16, %v3744_v57  ;;  %v6141_v52 = vld [vmem:[%s6209_s26 + $0x9c] sm:$0xff]   ;;  %v7817_v13 = vrot.slane %v3737_v41, 5  ;;  %v5489_v41 = vld [vmem:[%s6209_s26 + $0x6c] sm:$0xf] }
  0xfd   : > { %5959 = vmatprep.mubr.msk.bf16.mxu1 %vm696_vm3, %v8946_v46  ;;  %v4388_v46 = vrot.slane %v4386_v3, 4  ;;  %8948 = vst [vmem:[#allocation2_spill] sm:$0xff] %v7760_v27  ;;  %v3734_v48 = vor.u32 %v3733_v14, %v7757_v25  ;;  %v8951_v3 = vcombine.low %v7418_v43, %v7435_v2  ;;  %v3761_v57 = vshll.u32 %v7785_v35, 16  ;;  %v5554_v14 = vld [vmem:[%s6209_s26 + $0x54] sm:$0xe]  ;;  %v7826_v2 = vpop.f32.mrf.mxu0 }
  0xfe   : > { %v7811_v11 = vpop.f32.mrf.mxu1  ;;  %v8953_v43 = vcombine.low %v7439_v59, %v7449_v50  ;;  %8954 = vst [vmem:[#allocation15_spill] sm:$0xff] %v7826_v2  ;;  %v4400_v16 = vrot.slane %v7717_v24, 5  ;;  %v3775_v7 = vshll.u32 %v7804_v23, 16  ;;  %v3779_v59 = vshrl.u32 %v7804_v23, 16  ;;  %v7839_v32 = vld [vmem:[%s6209_s26 + $0x70] sm:$0xf] }
  0xff   : > { %v7800_v37 = vsel %vm6539_vm7, %v4388_v46, %v4389_v1  ;;  %8952 = vst [vmem:[#allocation14_spill] sm:$0xff] %v7811_v11  ;;  %v3716_v1 = vsel %vm6253_vm4, %v7762_v38, %v7751_v40  ;;  %v4396_v46 = vrot.slane %v7754_v17, 5  ;;  %v3766_v40 = vshrl.u32 %v5486_v9, 16  ;;  %v7848_v61 = vld [vmem:[%s6209_s26 + $0x68] sm:$0x1] }
 0x100   : > { %v3769_v38 = vshll.u32 %v5486_v9, 16  ;;  %v3749_v10 = vrot.slane %v3748_v49, 4  ;;  %v5570_v17 = vrot.slane %v5554_v14, 9  ;;  %v7841_v24 = vpop.f32.mrf.mxu1  ;;  %v3793_v11 = vshll.u32 %v5489_v41, 16 }
 0x101   : > { %5994 = vmatmul.mubr.msk.bf16.gmra.mxu0 %vm696_vm3, %v6139_v28  ;;  %v5569_v28 = vrot.slane %v5553_v47, 9  ;;  %v6142_v47 = vld [vmem:[%s6209_s26 + $0xa8] sm:$0xff]   ;;  %8955 = vst [vmem:[#allocation9_spill] sm:$0xff] %v7841_v24  ;;  %v4402_v2 = vrot.slane %v4400_v16, 4  ;;  %v7851_v14 = vrot.slane %v3775_v7, 5 }
 0x102   : > { %5997 = vmatprep.mubr.msk.bf16.mxu0 %vm696_vm3, %v6140_v22  ;;  %v4393_v22 = vrot.slane %v7700_v20, 5  ;;  %v3758_v20 = vor.u32 %v3757_v45, %v7766_v36  ;;  %v3725_v45 = vrot.slane %v3724_v21, 4  ;;  %v3763_v21 = vrot.slane %v3761_v57, 5  ;;  %v5555_v57 = vld [vmem:[%s6209_s26 + $0x60] sm:$0xe] }
 0x103   : > { %v3771_v49 = vrot.slane %v3769_v38, 5  ;;  %v8956_v38 = vcombine.low %v7457_v54, %v7472_v56  ;;  %v6143_v54 = vld [vmem:[%s6209_s26 + $0xb4] sm:$0xff]  }
 0x104   : > { %5960 = vmatmul.mubr.msk.bf16.gmra.mxu1 %vm696_vm3, %v8951_v3  ;;  %v3735_v3 = vrot.slane %v3734_v48, 4  ;;  %v7836_v50 = vsel %vm6539_vm7, %v5569_v28, %v4393_v22  ;;  %v3759_v9 = vrot.slane %v3758_v20, 4  ;;  %v3790_v48 = vshrl.u32 %v5489_v41, 16 }
 0x105   : > { %5963 = vmatprep.mubr.msk.bf16.mxu1 %vm696_vm3, %v8953_v43  ;;  %v4395_v43 = vrot.slane %v4393_v22, 4  ;;  %v4403_v28 = vrot.slane %v7785_v35, 5  ;;  %v3768_v22 = vrot.slane %v3766_v40, 4  ;;  %v3781_v20 = vrot.slane %v3779_v59, 4 }
 0x106   : > { %v3799_v41 = vshll.u32 %v7839_v32, 16  ;;  %v3730_v24 = vsel %vm6253_vm4, %v3725_v45, %v7757_v25  ;;  %v3740_v35 = vsel %vm6253_vm4, %v3735_v3, %v7817_v13  ;;  %v7868_v40 = vsel %vm6539_vm7, %v5570_v17, %v4400_v16 }
 0x107   : > { %v7844_v27 = vpop.f32.mrf.mxu0  ;;  %v7864_v7 = vsel %vm6539_vm7, %v4395_v43, %v4396_v46  ;;  %v3754_v25 = vsel %vm6253_vm4, %v3749_v10, %v7766_v36  ;;  %v3764_v13 = vsel %vm6253_vm4, %v3759_v9, %v3763_v21  ;;  %v3792_v46 = vrot.slane %v3790_v48, 4  ;;  %v6144_v43 = vld [vmem:[%s6209_s26 + $0xc0] sm:$0xff]  }
 0x108   : > { %v3795_v45 = vrot.slane %v3793_v11, 5  ;;  %v8958_v16 = vcombine.low %v7464_v29, %v7485_v42  ;;  %v7890_v3 = vsel %vm6539_vm7, %v4402_v2, %v4403_v28  ;;  %v3772_v36 = vor.u32 %v3771_v49, %v3768_v22  ;;  %v5556_v22 = vld [vmem:[%s6209_s26 + $0x6c] sm:$0xe] }
 0x109   : > { %5998 = vmatmul.mubr.msk.bf16.gmra.mxu0 %vm696_vm3, %v6141_v52  ;;  %v3803_v52 = vshrl.u32 %v7839_v32, 16  ;;  %v7886_v56 = vpop.f32.mrf.mxu0  ;;  %v3785_v10 = vshll.u32 %v7848_v61, 16  ;;  %v5571_v59 = vrot.slane %v5555_v57, 9  ;;  %v3782_v11 = vor.u32 %v3781_v20, %v7851_v14  ;;  %v5492_v57 = vld [vmem:[%s6209_s26 + $0x78] sm:$0xf] }
 0x10a   : > { %6001 = vmatprep.mubr.msk.bf16.mxu0 %vm696_vm3, %v6142_v47  ;;  %v4407_v29 = vrot.slane %v7804_v23, 5  ;;  %v7896_v42 = vrot.slane %v3799_v41, 5  ;;  %v8959_v2 = vsel %vm6253_vm4, %v7749_v51, %v7705_v62  ;;  %v7907_v48 = vcombine.low %v3730_v24, %v3740_v35  ;;  %v5491_v23 = vld [vmem:[%s6209_s26 + $0x74] sm:$0x1]  ;;  %v7922_v24 = vld [vmem:[%s6209_s26 + $0x7c] sm:$0xf] }
 0x10b   : > { %v3805_v17 = vrot.slane %v3803_v52, 4  ;;  %v7903_v9 = vcombine.low %v8959_v2, %v3716_v1  ;;  %v7915_v20 = vcombine.low %v3754_v25, %v3764_v13  ;;  %v3796_v51 = vor.u32 %v3795_v45, %v3792_v46  ;;  %v7925_v41 = vpop.f32.mrf.mxu0  ;;  %v5495_v13 = vld [vmem:[%s6209_s26 + $0x84] sm:$0xf] }
 0x10c   : > { %5964 = vmatmul.mubr.msk.bf16.gmra.mxu1 %vm696_vm3, %v8956_v38  ;;  %v7874_v47 = vpop.f32.mrf.mxu1  ;;  %v4414_v1 = vrot.slane %v7839_v32, 5  ;;  %v7927_v52 = vrot.slane %v3772_v36, 4  ;;  %v7929_v35 = vrot.slane %v3785_v10, 5  ;;  %v7933_v38 = vsel %vm6539_vm7, %v5571_v59, %v4407_v29 }
 0x10d   : > { %8957 = vst [vmem:[#allocation11_spill] sm:$0xff] %v7874_v47  ;;  %5967 = vmatprep.mubr.msk.bf16.mxu1 %vm696_vm3, %v8958_v16  ;;  %v4410_v25 = vrot.slane %v7848_v61, 5  ;;  %v3783_v32 = vrot.slane %v3782_v11, 4  ;;  %v4409_v46 = vrot.slane %v4407_v29, 4  ;;  %v3806_v45 = vor.u32 %v3805_v17, %v7896_v42  ;;  %v7950_v28 = vpop.f32.mrf.mxu0 }
 0x10e   : > { %v7913_v49 = vpop.f32.mrf.mxu1  ;;  %v3809_v16 = vshll.u32 %v5491_v23, 16  ;;  %v5572_v36 = vrot.slane %v5556_v22, 9  ;;  %v4417_v10 = vrot.slane %v5491_v23, 5  ;;  %v3814_v2 = vshrl.u32 %v5492_v57, 16  ;;  %8963 = vst [vmem:[#allocation18_spill] sm:$0xff] %v7950_v28 }
 0x10f   : > { %8960 = vst [vmem:[#allocation16_spill] sm:$0xff] %v7913_v49  ;;  %v3817_v62 = vshll.u32 %v5492_v57, 16  ;;  %v8961_v59 = vcombine.low %v7476_v30, %v7492_v58  ;;  %v4416_v11 = vrot.slane %v4414_v1, 4  ;;  %v3823_v29 = vshll.u32 %v7922_v24, 16  ;;  %v6145_v30 = vld [vmem:[%s6209_s26 + $0xcc] sm:$0xff]  }
 0x110   : > { %v7946_v61 = vpop.f32.mrf.mxu1  ;;  %v3827_v17 = vshrl.u32 %v7922_v24, 16  ;;  %v8964_v23 = vcombine.low %v7496_v15, %v7524_v19  ;;  %v3838_v58 = vshrl.u32 %v5495_v13, 16  ;;  %v3841_v22 = vshll.u32 %v5495_v13, 16  ;;  %v5498_v28 = vld [vmem:[%s6209_s26 + $0x90] sm:$0xf] }
 0x111   : > { %6002 = vmatmul.mubr.msk.bf16.gmra.mxu0 %vm696_vm3, %v6143_v54  ;;  %v7940_v54 = vld [vmem:[%s6209_s26 + $0x88] sm:$0xf]  ;;  %8962 = vst [vmem:[#allocation17_spill] sm:$0xff] %v7946_v61  ;;  %v7965_v21 = vsel %vm6539_vm7, %v4409_v46, %v4410_v25  ;;  %v3807_v15 = vrot.slane %v3806_v45, 4  ;;  %v3811_v19 = vrot.slane %v3809_v16, 5  ;;  %v3788_v13 = vsel %vm6253_vm4, %v3783_v32, %v7929_v35 }
 0x112   : > { %6005 = vmatprep.mubr.msk.bf16.mxu0 %vm696_vm3, %v6144_v43  ;;  %v3797_v43 = vrot.slane %v3796_v51, 4  ;;  %v3847_v57 = vshll.u32 %v7940_v54, 16  ;;  %v3851_v51 = vshrl.u32 %v7940_v54, 16  ;;  %v7975_v61 = vld [vmem:[%s6209_s26 + $0x80] sm:$0x1]  ;;  %v3816_v49 = vrot.slane %v3814_v2, 4 }
 0x113   : > { %v3819_v47 = vrot.slane %v3817_v62, 5  ;;  %v7985_v25 = vsel %vm6539_vm7, %v4416_v11, %v4417_v10  ;;  %v7987_v35 = vrot.slane %v3823_v29, 5  ;;  %v7990_v32 = vld [vmem:[%s6209_s26 + $0x94] sm:$0xf]  ;;  %v3840_v62 = vrot.slane %v3838_v58, 4 }
 0x114   : > { %5968 = vmatmul.mubr.msk.bf16.gmra.mxu1 %vm696_vm3, %v8961_v59  ;;  %v3778_v59 = vsel %vm6253_vm4, %v7927_v52, %v7851_v14  ;;  %v7978_v14 = vpop.f32.mrf.mxu1  ;;  %v3802_v52 = vsel %vm6253_vm4, %v3797_v43, %v7896_v42  ;;  %v3843_v45 = vrot.slane %v3841_v22, 5  ;;  %v7995_v16 = vrot.slane %v3847_v57, 5  ;;  %v8005_v43 = vld [vmem:[%s6209_s26 + $0x8c] sm:$0x1] }
 0x115   : > { %5971 = vmatprep.mubr.msk.bf16.mxu1 %vm696_vm3, %v8964_v23  ;;  %v7972_v23 = vsel %vm6539_vm7, %v5572_v36, %v4414_v1  ;;  %8965 = vst [vmem:[#allocation19_spill] sm:$0xff] %v7978_v14  ;;  %v3829_v1 = vrot.slane %v3827_v17, 4  ;;  %v3853_v36 = vrot.slane %v3851_v51, 4  ;;  %v8966_v42 = vcombine.low %v7630_v55, %v7634_v60 }
 0x116   : > { %v3812_v10 = vsel %vm6253_vm4, %v3807_v15, %v3811_v19  ;;  %v3833_v2 = vshll.u32 %v7975_v61, 16  ;;  %v3862_v11 = vshrl.u32 %v5498_v28, 16  ;;  %v3865_v29 = vshll.u32 %v5498_v28, 16 }
 0x117   : > { %v3820_v58 = vor.u32 %v3819_v47, %v3816_v49  ;;  %v3871_v55 = vshll.u32 %v7990_v32, 16  ;;  %v3875_v60 = vshrl.u32 %v7990_v32, 16  ;;  %v8969_v57 = vcombine.low %v7536_v12, %v7542_v34  ;;  %v5557_v49 = vld [vmem:[%s6209_s26 + $0x78] sm:$0xe] }
 0x118   : > { %v8019_v51 = vcombine.low %v3778_v59, %v3788_v13  ;;  %v3830_v47 = vor.u32 %v3829_v1, %v7987_v35  ;;  %v4421_v15 = vrot.slane %v7922_v24, 5  ;;  %v8030_v12 = vcombine.low %v3802_v52, %v3812_v10 }
 0x119   : > { %v7992_v46 = vpop.f32.mrf.mxu0  ;;  %6006 = vmatmul.mubr.msk.bf16.gmra.mxu0 %vm696_vm3, %v6145_v30  ;;  %v3844_v34 = vor.u32 %v3843_v45, %v3840_v62  ;;  %v3854_v59 = vor.u32 %v3853_v36, %v7995_v16  ;;  %v3857_v13 = vshll.u32 %v8005_v43, 16  ;;  %v8037_v1 = vrot.slane %v3833_v2, 5  ;;  %v8044_v62 = vld [vmem:[%s6209_s26 + $0x98] sm:$0x1] }
 0x11a   : > { %6045 = vmatprep.mubr.msk.bf16.mxu0 %vm696_vm3, %v8966_v42  ;;  %v5558_v42 = vld [vmem:[%s6209_s26 + $0x84] sm:$0xe]  ;;  %v4428_v24 = vrot.slane %v7940_v54, 5  ;;  %v3864_v28 = vrot.slane %v3862_v11, 4  ;;  %v3867_v30 = vrot.slane %v3865_v29, 5  ;;  %v5573_v52 = vrot.slane %v5557_v49, 9 }
 0x11b   : > { %v8007_v17 = vpop.f32.mrf.mxu0  ;;  %v8046_v45 = vrot.slane %v3871_v55, 5  ;;  %v3877_v36 = vrot.slane %v3875_v60, 4  ;;  %v4423_v2 = vrot.slane %v4421_v15, 4  ;;  %v5574_v54 = vrot.slane %v5558_v42, 9 }
 0x11c   : > { %8967 = vst [vmem:[#allocation20_spill] sm:$0xff] %v8007_v17  ;;  %v8013_v22 = vpop.f32.mrf.mxu1  ;;  %5972 = vmatmul.mubr.msk.bf16.gmra.mxu1 %vm696_vm3, %v8969_v57  ;;  %v8973_v29 = vcombine.low %v7685_v33, %v7696_v6  ;;  %v3855_v49 = vrot.slane %v3854_v59, 4  ;;  %v4431_v55 = vrot.slane %v8005_v43, 5  ;;  %v8057_v17 = vld [vmem:[%s6209_s26 + $0xa0] sm:$0xf]  ;;  %v3868_v42 = vor.u32 %v3867_v30, %v3864_v28  ;;  %v9004_v31 = vld [vmem:[#allocation19_spill] sm:$0xff] }
 0x11d   : > { %8968 = vst [vmem:[#allocation21_spill] sm:$0xff] %v8013_v22  ;;  %v8026_v19 = vpop.f32.mrf.mxu0  ;;  %6011 = vmatprep.mubr.msk.bf16.mxu1 %vm696_vm3, %v7675_v8  ;;  %v5501_v22 = vld [vmem:[%s6209_s26 + $0x9c] sm:$0xf]  ;;  %v3821_v8 = vrot.slane %v3820_v58, 4  ;;  %v3845_v58 = vrot.slane %v3844_v34, 4  ;;  %v3881_v33 = vshll.u32 %v8044_v62, 16  ;;  %v8071_v43 = vsel %vm6539_vm7, %v5573_v52, %v4421_v15 }
 0x11e   : > { %8970 = vst [vmem:[#allocation22_spill] sm:$0xff] %v8026_v19  ;;  %v8035_v57 = vpop.f32.mrf.mxu1  ;;  %v4424_v19 = vrot.slane %v7975_v61, 5  ;;  %v4430_v61 = vrot.slane %v4428_v24, 4  ;;  %v3886_v6 = vshrl.u32 %v5501_v22, 16  ;;  %v3878_v59 = vor.u32 %v3877_v36, %v8046_v45 }
 0x11f   : > { %8971 = vst [vmem:[#allocation23_spill] sm:$0xff] %v8035_v57  ;;  %v8041_v14 = vpop.f32.mrf.mxu0  ;;  %v3831_v57 = vrot.slane %v3830_v47, 4  ;;  %v8974_v47 = vcombine.low %v7713_v4, %v7735_v44  ;;  %v3826_v34 = vsel %vm6253_vm4, %v3821_v8, %v7987_v35  ;;  %v3889_v4 = vshll.u32 %v5501_v22, 16 }
 0x120   : > { %8972 = vst [vmem:[#allocation24_spill] sm:$0xff] %v8041_v14  ;;  %v8048_v10 = vpop.f32.mrf.mxu1  ;;  %v3859_v14 = vrot.slane %v3857_v13, 5  ;;  %v8081_v28 = vsel %vm6539_vm7, %v4423_v2, %v4424_v19  ;;  %v3895_v35 = vshll.u32 %v8057_v17, 16  ;;  %v3899_v15 = vshrl.u32 %v8057_v17, 16 }
 0x121   : > { %v5843_v11 = vpop.f32.mrf.mxu0  ;;  %6046 = vmatmul.mubr.msk.bf16.vlgmr.msra.gmra.mxu0 %vm696_vm3, %v8973_v29  ;;  %v3836_v30 = vsel %vm6253_vm4, %v3831_v57, %v8037_v1  ;;  %v8095_v19 = vsel %vm6539_vm7, %v5574_v54, %v4428_v24  ;;  %v8098_v57 = vld [vmem:[%s6209_s26 + $0xa4] sm:$0x1]  ;;  %v3869_v52 = vrot.slane %v3868_v42, 4  ;;  %v3888_v36 = vrot.slane %v3886_v6, 4  ;;  %v5559_v24 = vld [vmem:[%s6209_s26 + $0x90] sm:$0xe] }
 0x122   : > { %v8059_v60 = vpop.f32.mrf.mxu1  ;;  %6049 = vmatprep.mubr.msk.bf16.mxu0 %vm696_vm3, %v8974_v47  ;;  %v3860_v22 = vsel %vm6253_vm4, %v3855_v49, %v3859_v14  ;;  %v3891_v49 = vrot.slane %v3889_v4, 5  ;;  %v8120_v6 = vcombine.low %v3826_v34, %v3836_v30  ;;  %v5504_v4 = vld [vmem:[%s6209_s26 + $0xa8] sm:$0xf]  ;;  %v8977_v30 = vld [vmem:[#allocation5_spill] sm:$0xff] }
 0x123   : > { %v1500_v29 = vpop.f32.mrf.mxu0 }
 0x124   : > { %v5809_v44 = vpop.f32.mrf.mxu1  ;;  %6012 = vmatmul.mubr.msk.bf16.vlgmr.msra.gmra.mxu1 %vm696_vm3, %v7776_v53  ;;  %v3850_v53 = vsel %vm6253_vm4, %v3845_v58, %v7995_v16  ;;  %v3879_v58 = vrot.slane %v3878_v59, 4 }
 0x125   : > { %v1084_v13 = vadd.f32 %v5809_v44, %v7589_v5  ;;  %v5844_v8 = vpop.f32.mrf.mxu0  ;;  %6015 = vmatprep.mubr.msk.bf16.mxu1 %vm696_vm3, %v7780_v63  ;;  %v8102_v5 = vsel %vm6539_vm7, %v4430_v61, %v4431_v55  ;;  %v3883_v63 = vrot.slane %v3881_v33, 5  ;;  %v8110_v44 = vrot.slane %v3895_v35, 5 }
 0x126   : > { %v1075_v1 = vpop.f32.mrf.mxu1  ;;  %v3901_v55 = vrot.slane %v3899_v15, 4  ;;  %v3905_v61 = vshll.u32 %v8098_v57, 16  ;;  %v8122_v59 = vcombine.low %v3850_v53, %v3860_v22  ;;  %v8976_v15 = vcombine.low %v7836_v50, %v7864_v7  ;;  %v8141_v22 = vld [vmem:[%s6209_s26 + $0xac] sm:$0xf] }
 0x127   : > { %v8104_v2 = vadd.f32 %v5843_v11, %v1084_v13  ;;  %v1076_v16 = vadd.f32 %v1075_v1, %v7611_v26  ;;  %v1503_v14 = vpop.f32.mrf.mxu0  ;;  %v8975_v26 = vcombine.low %v7794_v18, %v7800_v37  ;;  %v3874_v18 = vsel %vm6253_vm4, %v3869_v52, %v8046_v45 }
 0x128   : > { %v5810_v54 = vpop.f32.mrf.mxu1  ;;  %v5575_v37 = vrot.slane %v5559_v24, 9  ;;  %v3884_v50 = vsel %vm6253_vm4, %v3879_v58, %v3883_v63  ;;  %v3892_v7 = vor.u32 %v3891_v49, %v3888_v36  ;;  %v3902_v45 = vor.u32 %v3901_v55, %v8110_v44  ;;  %v8978_v24 = vld [vmem:[#allocation7_spill] sm:$0xff]  ;;  %v5560_v36 = vld [vmem:[%s6209_s26 + $0x9c] sm:$0xe] }
 0x129   : > { %v8113_v42 = vadd.f32 %v1500_v29, %v1076_v16  ;;  %v1087_v11 = vadd.f32 %v5810_v54, %v7640_v39  ;;  %v5847_v33 = vpop.f32.mrf.mxu0  ;;  %6050 = vmatmul.mubr.msk.bf16.gmra.mxu0 %vm696_vm3, %v8975_v26  ;;  %v4435_v29 = vrot.slane %v7990_v32, 5  ;;  %v8146_v52 = vrot.slane %v3905_v61, 5 }
 0x12a   : > { %v1078_v35 = vpop.f32.mrf.mxu1  ;;  %6053 = vmatprep.mubr.msk.bf16.mxu0 %vm696_vm3, %v8976_v15  ;;  %v3910_v32 = vshrl.u32 %v5504_v4, 16  ;;  %v4438_v63 = vrot.slane %v8044_v62, 5  ;;  %v8156_v49 = vcombine.low %v3874_v18, %v3884_v50  ;;  %v3923_v61 = vshrl.u32 %v8141_v22, 16 }
 0x12b   : > { %v8135_v34 = vadd.f32 %v5844_v8, %v1087_v11  ;;  %v1079_v13 = vadd.f32 %v1078_v35, %v8977_v30  ;;  %v1516_v53 = vpop.f32.mrf.mxu0  ;;  %v3913_v8 = vshll.u32 %v5504_v4, 16  ;;  %v8160_v55 = vsel %vm6539_vm7, %v5575_v37, %v4435_v29  ;;  %v8979_v4 = vld [vmem:[#allocation10_spill] sm:$0xff] }
 0x12c   : > { %v5813_v1 = vpop.f32.mrf.mxu1  ;;  %6016 = vmatmul.mubr.msk.bf16.gmra.mxu1 %vm696_vm3, %v7903_v9  ;;  %v4442_v9 = vrot.slane %v8057_v17, 5  ;;  %v3893_v35 = vrot.slane %v3892_v7, 4  ;;  %v4437_v15 = vrot.slane %v4435_v29, 4  ;;  %v5507_v17 = vld [vmem:[%s6209_s26 + $0xb4] sm:$0xf]  ;;  %v3903_v18 = vrot.slane %v3902_v45, 4 }
 0x12d   : > { %v8148_v16 = vadd.f32 %v1503_v14, %v1079_v13  ;;  %v1100_v54 = vadd.f32 %v5813_v1, %v8978_v24  ;;  %v5848_v11 = vpop.f32.mrf.mxu0  ;;  %6019 = vmatprep.mubr.msk.bf16.mxu1 %vm696_vm3, %v7907_v48  ;;  %v3919_v14 = vshll.u32 %v8141_v22, 16  ;;  %v5576_v13 = vrot.slane %v5560_v36, 9  ;;  %v8980_v24 = vld [vmem:[#allocation13_spill] sm:$0xff]  ;;  %v8177_v7 = vld [vmem:[%s6209_s26 + $0xb0] sm:$0x1] }
 0x12e   : > { %v1091_v58 = vpop.f32.mrf.mxu1  ;;  %v3912_v50 = vrot.slane %v3910_v32, 4  ;;  %v3915_v37 = vrot.slane %v3913_v8, 5  ;;  %v4445_v29 = vrot.slane %v8098_v57, 5  ;;  %v8982_v45 = vcombine.low %v7933_v38, %v7965_v21  ;;  %v8186_v8 = vld [vmem:[%s6209_s26 + $0xb8] sm:$0xf] }
 0x12f   : > { %v8164_v26 = vadd.f32 %v5847_v33, %v1100_v54  ;;  %v1092_v48 = vadd.f32 %v1091_v58, %v8979_v4  ;;  %v1519_v62 = vpop.f32.mrf.mxu0  ;;  %v8981_v33 = vcombine.low %v7868_v40, %v7890_v3  ;;  %v4444_v54 = vrot.slane %v4442_v9, 4  ;;  %v8983_v4 = vld [vmem:[#allocation15_spill] sm:$0xff] }
 0x130   : > { %v5814_v30 = vpop.f32.mrf.mxu1  ;;  %v3925_v32 = vrot.slane %v3923_v61, 4  ;;  %v3934_v36 = vshrl.u32 %v5507_v17, 16  ;;  %v3937_v40 = vshll.u32 %v5507_v17, 16  ;;  %v8196_v21 = vsel %vm6539_vm7, %v4437_v15, %v4438_v63  ;;  %v8220_v17 = vld [vmem:[%s6209_s26 + $0xbc] sm:$0x1] }
 0x131   : > { %v8168_v1 = vadd.f32 %v1516_v53, %v1092_v48  ;;  %v1103_v39 = vadd.f32 %v5814_v30, %v8980_v24  ;;  %v5851_v47 = vpop.f32.mrf.mxu0  ;;  %6054 = vmatmul.mubr.msk.bf16.gmra.mxu0 %vm696_vm3, %v8981_v33  ;;  %v8183_v53 = vrot.slane %v3919_v14, 5  ;;  %v3898_v30 = vsel %vm6253_vm4, %v3893_v35, %v8110_v44  ;;  %v5561_v24 = vld [vmem:[%s6209_s26 + $0xa8] sm:$0xe] }
 0x132   : > { %v1094_v58 = vpop.f32.mrf.mxu1  ;;  %6057 = vmatprep.mubr.msk.bf16.mxu0 %vm696_vm3, %v8982_v45  ;;  %v3916_v14 = vor.u32 %v3915_v37, %v3912_v50  ;;  %v3929_v44 = vshll.u32 %v8177_v7, 16  ;;  %v5592_v37 = vcombine.low %v8160_v55, %v8196_v21  ;;  %v4449_v33 = vrot.slane %v8141_v22, 5  ;;  %v5563_v55 = vld [vmem:[%s6209_s26 + $0xc0] sm:$0xe] }
 0x133   : > { %v8188_v3 = vadd.f32 %v5848_v11, %v1103_v39  ;;  %v1095_v48 = vadd.f32 %v1094_v58, %v8983_v4  ;;  %v1532_v57 = vpop.f32.mrf.mxu0  ;;  %v3908_v39 = vsel %vm6253_vm4, %v3903_v18, %v8146_v52  ;;  %v8205_v11 = vsel %vm6539_vm7, %v5576_v13, %v4442_v9 }
 0x134   : > { %v5817_v38 = vpop.f32.mrf.mxu1  ;;  %6020 = vmatmul.mubr.msk.bf16.gmra.mxu1 %vm696_vm3, %v7915_v20  ;;  %v8215_v20 = vsel %vm6539_vm7, %v4444_v54, %v4445_v29  ;;  %v3943_v52 = vshll.u32 %v8186_v8, 16  ;;  %v3926_v15 = vor.u32 %v3925_v32, %v8183_v53  ;;  %v3939_v18 = vrot.slane %v3937_v40, 5 }
 0x135   : > { %v8208_v61 = vadd.f32 %v1519_v62, %v1095_v48  ;;  %v1116_v63 = vadd.f32 %v5817_v38, %v7844_v27  ;;  %v5852_v35 = vpop.f32.mrf.mxu0  ;;  %6023 = vmatprep.mubr.msk.bf16.mxu1 %vm696_vm3, %v8019_v51  ;;  %v3936_v62 = vrot.slane %v3934_v36, 4  ;;  %v3947_v13 = vshrl.u32 %v8186_v8, 16  ;;  %v5510_v48 = vld [vmem:[%s6209_s26 + $0xc0] sm:$0xf] }
 0x136   : > { %v1107_v9 = vpop.f32.mrf.mxu1  ;;  %v8230_v29 = vcombine.low %v3898_v30, %v3908_v39  ;;  %v3917_v45 = vrot.slane %v3916_v14, 4  ;;  %v8984_v40 = vcombine.low %v7972_v23, %v7985_v25  ;;  %v8241_v4 = vrot.slane %v3943_v52, 5  ;;  %v8246_v30 = vld [vmem:[%s6209_s26 + $0xc4] sm:$0xf] }
 0x137   : > { %v8223_v27 = vadd.f32 %v5851_v47, %v1116_v63  ;;  %v1108_v50 = vadd.f32 %v1107_v9, %v7886_v56  ;;  %v1535_v51 = vpop.f32.mrf.mxu0  ;;  %v3931_v47 = vrot.slane %v3929_v44, 5  ;;  %v3953_v22 = vshll.u32 %v8220_v17, 16  ;;  %v8986_v25 = vld [vmem:[#allocation18_spill] sm:$0xff] }
 0x138   : > { %v5818_v54 = vpop.f32.mrf.mxu1  ;;  %v3940_v39 = vor.u32 %v3939_v18, %v3936_v62  ;;  %v3949_v14 = vrot.slane %v3947_v13, 4  ;;  %v5577_v44 = vrot.slane %v5561_v24, 9  ;;  %v4451_v9 = vrot.slane %v4449_v33, 4 }
 0x139   : > { %v8234_v32 = vadd.f32 %v1532_v57, %v1108_v50  ;;  %v1119_v56 = vadd.f32 %v5818_v54, %v7925_v41  ;;  %v5855_v36 = vpop.f32.mrf.mxu0  ;;  %6058 = vmatmul.mubr.msk.bf16.gmra.mxu0 %vm696_vm3, %v8984_v40  ;;  %v8985_v57 = vcombine.low %v8071_v43, %v8081_v28  ;;  %v3927_v41 = vrot.slane %v3926_v15, 4  ;;  %v5562_v40 = vld [vmem:[%s6209_s26 + $0xb4] sm:$0xe] }
 0x13a   : > { %v1110_v38 = vpop.f32.mrf.mxu1  ;;  %v4452_v50 = vrot.slane %v8177_v7, 5  ;;  %v3958_v43 = vshrl.u32 %v5510_v48, 16  ;;  %v3961_v28 = vshll.u32 %v5510_v48, 16  ;;  %v3967_v15 = vshll.u32 %v8246_v30, 16 }
 0x13b   : > { %6061 = vmatprep.mubr.msk.bf16.mxu0 %vm696_vm3, %v8985_v57  ;;  %v8252_v23 = vadd.f32 %v5852_v35, %v1119_v56  ;;  %v1111_v63 = vadd.f32 %v1110_v38, %v8986_v25  ;;  %v1548_v52 = vpop.f32.mrf.mxu0  ;;  %v3971_v62 = vshrl.u32 %v8246_v30, 16  ;;  %v3922_v7 = vsel %vm6253_vm4, %v3917_v45, %v8183_v53  ;;  %v8987_v38 = vld [vmem:[#allocation20_spill] sm:$0xff]  ;;  %v8988_v25 = vld [vmem:[#allocation22_spill] sm:$0xff] }
 0x13c   : > { %v5821_v54 = vpop.f32.mrf.mxu1  ;;  %6024 = vmatmul.mubr.msk.bf16.gmra.mxu1 %vm696_vm3, %v8030_v12  ;;  %v8268_v12 = vrot.slane %v3953_v22, 5  ;;  %v3932_v56 = vsel %vm6253_vm4, %v3927_v41, %v3931_v47  ;;  %v4456_v48 = vrot.slane %v8186_v8, 5  ;;  %v8282_v45 = vrot.slane %v3940_v39, 4  ;;  %v8289_v22 = vld [vmem:[%s6209_s26 + $0xc8] sm:$0x1] }
 0x13d   : > { %v8260_v18 = vadd.f32 %v1535_v51, %v1111_v63  ;;  %v1132_v35 = vadd.f32 %v5821_v54, %v7992_v46  ;;  %v5856_v13 = vpop.f32.mrf.mxu0  ;;  %6027 = vmatprep.mubr.msk.bf16.mxu1 %vm696_vm3, %v8120_v6  ;;  %v3950_v51 = vor.u32 %v3949_v14, %v8241_v4  ;;  %v8275_v46 = vsel %vm6539_vm7, %v5577_v44, %v4449_v33 }
 0x13e   : > { %v1123_v24 = vpop.f32.mrf.mxu1  ;;  %v8286_v47 = vsel %vm6539_vm7, %v4451_v9, %v4452_v50  ;;  %v3960_v33 = vrot.slane %v3958_v43, 4  ;;  %v3963_v14 = vrot.slane %v3961_v28, 5  ;;  %v8291_v44 = vrot.slane %v3967_v15, 5  ;;  %v5513_v43 = vld [vmem:[%s6209_s26 + $0xcc] sm:$0xf] }
 0x13f   : > { %v8279_v6 = vadd.f32 %v5855_v36, %v1132_v35  ;;  %v1124_v57 = vadd.f32 %v1123_v24, %v8987_v38  ;;  %v1551_v53 = vpop.f32.mrf.mxu0  ;;  %v3973_v8 = vrot.slane %v3971_v62, 4  ;;  %v8989_v39 = vcombine.low %v8095_v19, %v8102_v5  ;;  %v8312_v5 = vld [vmem:[%s6209_s26 + $0xd0] sm:$0xf] }
 0x140   : > { %v5822_v41 = vpop.f32.mrf.mxu1  ;;  %v8300_v9 = vcombine.low %v3922_v7, %v3932_v56  ;;  %v5578_v50 = vrot.slane %v5562_v40, 9  ;;  %v4458_v15 = vrot.slane %v4456_v48, 4  ;;  %v4459_v62 = vrot.slane %v8220_v17, 5  ;;  %v8990_v7 = vld [vmem:[#allocation24_spill] sm:$0xff] }
 0x141   : > { %v8293_v36 = vadd.f32 %v1548_v52, %v1124_v57  ;;  %v1135_v63 = vadd.f32 %v5822_v41, %v8988_v25  ;;  %v5859_v54 = vpop.f32.mrf.mxu0  ;;  %6062 = vmatmul.mubr.msk.bf16.gmra.mxu0 %vm696_vm3, %v8989_v39  ;;  %v8307_v52 = vrot.slane %v3950_v51, 4  ;;  %v3977_v19 = vshll.u32 %v8289_v22, 16  ;;  %v8992_v41 = vld [vmem:[#allocation4_spill] sm:$0xff]  ;;  %v8993_v39 = vld [vmem:[#allocation3_spill] sm:$0xff] }
 0x142   : > { %v1126_v28 = vpop.f32.mrf.mxu1  ;;  %6065 = vmatprep.mubr.msk.bf16.mxu0 %vm696_vm3, %v5592_v37  ;;  %v5594_v40 = vcombine.low %v8275_v46, %v8286_v47  ;;  %v4463_v21 = vrot.slane %v8246_v30, 5  ;;  %v3964_v17 = vor.u32 %v3963_v14, %v3960_v33  ;;  %v3974_v51 = vor.u32 %v3973_v8, %v8291_v44 }
 0x143   : > { %v8314_v35 = vadd.f32 %v5856_v13, %v1135_v63  ;;  %v1127_v24 = vadd.f32 %v1126_v28, %v8990_v7  ;;  %v1564_v56 = vpop.f32.mrf.mxu0  ;;  %v3982_v38 = vshrl.u32 %v5513_v43, 16  ;;  %v3985_v57 = vshll.u32 %v5513_v43, 16 }
 0x144   : > { %v5825_v37 = vpop.f32.mrf.mxu1  ;;  %6028 = vmatmul.mubr.msk.bf16.gmra.mxu1 %vm696_vm3, %v8122_v59  ;;  %v3991_v46 = vshll.u32 %v8312_v5, 16  ;;  %v3995_v30 = vshrl.u32 %v8312_v5, 16  ;;  %v4457_v59 = vsel %vm6539_vm7, %v5578_v50, %v4456_v48  ;;  %v4460_v33 = vsel %vm6539_vm7, %v4458_v15, %v4459_v62  ;;  %v8994_v50 = vld [vmem:[#allocation6_spill] sm:$0xff] }
 0x145   : > { %v8324_v13 = vadd.f32 %v1551_v53, %v1127_v24  ;;  %v1148_v25 = vadd.f32 %v5825_v37, %v8992_v41  ;;  %v5860_v63 = vpop.f32.mrf.mxu0  ;;  %6031 = vmatprep.mubr.msk.bf16.mxu1 %vm696_vm3, %v8156_v49  ;;  %v3979_v14 = vrot.slane %v3977_v19, 5  ;;  %v5579_v53 = vrot.slane %v5563_v55, 9  ;;  %v5515_v19 = vld [vmem:[%s6209_s26 + $0xd4] sm:$0x1] }
 0x146   : > { %v1139_v47 = vpop.f32.mrf.mxu1  ;;  %v4465_v49 = vrot.slane %v4463_v21, 4  ;;  %v4466_v7 = vrot.slane %v8289_v22, 5  ;;  %v3965_v37 = vrot.slane %v3964_v17, 4  ;;  %v3975_v41 = vrot.slane %v3974_v51, 4  ;;  %v8996_v51 = vld [vmem:[#allocation8_spill] sm:$0xff] }
 0x147   : > { %8991 = vst [vmem:[#allocation5_spill] sm:$0xff] %v8324_v13  ;;  %v8335_v8 = vadd.f32 %v5859_v54, %v1148_v25  ;;  %v1140_v43 = vadd.f32 %v1139_v47, %v8993_v39  ;;  %v1567_v28 = vpop.f32.mrf.mxu0  ;;  %v3984_v58 = vrot.slane %v3982_v38, 4  ;;  %v3987_v13 = vrot.slane %v3985_v57, 5  ;;  %v8997_v47 = vld [vmem:[#allocation12_spill] sm:$0xff] }
 0x148   : > { %v5826_v24 = vpop.f32.mrf.mxu1  ;;  %v8995_v54 = vcombine.low %v8205_v11, %v8215_v20  ;;  %v8347_v55 = vrot.slane %v3991_v46, 5  ;;  %v3997_v22 = vrot.slane %v3995_v30, 4  ;;  %v3956_v17 = vsel %vm6253_vm4, %v8307_v52, %v8268_v12 }
 0x149   : > { %v8339_v48 = vadd.f32 %v1564_v56, %v1140_v43  ;;  %v1151_v15 = vadd.f32 %v5826_v24, %v8994_v50  ;;  %v5863_v62 = vpop.f32.mrf.mxu0  ;;  %v3946_v56 = vsel %vm6253_vm4, %v8282_v45, %v8241_v4  ;;  %v4470_v11 = vrot.slane %v8312_v5, 5  ;;  %v5564_v45 = vld [vmem:[%s6209_s26 + $0xcc] sm:$0xe] }
 0x14a   : > { %6066 = vmatmul.mubr.msk.bf16.gmra.mxu0 %vm696_vm3, %v8995_v54  ;;  %v1142_v25 = vpop.f32.mrf.mxu1  ;;  %v4464_v46 = vsel %vm6539_vm7, %v5579_v53, %v4463_v21  ;;  %v4467_v4 = vsel %vm6539_vm7, %v4465_v49, %v4466_v7  ;;  %v5595_v12 = vcombine.low %v4457_v59, %v4460_v33  ;;  %v3970_v52 = vsel %vm6253_vm4, %v3965_v37, %v8291_v44  ;;  %v8999_v54 = vld [vmem:[#allocation14_spill] sm:$0xff] }
 0x14b   : > { %6069 = vmatprep.mubr.msk.bf16.mxu0 %vm696_vm3, %v5594_v40  ;;  %v8359_v20 = vadd.f32 %v5860_v63, %v1151_v15  ;;  %v1143_v38 = vadd.f32 %v1142_v25, %v8996_v51  ;;  %v1580_v57 = vpop.f32.mrf.mxu0  ;;  %v3988_v5 = vor.u32 %v3987_v13, %v3984_v58  ;;  %v4001_v40 = vshll.u32 %v5515_v19, 16  ;;  %v8998_v13 = vld [vmem:[#allocation2_spill] sm:$0xff] }
 0x14c   : > { %v5829_v30 = vpop.f32.mrf.mxu1  ;;  %6032 = vmatmul.mubr.msk.bf16.gmra.mxu1 %vm696_vm3, %v8230_v29  ;;  %v3980_v53 = vsel %vm6253_vm4, %v3975_v41, %v3979_v14  ;;  %v3998_v29 = vor.u32 %v3997_v22, %v8347_v55  ;;  %v5596_v33 = vcombine.low %v4464_v46, %v4467_v4  ;;  %v5580_v43 = vrot.slane %v5564_v45, 9 }
 0x14d   : > { %v8372_v63 = vadd.f32 %v1567_v28, %v1143_v38  ;;  %v1164_v39 = vadd.f32 %v5829_v30, %v8997_v47  ;;  %v5864_v21 = vpop.f32.mrf.mxu0  ;;  %6035 = vmatprep.mubr.msk.bf16.mxu1 %vm696_vm3, %v8300_v9  ;;  %v4472_v49 = vrot.slane %v4470_v11, 4  ;;  %v4473_v44 = vrot.slane %v5515_v19, 5  ;;  %v9001_v30 = vld [vmem:[#allocation11_spill] sm:$0xff]  ;;  %v9002_v47 = vld [vmem:[#allocation16_spill] sm:$0xff] }
 0x14e   : > { %v1155_v59 = vpop.f32.mrf.mxu1  ;;  %v5530_v37 = vcombine.low %v3946_v56, %v3956_v17  ;;  %v3989_v50 = vrot.slane %v3988_v5, 4  ;;  %v4003_v15 = vrot.slane %v4001_v40, 5  ;;  %v5531_v22 = vcombine.low %v3970_v52, %v3980_v53  ;;  %v9000_v17 = vld [vmem:[#allocation9_spill] sm:$0xff] }
 0x14f   : > { %v8380_v58 = vadd.f32 %v5863_v62, %v1164_v39  ;;  %v1156_v28 = vadd.f32 %v1155_v59, %v8998_v13  ;;  %v1583_v7 = vpop.f32.mrf.mxu0  ;;  %v3999_v25 = vrot.slane %v3998_v29, 4  ;;  %v4471_v62 = vsel %vm6539_vm7, %v5580_v43, %v4470_v11  ;;  %v9003_v59 = vld [vmem:[#allocation17_spill] sm:$0xff] }
 0x150   : > { %v5830_v24 = vpop.f32.mrf.mxu1  ;;  %v4474_v19 = vsel %vm6539_vm7, %v4472_v49, %v4473_v44  ;;  %v3994_v4 = vsel %vm6253_vm4, %v3989_v50, %v8347_v55 }
 0x151   : > { %v8383_v9 = vadd.f32 %v1580_v57, %v1156_v28  ;;  %v1167_v14 = vadd.f32 %v5830_v24, %v8999_v54  ;;  %v5867_v41 = vpop.f32.mrf.mxu0  ;;  %v4004_v0 = vsel %vm6253_vm4, %v3999_v25, %v4003_v15  ;;  %v5597_v52 = vcombine.low %v4471_v62, %v4474_v19 }
 0x152   : > { %6070 = vmatmul.mubr.msk.bf16.gmra.mxu0 %vm696_vm3, %v5595_v12  ;;  %v1158_v51 = vpop.f32.mrf.mxu1  ;;  %v5532_v29 = vcombine.low %v3994_v4, %v4004_v0 }
 0x153   : > { %6073 = vmatprep.mubr.msk.bf16.mxu0 %vm696_vm3, %v5596_v33  ;;  %v8392_v56 = vadd.f32 %v5864_v21, %v1167_v14  ;;  %v1159_v38 = vadd.f32 %v1158_v51, %v9000_v17  ;;  %v1596_v57 = vpop.f32.mrf.mxu0 }
 0x154   : > { %v5833_v46 = vpop.f32.mrf.mxu1  ;;  %6036 = vmatmul.mubr.msk.bf16.gmra.mxu1 %vm696_vm3, %v5530_v37  ;;  %v9005_v37 = vld [vmem:[#allocation21_spill] sm:$0xff] }
 0x155   : > { %v8399_v45 = vadd.f32 %v1583_v7, %v1159_v38  ;;  %v1180_v12 = vadd.f32 %v5833_v46, %v9001_v30  ;;  %v5868_v11 = vpop.f32.mrf.mxu0  ;;  %6039 = vmatprep.mubr.msk.bf16.mxu1 %vm696_vm3, %v5531_v22 }
 0x156   : > { %v1171_v5 = vpop.f32.mrf.mxu1 }
 0x157   : > { %v8405_v40 = vadd.f32 %v5867_v41, %v1180_v12  ;;  %v1172_v39 = vadd.f32 %v1171_v5, %v9002_v47  ;;  %v1599_v21 = vpop.f32.mrf.mxu0  ;;  %v9006_v41 = vld [vmem:[#allocation23_spill] sm:$0xff] }
 0x158   : > { %v5834_v53 = vpop.f32.mrf.mxu1 }
 0x159   : > { %v8408_v55 = vadd.f32 %v1596_v57, %v1172_v39  ;;  %v1183_v33 = vadd.f32 %v5834_v53, %v9003_v59  ;;  %v5871_v43 = vpop.f32.mrf.mxu0 }
 0x15a   : > { %6074 = vmatmul.mubr.msk.bf16.gmra.mxu0 %vm696_vm3, %v5597_v52  ;;  %v1174_v49 = vpop.f32.mrf.mxu1 }
 0x15b   : > { %v8412_v44 = vadd.f32 %v5868_v11, %v1183_v33  ;;  %v1175_v13 = vadd.f32 %v1174_v49, %v9004_v31  ;;  %v1612_v28 = vpop.f32.mrf.mxu0 }
 0x15c   : > { %v5837_v7 = vpop.f32.mrf.mxu1  ;;  %6040 = vmatmul.mubr.msk.bf16.gmra.mxu1 %vm696_vm3, %v5532_v29 }
 0x15d   : > { %v8416_v24 = vadd.f32 %v1599_v21, %v1175_v13  ;;  %v1196_v50 = vadd.f32 %v5837_v7, %v9005_v37  ;;  %v5872_v15 = vpop.f32.mrf.mxu0 }
 0x15e   : > { %v1187_v54 = vpop.f32.mrf.mxu1 }
 0x15f   : > { %v8419_v14 = vadd.f32 %v5871_v43, %v1196_v50  ;;  %v1188_v22 = vadd.f32 %v1187_v54, %v9006_v41  ;;  %v1615_v25 = vpop.f32.mrf.mxu0 }
 0x160   : > { %v5838_v51 = vpop.f32.mrf.mxu1 }
 0x161   : > { %v8422_v62 = vadd.f32 %v1612_v28, %v1188_v22  ;;  %v1199_v19 = vadd.f32 %v5838_v51, %v8048_v10  ;;  %v5911_v17 = vpop.f32.mrf.mxu0 }
 0x162   : > { %v1190_v38 = vpop.f32.mrf.mxu1 }
 0x163   : > { %v8425_v57 = vadd.f32 %v5872_v15, %v1199_v19  ;;  %v1191_v46 = vadd.f32 %v1190_v38, %v8059_v60  ;;  %v2585_v4 = vpop.f32.mrf.mxu0 }
 0x164   : > { %v5877_v30 = vpop.f32.mrf.mxu1 }
 0x165   : > { %v8428_v12 = vadd.f32 %v1615_v25, %v1191_v46  ;;  %v1988_v11 = vadd.f32 %v5877_v30, %v8104_v2  ;;  %v5912_v0 = vpop.f32.mrf.mxu0 }
 0x166   : > { %v1859_v52 = vpop.f32.mrf.mxu1 }
 0x167   : > { %v8431_v5 = vadd.f32 %v5911_v17, %v1988_v11  ;;  %v1986_v47 = vadd.f32 %v1859_v52, %v8113_v42  ;;  %v2588_v39 = vpop.f32.mrf.mxu0 }
 0x168   : > { %v5878_v10 = vpop.f32.mrf.mxu1 }
 0x169   : > { %v8434_v21 = vadd.f32 %v2585_v4, %v1986_v47  ;;  %v1989_v53 = vadd.f32 %v5878_v10, %v8135_v34  ;;  %v5915_v29 = vpop.f32.mrf.mxu0 }
 0x16a   : > { %v1862_v60 = vpop.f32.mrf.mxu1 }
 0x16b   : > { %v8437_v59 = vadd.f32 %v5912_v0, %v1989_v53  ;;  %v1987_v33 = vadd.f32 %v1862_v60, %v8148_v16  ;;  %v2601_v43 = vpop.f32.mrf.mxu0 }
 0x16c   : > { %v5881_v2 = vpop.f32.mrf.mxu1 }
 0x16d   : > { %v8440_v49 = vadd.f32 %v2588_v39, %v1987_v33  ;;  %v1992_v31 = vadd.f32 %v5881_v2, %v8164_v26  ;;  %v5916_v13 = vpop.f32.mrf.mxu0 }
 0x16e   : > { %v1875_v42 = vpop.f32.mrf.mxu1 }
 0x16f   : > { %v8443_v28 = vadd.f32 %v5915_v29, %v1992_v31  ;;  %v1990_v7 = vadd.f32 %v1875_v42, %v8168_v1  ;;  %v2604_v37 = vpop.f32.mrf.mxu0 }
 0x170   : > { %v5882_v34 = vpop.f32.mrf.mxu1 }
 0x171   : > { %v8446_v50 = vadd.f32 %v2601_v43, %v1990_v7  ;;  %v1993_v15 = vadd.f32 %v5882_v34, %v8188_v3  ;;  %v5919_v54 = vpop.f32.mrf.mxu0  ;;  %v9007_v7 = vld [vmem:[#allocation5_spill] sm:$0xff] }
 0x172   : > { %v1878_v16 = vpop.f32.mrf.mxu1 }
 0x173   : > { %v8449_v41 = vadd.f32 %v5916_v13, %v1993_v15  ;;  %v1991_v22 = vadd.f32 %v1878_v16, %v8208_v61  ;;  %v2617_v25 = vpop.f32.mrf.mxu0 }
 0x174   : > { %v5885_v26 = vpop.f32.mrf.mxu1 }
 0x175   : > { %v8452_v51 = vadd.f32 %v2604_v37, %v1991_v22  ;;  %v1996_v19 = vadd.f32 %v5885_v26, %v8223_v27  ;;  %v5920_v17 = vpop.f32.mrf.mxu0 }
 0x176   : > { %v1891_v1 = vpop.f32.mrf.mxu1 }
 0x177   : > { %v8455_v38 = vadd.f32 %v5919_v54, %v1996_v19  ;;  %v1994_v46 = vadd.f32 %v1891_v1, %v8234_v32  ;;  %v2620_v4 = vpop.f32.mrf.mxu0 }
 0x178   : > { %v5886_v3 = vpop.f32.mrf.mxu1 }
 0x179   : > { %v8458_v30 = vadd.f32 %v2617_v25, %v1994_v46  ;;  %v1997_v11 = vadd.f32 %v5886_v3, %v8252_v23  ;;  %v5923_v0 = vpop.f32.mrf.mxu0 }
 0x17a   : > { %v1894_v61 = vpop.f32.mrf.mxu1 }
 0x17b   : > { %v8461_v52 = vadd.f32 %v5920_v17, %v1997_v11  ;;  %v1995_v47 = vadd.f32 %v1894_v61, %v8260_v18  ;;  %v2633_v39 = vpop.f32.mrf.mxu0 }
 0x17c   : > { %v5889_v27 = vpop.f32.mrf.mxu1 }
 0x17d   : > { %v8464_v10 = vadd.f32 %v2620_v4, %v1995_v47  ;;  %v2000_v53 = vadd.f32 %v5889_v27, %v8279_v6  ;;  %v5924_v29 = vpop.f32.mrf.mxu0 }
 0x17e   : > { %v1907_v32 = vpop.f32.mrf.mxu1 }
 0x17f   : > { %v8467_v60 = vadd.f32 %v5923_v0, %v2000_v53  ;;  %v1998_v33 = vadd.f32 %v1907_v32, %v8293_v36  ;;  %v2636_v43 = vpop.f32.mrf.mxu0 }
 0x180   : > { %v5890_v23 = vpop.f32.mrf.mxu1 }
 0x181   : > { %v8470_v2 = vadd.f32 %v2633_v39, %v1998_v33  ;;  %v2001_v31 = vadd.f32 %v5890_v23, %v8314_v35  ;;  %v5927_v13 = vpop.f32.mrf.mxu0 }
 0x182   : > { %v1910_v18 = vpop.f32.mrf.mxu1 }
 0x183   : > { %v8473_v42 = vadd.f32 %v5924_v29, %v2001_v31  ;;  %v1999_v37 = vadd.f32 %v1910_v18, %v9007_v7  ;;  %v2649_v34 = vpop.f32.mrf.mxu0 }
 0x184   : > { %v5893_v6 = vpop.f32.mrf.mxu1 }
 0x185   : > { %v8476_v15 = vadd.f32 %v2636_v43, %v1999_v37  ;;  %v2004_v54 = vadd.f32 %v5893_v6, %v8335_v8  ;;  %v5928_v16 = vpop.f32.mrf.mxu0 }
 0x186   : > { %v1923_v36 = vpop.f32.mrf.mxu1 }
 0x187   : > { %v8479_v22 = vadd.f32 %v5927_v13, %v2004_v54  ;;  %v2002_v25 = vadd.f32 %v1923_v36, %v8339_v48  ;;  %v2652_v26 = vpop.f32.mrf.mxu0 }
 0x188   : > { %v5894_v35 = vpop.f32.mrf.mxu1 }
 0x189   : > { %v8482_v19 = vadd.f32 %v2649_v34, %v2002_v25  ;;  %v2005_v17 = vadd.f32 %v5894_v35, %v8359_v20  ;;  %v5931_v1 = vpop.f32.mrf.mxu0 }
 0x18a   : > { %v1926_v46 = vpop.f32.mrf.mxu1 }
 0x18b   : > { %v8485_v4 = vadd.f32 %v5928_v16, %v2005_v17  ;;  %v2003_v3 = vadd.f32 %v1926_v46, %v8372_v63  ;;  %v2665_v11 = vpop.f32.mrf.mxu0 }
 0x18c   : > { %v5897_v8 = vpop.f32.mrf.mxu1 }
 0x18d   : > { %v8488_v0 = vadd.f32 %v2652_v26, %v2003_v3  ;;  %v2008_v61 = vadd.f32 %v5897_v8, %v8380_v58  ;;  %v5932_v47 = vpop.f32.mrf.mxu0 }
 0x18e   : > { %v1939_v48 = vpop.f32.mrf.mxu1 }
 0x18f   : > { %v8491_v39 = vadd.f32 %v5931_v1, %v2008_v61  ;;  %v2006_v27 = vadd.f32 %v1939_v48, %v8383_v9  ;;  %v2668_v53 = vpop.f32.mrf.mxu0 }
 0x190   : > { %v5898_v20 = vpop.f32.mrf.mxu1 }
 0x191   : > { %v8494_v29 = vadd.f32 %v2665_v11, %v2006_v27  ;;  %v2009_v32 = vadd.f32 %v5898_v20, %v8392_v56  ;;  %v5935_v33 = vpop.f32.mrf.mxu0 }
 0x192   : > { %v1942_v63 = vpop.f32.mrf.mxu1 }
 0x193   : > { %v8497_v43 = vadd.f32 %v5932_v47, %v2009_v32  ;;  %v2007_v23 = vadd.f32 %v1942_v63, %v8399_v45  ;;  %v2681_v31 = vpop.f32.mrf.mxu0 }
 0x194   : > { %v5901_v58 = vpop.f32.mrf.mxu1 }
 0x195   : > { %v8500_v13 = vadd.f32 %v2668_v53, %v2007_v23  ;;  %v2012_v18 = vadd.f32 %v5901_v58, %v8405_v40  ;;  %v5936_v7 = vpop.f32.mrf.mxu0 }
 0x196   : > { %v1955_v9 = vpop.f32.mrf.mxu1 }
 0x197   : > { %v8503_v37 = vadd.f32 %v5935_v33, %v2012_v18  ;;  %v2010_v34 = vadd.f32 %v1955_v9, %v8408_v55  ;;  %v2684_v6 = vpop.f32.mrf.mxu0 }
 0x198   : > { %v5902_v56 = vpop.f32.mrf.mxu1 }
 0x199   : > { %v8506_v54 = vadd.f32 %v2681_v31, %v2010_v34  ;;  %v2013_v16 = vadd.f32 %v5902_v56, %v8412_v44  ;;  %v5939_v36 = vpop.f32.mrf.mxu0 }
 0x19a   : > { %v1958_v45 = vpop.f32.mrf.mxu1 }
 0x19b   : > { %9008 = vst [vmem:[#allocation7_spill] sm:$0xff] %v8506_v54  ;;  %v8509_v25 = vadd.f32 %v5936_v7, %v2013_v16  ;;  %v2011_v26 = vadd.f32 %v1958_v45, %v8416_v24  ;;  %v2697_v35 = vpop.f32.mrf.mxu0 }
 0x19c   : > { %v5905_v40 = vpop.f32.mrf.mxu1 }
 0x19d   : > { %v8512_v17 = vadd.f32 %v2684_v6, %v2011_v26  ;;  %v2016_v1 = vadd.f32 %v5905_v40, %v8419_v14  ;;  %v5940_v46 = vpop.f32.mrf.mxu0 }
 0x19e   : > { %v1971_v55 = vpop.f32.mrf.mxu1 }
 0x19f   : > { %9009 = vst [vmem:[#allocation10_spill] sm:$0xff] %v8512_v17  ;;  %v8515_v3 = vadd.f32 %v5939_v36, %v2016_v1  ;;  %v2014_v11 = vadd.f32 %v1971_v55, %v8422_v62  ;;  %v2700_v8 = vpop.f32.mrf.mxu0 }
 0x1a0   : > { %v5906_v44 = vpop.f32.mrf.mxu1 }
 0x1a1   : > { %v8518_v61 = vadd.f32 %v2697_v35, %v2014_v11  ;;  %v2017_v47 = vadd.f32 %v5906_v44, %v8425_v57  ;;  %v5979_v48 = vpop.f32.mrf.mxu0 }
 0x1a2   : > { %v1974_v24 = vpop.f32.mrf.mxu1 }
 0x1a3   : > { %9010 = vst [vmem:[#allocation13_spill] sm:$0xff] %v8518_v61  ;;  %v8521_v27 = vadd.f32 %v5940_v46, %v2017_v47  ;;  %v2015_v53 = vadd.f32 %v1974_v24, %v8428_v12  ;;  %v8524_v20 = vpop.f32.mrf.mxu0 }
 0x1a4   : > { %v5945_v14 = vpop.f32.mrf.mxu1 }
 0x1a5   : > { %v8526_v32 = vadd.f32 %v2700_v8, %v2015_v53  ;;  %v3184_v33 = vadd.f32 %v5945_v14, %v8431_v5  ;;  %v5980_v62 = vpop.f32.mrf.mxu0 }
 0x1a6   : > { %v8529_v63 = vpop.f32.mrf.mxu1 }
 0x1a7   : > { %9011 = vst [vmem:[#allocation15_spill] sm:$0xff] %v8526_v32  ;;  %v8531_v23 = vadd.f32 %v5979_v48, %v3184_v33  ;;  %v8533_v31 = vpop.f32.mrf.mxu0 }
 0x1a8   : > { %v5946_v57 = vpop.f32.mrf.mxu1 }
 0x1a9   : > { %v3185_v58 = vadd.f32 %v5946_v57, %v8437_v59  ;;  %v5983_v18 = vpop.f32.mrf.mxu0 }
 0x1aa   : > { %v8536_v7 = vpop.f32.mrf.mxu1 }
 0x1ab   : > { %v8538_v12 = vadd.f32 %v5980_v62, %v3185_v58  ;;  %v8540_v9 = vpop.f32.mrf.mxu0 }
 0x1ac   : > { %v5949_v34 = vpop.f32.mrf.mxu1 }
 0x1ad   : > { %v3188_v5 = vadd.f32 %v5949_v34, %v8443_v28  ;;  %v5984_v6 = vpop.f32.mrf.mxu0 }
 0x1ae   : > { %v8543_v56 = vpop.f32.mrf.mxu1 }
 0x1af   : > { %v8545_v16 = vadd.f32 %v5983_v18, %v3188_v5  ;;  %v8547_v36 = vpop.f32.mrf.mxu0 }
 0x1b0   : > { %v5950_v45 = vpop.f32.mrf.mxu1 }
 0x1b1   : > { %v3189_v59 = vadd.f32 %v5950_v45, %v8449_v41  ;;  %v5987_v26 = vpop.f32.mrf.mxu0 }
 0x1b2   : > { %v8550_v35 = vpop.f32.mrf.mxu1 }
 0x1b3   : > { %v8552_v40 = vadd.f32 %v5984_v6, %v3189_v59  ;;  %v8554_v1 = vpop.f32.mrf.mxu0 }
 0x1b4   : > { %v5953_v46 = vpop.f32.mrf.mxu1 }
 0x1b5   : > { %v3192_v28 = vadd.f32 %v5953_v46, %v8455_v38  ;;  %v5988_v55 = vpop.f32.mrf.mxu0 }
 0x1b6   : > { %v8557_v11 = vpop.f32.mrf.mxu1 }
 0x1b7   : > { %v8559_v8 = vadd.f32 %v5987_v26, %v3192_v28  ;;  %v8561_v44 = vpop.f32.mrf.mxu0 }
 0x1b8   : > { %v5954_v47 = vpop.f32.mrf.mxu1 }
 0x1b9   : > { %v3193_v41 = vadd.f32 %v5954_v47, %v8461_v52  ;;  %v5991_v48 = vpop.f32.mrf.mxu0 }
 0x1ba   : > { %v8564_v24 = vpop.f32.mrf.mxu1 }
 0x1bb   : > { %v8566_v53 = vadd.f32 %v5988_v55, %v3193_v41  ;;  %v8568_v14 = vpop.f32.mrf.mxu0 }
 0x1bc   : > { %v5957_v33 = vpop.f32.mrf.mxu1 }
 0x1bd   : > { %v3196_v38 = vadd.f32 %v5957_v33, %v8467_v60  ;;  %v5992_v62 = vpop.f32.mrf.mxu0 }
 0x1be   : > { %v8571_v57 = vpop.f32.mrf.mxu1 }
 0x1bf   : > { %v8573_v58 = vadd.f32 %v5991_v48, %v3196_v38  ;;  %v8575_v18 = vpop.f32.mrf.mxu0 }
 0x1c0   : > { %v5958_v34 = vpop.f32.mrf.mxu1 }
 0x1c1   : > { %v3197_v52 = vadd.f32 %v5958_v34, %v8473_v42  ;;  %v5995_v5 = vpop.f32.mrf.mxu0 }
 0x1c2   : > { %v8578_v6 = vpop.f32.mrf.mxu1 }
 0x1c3   : > { %v8580_v45 = vadd.f32 %v5992_v62, %v3197_v52  ;;  %v8582_v59 = vpop.f32.mrf.mxu0 }
 0x1c4   : > { %v5961_v26 = vpop.f32.mrf.mxu1 }
 0x1c5   : > { %v3200_v60 = vadd.f32 %v5961_v26, %v8479_v22  ;;  %v5996_v46 = vpop.f32.mrf.mxu0 }
 0x1c6   : > { %v8585_v28 = vpop.f32.mrf.mxu1 }
 0x1c7   : > { %v8587_v55 = vadd.f32 %v5995_v5, %v3200_v60  ;;  %v8589_v47 = vpop.f32.mrf.mxu0 }
 0x1c8   : > { %v5962_v41 = vpop.f32.mrf.mxu1 }
 0x1c9   : > { %v3201_v42 = vadd.f32 %v5962_v41, %v8485_v4  ;;  %v5999_v48 = vpop.f32.mrf.mxu0 }
 0x1ca   : > { %v8592_v33 = vpop.f32.mrf.mxu1 }
 0x1cb   : > { %v8594_v38 = vadd.f32 %v5996_v46, %v3201_v42  ;;  %v8596_v62 = vpop.f32.mrf.mxu0 }
 0x1cc   : > { %v5965_v34 = vpop.f32.mrf.mxu1 }
 0x1cd   : > { %v3204_v22 = vadd.f32 %v5965_v34, %v8491_v39  ;;  %v6000_v52 = vpop.f32.mrf.mxu0 }
 0x1ce   : > { %v8599_v26 = vpop.f32.mrf.mxu1 }
 0x1cf   : > { %v8601_v5 = vadd.f32 %v5999_v48, %v3204_v22  ;;  %v8603_v60 = vpop.f32.mrf.mxu0 }
 0x1d0   : > { %9013 = vst [vmem:[#allocation20_spill] sm:$0xff] %v8603_v60  ;;  %v5966_v32 = vpop.f32.mrf.mxu1 }
 0x1d1   : > { %9012 = vst [vmem:[#allocation18_spill] sm:$0xff] %v8601_v5  ;;  %v3205_v4 = vadd.f32 %v5966_v32, %v8497_v43  ;;  %v6003_v41 = vpop.f32.mrf.mxu0 }
 0x1d2   : > { %v8606_v61 = vpop.f32.mrf.mxu1 }
 0x1d3   : > { %v8608_v46 = vadd.f32 %v6000_v52, %v3205_v4  ;;  %v8610_v42 = vpop.f32.mrf.mxu0 }
 0x1d4   : > { %9015 = vst [vmem:[#allocation24_spill] sm:$0xff] %v8610_v42  ;;  %v5969_v17 = vpop.f32.mrf.mxu1 }
 0x1d5   : > { %9014 = vst [vmem:[#allocation22_spill] sm:$0xff] %v8608_v46  ;;  %v3208_v39 = vadd.f32 %v5969_v17, %v8503_v37  ;;  %v6004_v34 = vpop.f32.mrf.mxu0 }
 0x1d6   : > { %v8613_v54 = vpop.f32.mrf.mxu1 }
 0x1d7   : > { %v8615_v48 = vadd.f32 %v6003_v41, %v3208_v39  ;;  %v8617_v22 = vpop.f32.mrf.mxu0 }
 0x1d8   : > { %9016 = vst [vmem:[#allocation4_spill] sm:$0xff] %v8617_v22  ;;  %v5970_v60 = vpop.f32.mrf.mxu1 }
 0x1d9   : > { %v3209_v43 = vadd.f32 %v5970_v60, %v8509_v25  ;;  %v6007_v32 = vpop.f32.mrf.mxu0  ;;  %v3182_v25 = vadd.f32 %v8529_v63, %v8434_v21 }
 0x1da   : > { %v8620_v5 = vpop.f32.mrf.mxu1 }
 0x1db   : > { %v8622_v52 = vadd.f32 %v6004_v34, %v3209_v43  ;;  %v8624_v4 = vpop.f32.mrf.mxu0 }
 0x1dc   : > { %9018 = vst [vmem:[#allocation6_spill] sm:$0xff] %v8624_v4  ;;  %v5973_v42 = vpop.f32.mrf.mxu1 }
 0x1dd   : > { %9017 = vst [vmem:[#allocation3_spill] sm:$0xff] %v8622_v52  ;;  %v3212_v37 = vadd.f32 %v5973_v42, %v8515_v3  ;;  %v6008_v17 = vpop.f32.mrf.mxu0  ;;  %v3541_v42 = vadd.f32 %v8524_v20, %v3182_v25 }
 0x1de   : > { %v8627_v46 = vpop.f32.mrf.mxu1 }
 0x1df   : > { %9019 = vst [vmem:[#allocation8_spill] sm:$0xff] %v8627_v46  ;;  %v8629_v41 = vadd.f32 %v6007_v32, %v3212_v37  ;;  %v8631_v39 = vpop.f32.mrf.mxu0  ;;  %v3183_v32 = vadd.f32 %v8536_v7, %v8440_v49  ;;  %v8651_v49 = vld [vmem:[%s8824_s2] ss:$0 sm:$0xff] }
 0x1e0   : > { %9021 = vst [vmem:[#allocation2_spill] sm:$0xff] %v8631_v39  ;;  %v5974_v22 = vpop.f32.mrf.mxu1 }
 0x1e1   : > { %9020 = vst [vmem:[#allocation12_spill] sm:$0xff] %v8629_v41  ;;  %v3213_v60 = vadd.f32 %v5974_v22, %v8521_v27  ;;  %v6047_v34 = vpop.f32.mrf.mxu0  ;;  %v3542_v27 = vadd.f32 %v8533_v31, %v3183_v32  ;;  %v3186_v22 = vadd.f32 %v8543_v56, %v8446_v50 }
 0x1e2   : > { %v8636_v43 = vpop.f32.mrf.mxu1 }
 0x1e3   : > { %v8638_v4 = vadd.f32 %v6008_v17, %v3213_v60  ;;  %v4610_v52 = vpop.f32.mrf.mxu0  ;;  %v3545_v31 = vadd.f32 %v8540_v9, %v3186_v22 }
 0x1e4   : > { %v6013_v3 = vpop.f32.mrf.mxu1 }
 0x1e5   : > { %9022 = vst [vmem:[#allocation14_spill] sm:$0xff] %v8638_v4  ;;  %v6048_v37 = vpop.f32.mrf.mxu0  ;;  %v4269_v41 = vadd.f32 %v6013_v3, %v8531_v23 }
 0x1e6   : > { %v4140_v39 = vpop.f32.mrf.mxu1 }
 0x1e7   : > { %v4267_v46 = vadd.f32 %v4140_v39, %v3541_v42  ;;  %v4613_v21 = vpop.f32.mrf.mxu0  ;;  %v4739_v7 = vadd.f32 %v6047_v34, %v4269_v41 }
 0x1e8   : > { %v6014_v63 = vpop.f32.mrf.mxu1 }
 0x1e9   : > { %v4737_v17 = vadd.f32 %v4610_v52, %v4267_v46  ;;  %v4270_v60 = vadd.f32 %v6014_v63, %v8538_v12  ;;  %v6051_v4 = vpop.f32.mrf.mxu0  ;;  %v3187_v12 = vadd.f32 %v8550_v35, %v8452_v51  ;;  %v4778_v52 = vadd.f32 %v8651_v49, %v4739_v7 }
 0x1ea   : > { %v4143_v20 = vpop.f32.mrf.mxu1  ;;  %v3190_v63 = vadd.f32 %v8557_v11, %v8458_v30 }
 0x1eb   : > { %v4776_v23 = vadd.f32 %v8651_v49, %v4737_v17  ;;  %v4268_v39 = vadd.f32 %v4143_v20, %v3542_v27  ;;  %v4626_v25 = vpop.f32.mrf.mxu0  ;;  %v4740_v42 = vadd.f32 %v6048_v37, %v4270_v60  ;;  %v3546_v35 = vadd.f32 %v8547_v36, %v3187_v12 }
 0x1ec   : > { %v6017_v3 = vpop.f32.mrf.mxu1 }
 0x1ed   : > { %v4738_v50 = vadd.f32 %v4613_v21, %v4268_v39  ;;  %4917 = vxpose.xlu0.b32.start [1/16] (narrow) %v4776_v23, 8  ;;  %v6052_v56 = vpop.f32.mrf.mxu0  ;;  %v4845_v27 = vmul.f32 %v4776_v23, %v4776_v23  ;;  %v4273_v9 = vadd.f32 %v6017_v3, %v8545_v16  ;;  %v4779_v21 = vadd.f32 %v8651_v49, %v4740_v42 }
 0x1ee   : > { %v4156_v46 = vpop.f32.mrf.mxu1  ;;  %v4847_v39 = vmul.f32 %v4778_v52, %v4778_v52  ;;  %v3549_v16 = vadd.f32 %v8554_v1, %v3190_v63 }
 0x1ef   : > { %v4777_v32 = vadd.f32 %v8651_v49, %v4738_v50  ;;  %v4271_v41 = vadd.f32 %v4156_v46, %v3545_v31  ;;  %v4629_v34 = vpop.f32.mrf.mxu0  ;;  %v4743_v3 = vadd.f32 %v6051_v4, %v4273_v9  ;;  %v4848_v46 = vmul.f32 %v4779_v21, %v4779_v21 }
 0x1f0   : > { %v6018_v37 = vpop.f32.mrf.mxu1 }
 0x1f1   : > { %v4808_v22 = vadd.f32 %v4777_v32, %v4776_v23  ;;  %v4846_v17 = vmul.f32 %v4777_v32, %v4777_v32  ;;  %v4741_v60 = vadd.f32 %v4626_v25, %v4271_v41  ;;  %4918 = vxpose.xlu0.b32.cont [2/16] (narrow) %v4777_v32, 8  ;;  %v6055_v51 = vpop.f32.mrf.mxu0  ;;  %v4274_v20 = vadd.f32 %v6018_v37, %v8552_v40 }
 0x1f2   : > { %v4159_v7 = vpop.f32.mrf.mxu1  ;;  %v3191_v25 = vadd.f32 %v8564_v24, %v8464_v10  ;;  %v8671_v63 = vadd.f32 %v8651_v49, %v4743_v3 }
 0x1f3   : > { %v4809_v31 = vadd.f32 %v4808_v22, %v4778_v52  ;;  %v4877_v50 = vadd.f32 %v4846_v17, %v4845_v27  ;;  %v4780_v30 = vadd.f32 %v8651_v49, %v4741_v60  ;;  %v4642_v11 = vpop.f32.mrf.mxu0  ;;  %v4272_v42 = vadd.f32 %v4159_v7, %v3546_v35 }
 0x1f4   : > { %v6021_v23 = vpop.f32.mrf.mxu1  ;;  %v4744_v41 = vadd.f32 %v6052_v56, %v4274_v20  ;;  %v3550_v9 = vadd.f32 %v8561_v44, %v3191_v25  ;;  %v4851_v44 = vmul.f32 %v8671_v63, %v8671_v63 }
 0x1f5   : > { %v4878_v32 = vadd.f32 %v4877_v50, %v4847_v39  ;;  %v4810_v36 = vadd.f32 %v4809_v31, %v4779_v21  ;;  %4919 = vxpose.xlu0.b32.cont [3/16] (narrow) %v4778_v52, 8  ;;  %v6056_v40 = vpop.f32.mrf.mxu0  ;;  %v4849_v12 = vmul.f32 %v4780_v30, %v4780_v30  ;;  %v4742_v37 = vadd.f32 %v4629_v34, %v4272_v42 }
 0x1f6   : > { %v4172_v27 = vpop.f32.mrf.mxu1  ;;  %v4277_v60 = vadd.f32 %v6021_v23, %v8559_v8  ;;  %v3194_v52 = vadd.f32 %v8571_v57, %v8470_v2  ;;  %v8678_v20 = vadd.f32 %v8651_v49, %v4744_v41  ;;  %v3195_v23 = vadd.f32 %v8578_v6, %v8476_v15 }
 0x1f7   : > { %v4811_v22 = vadd.f32 %v4810_v36, %v4780_v30  ;;  %v4879_v17 = vadd.f32 %v4878_v32, %v4848_v46  ;;  %v4275_v1 = vadd.f32 %v4172_v27, %v3549_v16  ;;  %v4645_v4 = vpop.f32.mrf.mxu0  ;;  %v4781_v10 = vadd.f32 %v8651_v49, %v4742_v37 }
 0x1f8   : > { %v6022_v24 = vpop.f32.mrf.mxu1  ;;  %v4747_v50 = vadd.f32 %v6055_v51, %v4277_v60  ;;  %v3553_v42 = vadd.f32 %v8568_v14, %v3194_v52  ;;  %v4852_v25 = vmul.f32 %v8678_v20, %v8678_v20  ;;  %v3198_v60 = vadd.f32 %v8585_v28, %v8482_v19 }
 0x1f9   : > { %v4880_v56 = vadd.f32 %v4879_v17, %v4849_v12  ;;  %v4745_v34 = vadd.f32 %v4642_v11, %v4275_v1  ;;  %4920 = vxpose.xlu0.b32.cont [4/16] (narrow) %v4779_v21, 8  ;;  %v6059_v35 = vpop.f32.mrf.mxu0  ;;  %v4812_v8 = vadd.f32 %v4811_v22, %v4781_v10  ;;  %v4850_v7 = vmul.f32 %v4781_v10, %v4781_v10 }
 0x1fa   : > { %v4278_v39 = vadd.f32 %v6022_v24, %v8566_v53  ;;  %v4175_v31 = vpop.f32.mrf.mxu1  ;;  %v8694_v41 = vadd.f32 %v8651_v49, %v4747_v50  ;;  %v3557_v50 = vadd.f32 %v8582_v59, %v3198_v60 }
 0x1fb   : > { %v4276_v16 = vadd.f32 %v4175_v31, %v3550_v9  ;;  %v4658_v3 = vpop.f32.mrf.mxu0  ;;  %v4813_v2 = vadd.f32 %v4812_v8, %v8671_v63  ;;  %v4881_v57 = vadd.f32 %v4880_v56, %v4850_v7  ;;  %v8685_v21 = vadd.f32 %v8651_v49, %v4745_v34 }
 0x1fc   : > { %v6025_v11 = vpop.f32.mrf.mxu1  ;;  %v4748_v36 = vadd.f32 %v6056_v40, %v4278_v39  ;;  %v3554_v40 = vadd.f32 %v8575_v18, %v3195_v23  ;;  %v4855_v18 = vmul.f32 %v8694_v41, %v8694_v41 }
 0x1fd   : > { %v4746_v53 = vadd.f32 %v4645_v4, %v4276_v16  ;;  %4921 = vxpose.xlu0.b32.cont [5/16] (narrow) %v4780_v30, 8  ;;  %v6060_v51 = vpop.f32.mrf.mxu0  ;;  %v4882_v46 = vadd.f32 %v4881_v57, %v4851_v44  ;;  %v4814_v32 = vadd.f32 %v4813_v2, %v8678_v20  ;;  %v4853_v6 = vmul.f32 %v8685_v21, %v8685_v21 }
 0x1fe   : > { %v4188_v12 = vpop.f32.mrf.mxu1  ;;  %v4281_v22 = vadd.f32 %v6025_v11, %v8573_v58  ;;  %v8709_v52 = vadd.f32 %v8651_v49, %v4748_v36  ;;  %v3199_v16 = vadd.f32 %v8592_v33, %v8488_v0 }
 0x1ff   : > { %v8697_v37 = vadd.f32 %v8651_v49, %v4746_v53  ;;  %v4279_v14 = vadd.f32 %v4188_v12, %v3553_v42  ;;  %v4661_v27 = vpop.f32.mrf.mxu0  ;;  %v4815_v15 = vadd.f32 %v4814_v32, %v8685_v21  ;;  %v4883_v30 = vadd.f32 %v4882_v46, %v4852_v25 }
 0x200   : > { %v6026_v17 = vpop.f32.mrf.mxu1  ;;  %v4751_v39 = vadd.f32 %v6059_v35, %v4281_v22  ;;  %v4856_v44 = vmul.f32 %v8709_v52, %v8709_v52  ;;  %v3202_v32 = vadd.f32 %v8599_v26, %v8494_v29 }
 0x201   : > { %v4854_v1 = vmul.f32 %v8697_v37, %v8697_v37  ;;  %v4749_v4 = vadd.f32 %v4658_v3, %v4279_v14  ;;  %4922 = vxpose.xlu0.b32.cont [6/16] (narrow) %v4781_v10, 8  ;;  %v6063_v24 = vpop.f32.mrf.mxu0  ;;  %v4884_v9 = vadd.f32 %v4883_v30, %v4853_v6  ;;  %v4816_v56 = vadd.f32 %v4815_v15, %v8697_v37 }
 0x202   : > { %v4282_v58 = vadd.f32 %v6026_v17, %v8580_v45  ;;  %v4191_v34 = vpop.f32.mrf.mxu1  ;;  %v8731_v0 = vadd.f32 %v8651_v49, %v4751_v39 }
 0x203   : > { %v4280_v8 = vadd.f32 %v4191_v34, %v3554_v40  ;;  %v4674_v19 = vpop.f32.mrf.mxu0  ;;  %v4817_v28 = vadd.f32 %v4816_v56, %v8694_v41  ;;  %v4885_v7 = vadd.f32 %v4884_v9, %v4854_v1  ;;  %v8717_v10 = vadd.f32 %v8651_v49, %v4749_v4 }
 0x204   : > { %v6029_v31 = vpop.f32.mrf.mxu1  ;;  %v4752_v35 = vadd.f32 %v6060_v51, %v4282_v58  ;;  %v3558_v51 = vadd.f32 %v8589_v47, %v3199_v16  ;;  %v4859_v17 = vmul.f32 %v8731_v0, %v8731_v0  ;;  %v3561_v1 = vadd.f32 %v8596_v62, %v3202_v32 }
 0x205   : > { %v4750_v45 = vadd.f32 %v4661_v27, %v4280_v8  ;;  %4923 = vxpose.xlu0.b32.cont [7/16] (narrow) %v8671_v63, 8  ;;  %v6064_v3 = vpop.f32.mrf.mxu0  ;;  %v4886_v2 = vadd.f32 %v4885_v7, %v4855_v18  ;;  %v4818_v57 = vadd.f32 %v4817_v28, %v8709_v52  ;;  %v4285_v59 = vadd.f32 %v6029_v31, %v8587_v55 }
 0x206   : > { %v4204_v11 = vpop.f32.mrf.mxu1  ;;  %v4857_v63 = vmul.f32 %v8717_v10, %v8717_v10  ;;  %v8743_v27 = vadd.f32 %v8651_v49, %v4752_v35  ;;  %v3203_v4 = vadd.f32 %v8606_v61, %v8500_v13 }
 0x207   : > { %v8727_v42 = vadd.f32 %v8651_v49, %v4750_v45  ;;  %v4283_v23 = vadd.f32 %v4204_v11, %v3557_v50  ;;  %v4677_v53 = vpop.f32.mrf.mxu0  ;;  %v4819_v33 = vadd.f32 %v4818_v57, %v8717_v10  ;;  %v4887_v25 = vadd.f32 %v4886_v2, %v4856_v44  ;;  %v9024_v50 = vld [vmem:[#allocation20_spill] sm:$0xff]  ;;  %v9025_v45 = vld [vmem:[#allocation7_spill] sm:$0xff] }
 0x208   : > { %v6030_v46 = vpop.f32.mrf.mxu1  ;;  %v4755_v47 = vadd.f32 %v6063_v24, %v4285_v59  ;;  %v4860_v24 = vmul.f32 %v8743_v27, %v8743_v27  ;;  %v3562_v16 = vadd.f32 %v9024_v50, %v3203_v4  ;;  %v3206_v44 = vadd.f32 %v8613_v54, %v9025_v45 }
 0x209   : > { %v4858_v55 = vmul.f32 %v8727_v42, %v8727_v42  ;;  %v4753_v36 = vadd.f32 %v4674_v19, %v4283_v23  ;;  %4924 = vxpose.xlu0.b32.cont [8/16] (narrow) %v8678_v20, 8  ;;  %v4888_v14 = vadd.f32 %v4887_v25, %v4857_v63  ;;  %v4820_v15 = vadd.f32 %v4819_v33, %v8727_v42  ;;  %v9026_v23 = vld [vmem:[#allocation22_spill] sm:$0xff] }
 0x20a   : > { %v6067_v12 = vpop.f32.mrf.mxu0  ;;  %v4286_v6 = vadd.f32 %v6030_v46, %v8594_v38  ;;  %v4207_v30 = vpop.f32.mrf.mxu1  ;;  %v4794_v8 = vadd.f32 %v8651_v49, %v4755_v47 }
 0x20b   : > { %v4792_v22 = vadd.f32 %v8651_v49, %v4753_v36  ;;  %v4284_v29 = vadd.f32 %v4207_v30, %v3558_v51  ;;  %v4821_v20 = vadd.f32 %v4820_v15, %v8731_v0  ;;  %v4889_v40 = vadd.f32 %v4888_v14, %v4858_v55  ;;  %v9027_v14 = vld [vmem:[#allocation24_spill] sm:$0xff]  ;;  %v9028_v15 = vld [vmem:[#allocation10_spill] sm:$0xff] }
 0x20c   : > { %v4690_v26 = vpop.f32.mrf.mxu0  ;;  %v6033_v60 = vpop.f32.mrf.mxu1  ;;  %v4756_v34 = vadd.f32 %v6064_v3, %v4286_v6  ;;  %v4863_v63 = vmul.f32 %v4794_v8, %v4794_v8  ;;  %v3207_v6 = vadd.f32 %v8620_v5, %v9028_v15 }
 0x20d   : > { %v4754_v9 = vadd.f32 %v4677_v53, %v4284_v29  ;;  %4925 = vxpose.xlu0.b32.cont [9/16] (narrow) %v8685_v21, 8  ;;  %v4890_v56 = vadd.f32 %v4889_v40, %v4859_v17  ;;  %v4822_v58 = vadd.f32 %v4821_v20, %v8743_v27  ;;  %4949 = vxpose.xlu1.b32.start [1/16] (narrow) %v4792_v22, 8  ;;  %v9023_v21 = vld [vmem:[#allocation18_spill] sm:$0xff] }
 0x20e   : > { %v6068_v38 = vpop.f32.mrf.mxu0  ;;  %v4220_v18 = vpop.f32.mrf.mxu1  ;;  %v4861_v61 = vmul.f32 %v4792_v22, %v4792_v22  ;;  %v4289_v39 = vadd.f32 %v6033_v60, %v9023_v21  ;;  %v4795_v11 = vadd.f32 %v8651_v49, %v4756_v34  ;;  %v9030_v34 = vld [vmem:[#allocation13_spill] sm:$0xff] }
 0x20f   : > { %v4793_v62 = vadd.f32 %v8651_v49, %v4754_v9  ;;  %v4287_v19 = vadd.f32 %v4220_v18, %v3561_v1  ;;  %v4823_v13 = vadd.f32 %v4822_v58, %v4792_v22  ;;  %v4891_v7 = vadd.f32 %v4890_v56, %v4860_v24  ;;  %v9029_v56 = vld [vmem:[#allocation4_spill] sm:$0xff] }
 0x210   : > { %v4693_v28 = vpop.f32.mrf.mxu0  ;;  %v6034_v31 = vpop.f32.mrf.mxu1  ;;  %v4759_v55 = vadd.f32 %v6067_v12, %v4289_v39  ;;  %v4864_v22 = vmul.f32 %v4795_v11, %v4795_v11  ;;  %v3566_v58 = vadd.f32 %v9029_v56, %v3207_v6  ;;  %v9031_v18 = vld [vmem:[#allocation8_spill] sm:$0xff]  ;;  %v9036_v6 = vld [vmem:[#allocation2_spill] sm:$0xff] }
 0x211   : > { %v4862_v3 = vmul.f32 %v4793_v62, %v4793_v62  ;;  %v4757_v2 = vadd.f32 %v4690_v26, %v4287_v19  ;;  %4926 = vxpose.xlu0.b32.cont [10/16] (narrow) %v8697_v37, 8  ;;  %v4892_v35 = vadd.f32 %v4891_v7, %v4861_v61  ;;  %v4824_v59 = vadd.f32 %v4823_v13, %v4793_v62  ;;  %v9032_v61 = vld [vmem:[#allocation3_spill] sm:$0xff] }
 0x212   : > { %v6071_v57 = vpop.f32.mrf.mxu0  ;;  %v4290_v53 = vadd.f32 %v6034_v31, %v9026_v23  ;;  %4950 = vxpose.xlu1.b32.cont [2/16] (narrow) %v4793_v62, 8  ;;  %v4223_v33 = vpop.f32.mrf.mxu1  ;;  %v3565_v37 = vadd.f32 %v9027_v14, %v3206_v44  ;;  %v8775_v4 = vadd.f32 %v8651_v49, %v4759_v55 }
 0x213   : > { %v4288_v25 = vadd.f32 %v4223_v33, %v3562_v16  ;;  %v4825_v51 = vadd.f32 %v4824_v59, %v4794_v8  ;;  %v4893_v32 = vadd.f32 %v4892_v35, %v4862_v3  ;;  %v4796_v54 = vadd.f32 %v8651_v49, %v4757_v2  ;;  %v9033_v2 = vld [vmem:[#allocation6_spill] sm:$0xff]  ;;  %v9034_v59 = vld [vmem:[#allocation15_spill] sm:$0xff] }
 0x214   : > { %v4706_v46 = vpop.f32.mrf.mxu0  ;;  %v6037_v36 = vpop.f32.mrf.mxu1  ;;  %v4760_v17 = vadd.f32 %v6068_v38, %v4290_v53  ;;  %v3210_v38 = vadd.f32 %v9031_v18, %v9030_v34  ;;  %v4867_v16 = vmul.f32 %v8775_v4, %v8775_v4  ;;  %v3211_v23 = vadd.f32 %v8636_v43, %v9034_v59 }
 0x215   : > { %v4758_v30 = vadd.f32 %v4693_v28, %v4288_v25  ;;  %4927 = vxpose.xlu0.b32.cont [11/16] (narrow) %v8694_v41, 8  ;;  %v4894_v29 = vadd.f32 %v4893_v32, %v4863_v63  ;;  %v4826_v26 = vadd.f32 %v4825_v51, %v4795_v11  ;;  %v4293_v12 = vadd.f32 %v6037_v36, %v8615_v48 }
 0x216   : > { %v6072_v47 = vpop.f32.mrf.mxu0  ;;  %4951 = vxpose.xlu1.b32.cont [3/16] (narrow) %v4794_v8, 8  ;;  %v4236_v20 = vpop.f32.mrf.mxu1  ;;  %v4865_v9 = vmul.f32 %v4796_v54, %v4796_v54  ;;  %v8782_v28 = vadd.f32 %v8651_v49, %v4760_v17  ;;  %v3569_v35 = vadd.f32 %v9033_v2, %v3210_v38 }
 0x217   : > { %v4797_v40 = vadd.f32 %v8651_v49, %v4758_v30  ;;  %v4291_v60 = vadd.f32 %v4236_v20, %v3565_v37  ;;  %v4827_v5 = vadd.f32 %v4826_v26, %v4796_v54  ;;  %v4895_v24 = vadd.f32 %v4894_v29, %v4864_v22  ;;  %v9035_v37 = vld [vmem:[#allocation12_spill] sm:$0xff]  ;;  %v9037_v29 = vld [vmem:[#allocation14_spill] sm:$0xff] }
 0x218   : > { %v4709_v1 = vpop.f32.mrf.mxu0  ;;  %v6038_v41 = vpop.f32.mrf.mxu1  ;;  %v4763_v39 = vadd.f32 %v6071_v57, %v4293_v12  ;;  %v4868_v57 = vmul.f32 %v8782_v28, %v8782_v28  ;;  %v3570_v30 = vadd.f32 %v9036_v6, %v3211_v23 }
 0x219   : > { %v4866_v8 = vmul.f32 %v4797_v40, %v4797_v40  ;;  %v4761_v62 = vadd.f32 %v4706_v46, %v4291_v60  ;;  %4928 = vxpose.xlu0.b32.cont [12/16] (narrow) %v8709_v52, 8  ;;  %v4896_v19 = vadd.f32 %v4895_v24, %v4865_v9  ;;  %v4828_v13 = vadd.f32 %v4827_v5, %v4797_v40 }
 0x21a   : > { %v6075_v48 = vpop.f32.mrf.mxu0  ;;  %v4294_v7 = vadd.f32 %v6038_v41, %v9032_v61  ;;  %4952 = vxpose.xlu1.b32.cont [4/16] (narrow) %v4795_v11, 8  ;;  %v4239_v21 = vpop.f32.mrf.mxu1  ;;  %v4802_v51 = vadd.f32 %v8651_v49, %v4763_v39 }
 0x21b   : > { %v4292_v31 = vadd.f32 %v4239_v21, %v3566_v58  ;;  %v4829_v45 = vadd.f32 %v4828_v13, %v8775_v4  ;;  %v4897_v44 = vadd.f32 %v4896_v19, %v4866_v8  ;;  %v4800_v52 = vadd.f32 %v8651_v49, %v4761_v62 }
 0x21c   : > { %v4722_v50 = vpop.f32.mrf.mxu0  ;;  %v6041_v3 = vpop.f32.mrf.mxu1  ;;  %v4764_v63 = vadd.f32 %v6072_v47, %v4294_v7 }
 0x21d   : > { %v4762_v53 = vadd.f32 %v4709_v1, %v4292_v31  ;;  %4929 = vxpose.xlu0.b32.cont [13/16] (narrow) %v8717_v10, 8  ;;  %v4898_v11 = vadd.f32 %v4897_v44, %v4867_v16  ;;  %v4830_v33 = vadd.f32 %v4829_v45, %v8782_v28  ;;  %v4869_v43 = vmul.f32 %v4800_v52, %v4800_v52 }
 0x21e   : > { %4953 = vxpose.xlu1.b32.cont [5/16] (narrow) %v4796_v54, 8  ;;  %v4252_v25 = vpop.f32.mrf.mxu1  ;;  %v6076_v46 = vpop.f32.mrf.mxu0  ;;  %v4297_v10 = vadd.f32 %v6041_v3, %v9035_v37  ;;  %v4803_v17 = vadd.f32 %v8651_v49, %v4764_v63  ;;  %v4871_v1 = vmul.f32 %v4802_v51, %v4802_v51 }
 0x21f   : > { %v4801_v32 = vadd.f32 %v8651_v49, %v4762_v53  ;;  %v4295_v55 = vadd.f32 %v4252_v25, %v3569_v35  ;;  %v4831_v36 = vadd.f32 %v4830_v33, %v4800_v52  ;;  %v4899_v14 = vadd.f32 %v4898_v11, %v4868_v57 }
 0x220   : > { %v6042_v15 = vpop.f32.mrf.mxu1  ;;  %v4725_v60 = vpop.f32.mrf.mxu0  ;;  %v4767_v56 = vadd.f32 %v6075_v48, %v4297_v10 }
 0x221   : > { %v4870_v22 = vmul.f32 %v4801_v32, %v4801_v32  ;;  %v4298_v26 = vadd.f32 %v6042_v15, %v9037_v29  ;;  %v4765_v47 = vadd.f32 %v4722_v50, %v4295_v55  ;;  %4930 = vxpose.xlu0.b32.cont [14/16] (narrow) %v8727_v42, 8  ;;  %v4900_v54 = vadd.f32 %v4899_v14, %v4869_v43 }
 0x222   : > { %v4832_v20 = vadd.f32 %v4831_v36, %v4801_v32  ;;  %4954 = vxpose.xlu1.b32.cont [6/16] (narrow) %v4797_v40, 8  ;;  %v4255_v12 = vpop.f32.mrf.mxu1  ;;  %v4872_v42 = vmul.f32 %v4803_v17, %v4803_v17  ;;  %v4806_v62 = vadd.f32 %v8651_v49, %v4767_v56 }
 0x223   : > { %v4296_v5 = vadd.f32 %v4255_v12, %v3570_v30  ;;  %v4768_v9 = vadd.f32 %v6076_v46, %v4298_v26  ;;  %v4901_v41 = vadd.f32 %v4900_v54, %v4870_v22  ;;  %v4804_v58 = vadd.f32 %v8651_v49, %v4765_v47 }
 0x224   : > { %v4833_v24 = vadd.f32 %v4832_v20, %v4802_v51 }
 0x225   : > { %v4807_v34 = vadd.f32 %v8651_v49, %v4768_v9  ;;  %v4766_v18 = vadd.f32 %v4725_v60, %v4296_v5  ;;  %4931 = vxpose.xlu0.b32.cont [15/16] (narrow) %v8731_v0, 8  ;;  %v4902_v38 = vadd.f32 %v4901_v41, %v4871_v1  ;;  %v4873_v13 = vmul.f32 %v4804_v58, %v4804_v58 }
 0x226   : > { %v4834_v8 = vadd.f32 %v4833_v24, %v4803_v17  ;;  %4955 = vxpose.xlu1.b32.cont [7/16] (narrow) %v8775_v4, 8  ;;  %v4875_v0 = vmul.f32 %v4806_v62, %v4806_v62 }
 0x227   : > { %v4805_v40 = vadd.f32 %v8651_v49, %v4766_v18  ;;  %v4903_v61 = vadd.f32 %v4902_v38, %v4872_v42  ;;  %v4876_v50 = vmul.f32 %v4807_v34, %v4807_v34 }
 0x228   : > { %v4835_v19 = vadd.f32 %v4834_v8, %v4804_v58 }
 0x229   : > { %v4874_v48 = vmul.f32 %v4805_v40, %v4805_v40  ;;  %4932 = vxpose.xlu0.b32.end [16/16] (narrow) %v8743_v27, 8  ;;  %v4904_v7 = vadd.f32 %v4903_v61, %v4873_v13 }
 0x22a   : > { %v4836_v21 = vadd.f32 %v4835_v19, %v4805_v40  ;;  %4956 = vxpose.xlu1.b32.cont [8/16] (narrow) %v8782_v28, 8 }
 0x22b   : > { %v4905_v31 = vadd.f32 %v4904_v7, %v4874_v48 }
 0x22c   : > { %v4837_v39 = vadd.f32 %v4836_v21, %v4806_v62 }
 0x22d   : > { %v4906_v16 = vadd.f32 %v4905_v31, %v4875_v0 }
 0x22e   : > { %v4838_v4 = vadd.f32 %v4837_v39, %v4807_v34  ;;  %4957 = vxpose.xlu1.b32.cont [9/16] (narrow) %v4800_v52, 8 }
 0x22f   : > { %v4907_v49 = vadd.f32 %v4906_v16, %v4876_v50 }
 0x230   : > { %v4839_v45 = vrot.slane %v4838_v4, 4 }
 0x231   : > { %v4908_v3 = vrot.slane %v4907_v49, 4 }
 0x232   : > { %v4840_v44 = vadd.f32 %v4839_v45, %v4838_v4  ;;  %4958 = vxpose.xlu1.b32.cont [10/16] (narrow) %v4801_v32, 8 }
 0x233   : > { %v4909_v35 = vadd.f32 %v4908_v3, %v4907_v49 }
 0x234   : > { %v4841_v2 = vrot.slane %v4840_v44, 2 }
 0x235   : > { %v4910_v59 = vrot.slane %v4909_v35, 2 }
 0x236   : > { %v4842_v27 = vadd.f32 %v4841_v2, %v4840_v44  ;;  %4959 = vxpose.xlu1.b32.cont [11/16] (narrow) %v4802_v51, 8 }
 0x237   : > { %v4911_v23 = vadd.f32 %v4910_v59, %v4909_v35 }
 0x238   : > { %v4843_v28 = vrot.slane %v4842_v27, 1 }
 0x239   : > { %v4912_v53 = vrot.slane %v4911_v23, 1 }
 0x23a   : > { %4960 = vxpose.xlu1.b32.cont [12/16] (narrow) %v4803_v17, 8  ;;  %v4844_v52 = vadd.f32 %v4843_v28, %v4842_v27 }
 0x23b   : > { %v4913_v57 = vadd.f32 %v4912_v53, %v4911_v23 }
 0x23d   : > { %v4915_v11 = vsel %vm4914_vm8, %v4844_v52, %v4913_v57 }
 0x23e   : > { %4961 = vxpose.xlu1.b32.cont [13/16] (narrow) %v4804_v58, 8  ;;  %4916 = vst [vmem:[%s208_s20] sm:$0x3] %v4915_v11 }
 0x242   : > { %4962 = vxpose.xlu1.b32.cont [14/16] (narrow) %v4805_v40, 8 }
 0x246   : > { %4963 = vxpose.xlu1.b32.cont [15/16] (narrow) %v4806_v62, 8 }
 0x24a   : > { %4964 = vxpose.xlu1.b32.end [16/16] (narrow) %v4807_v34, 8 }
 0x269   : > { %v4933_v33 = vpop.trf.xlu0 }
 0x26a   : > { %4981 = vst [vmem:[%s204_s24] sm:$0xff] %v4933_v33 }
 0x28a   : > { %v4965_v63 = vpop.trf.xlu1 }
 0x28b   : > { %4982 = vst [vmem:[%s204_s24 + $0x8] sm:$0xff] %v4965_v63 }
 0x28c PF: > { %s15_s15 = sadd.s32 1, %s6154_s15  }
 0x28d   : > { %p12_p4 = scmp.ge.s32.totalorder %s15_s15, 4  }
 0x28f   :  { %14 = sbr.rel (!%p12_p4) target bundleno = 1 (0x1), region = 84 }

</bundles_post_ra>
